<compile_context>
chip_gen: v5e
topology: v5e:2x2
jax: 0.10.0
libtpu: 0.0.40
codegen_flags: <defaults>
</compile_context>

<pallas_src>
import jax
import jax.numpy as jnp
from jax.experimental import pallas as pl
from jax.experimental.pallas import tpu as pltpu

HID = 16                         # hidden_dim of TinyMoEModel
NUM_EXPERTS = 4                  # num_experts
TOK_WIDE = 128                   # per-token fused stage-1 width (lane-dense)
MLP_OFF = NUM_EXPERTS * HID      # 64 : residual-expert columns
GATE_OFF = MLP_OFF + HID         # 80 : gate logit columns (4 wide, no bias)
COEF_OFF = GATE_OFF + NUM_EXPERTS  # 84 : coefficient logit columns (2 wide)
TOKENS_PER_ROW = 8               # 8 tokens x 16 features = 128 lanes per I/O row
MAX_TOKEN_TILE = 4096            # tokens per grid step (review: 2048-8192 depending on chip)


def _cdiv(a, b):
    return (a + b - 1) // b


def _round_up(a, b):
    return _cdiv(a, b) * b


def tiny_moe_kernel(xp_ref, w1_ref, b1_ref, w2s_ref, bsel_ref, bout_ref, yp_ref):
    # xp: (TP, 128) with 8 tokens per row (token t of a row lives in lanes [16t, 16t+16)).
    xp = xp_ref[...]

    # ---- fused stage 1 (input_layer folded in): one lane-dense MXU op ----
    # per token block (128 lanes): [expert fc1 (4x16) | residual fc1 (16) | gate (4) | coef (2) | 0]
    s1 = jnp.dot(xp, w1_ref[...], preferred_element_type=jnp.float32) + b1_ref[...]  # (TP, 1024)
    a1 = jnp.maximum(s1, 0.0)        # relu; gate/coef/pad columns get zero weight rows downstream

    # loop-invariant lane iotas (hoisted; 2-D iota as required by Mosaic)
    lane = jax.lax.broadcasted_iota(jnp.int32, (1, TOK_WIDE), 1)     # (1, 128)
    lane8 = jax.lax.broadcasted_iota(jnp.int32, (1, 8), 1)           # (1, 8)
    is_res_lane = (lane >= MLP_OFF) & (lane < GATE_OFF)              # residual-expert columns

    # ---- per-token-block gate / coefficient epilogue (8 blocks per packed row) ----
    mult_blocks = []
    for t in range(TOKENS_PER_ROW):
        base = t * TOK_WIDE
        gc = s1[:, base + GATE_OFF:base + GATE_OFF + 8]              # (TP,8): g0..g3, c0, c1, 0, 0
        g0 = gc[:, 0:1]
        g1 = gc[:, 1:2]
        g2 = gc[:, 2:3]
        g3 = gc[:, 3:4]
        gmax = jnp.maximum(jnp.maximum(g0, g1), jnp.maximum(g2, g3))
        cmax = jnp.maximum(gc[:, 4:5], gc[:, 5:6])
        # one dense exp over the slab (gate columns use gmax, coef columns use cmax)
        es = jnp.exp(gc - jnp.where(lane8 < NUM_EXPERTS, gmax, cmax))
        gsum = (es[:, 0:1] + es[:, 1:2]) + (es[:, 2:3] + es[:, 3:4])
        csum = es[:, 4:5] + es[:, 5:6]
        inv_c = pl.reciprocal(csum)                                  # exact (keeps f32 parity)
        coef1 = es[:, 5:6] * inv_c
        gsc = es[:, 4:5] * inv_c * pl.reciprocal(gsum)               # coef0 * top1 gate prob

        # first-max-wins argmax over the 4 gate logits (matches jnp/torch argmax)
        sel = jnp.where(g0 == gmax, 0,
                        jnp.where(g1 == gmax, 1,
                                  jnp.where(g2 == gmax, 2, 3)))      # (TP,1) int32
        sel16 = sel * HID
        is_sel_lane = (lane >= sel16) & (lane < sel16 + HID)         # winning expert's 16 columns
        # lane-dense per-token scaling mask for this token block
        mult_blocks.append(jnp.where(is_sel_lane, gsc,
                                     jnp.where(is_res_lane, coef1, 0.0)))   # (TP,128)

    mult = jnp.concatenate(mult_blocks, axis=-1)                     # (TP, 1024)

    # ---- fused stage 2 + combine + output_layer (folded) ----
    # y[token] = (relu(s1)*mult) @ W2S + mult @ Bsel + b_out, deposited lane-dense (8 tokens/row)
    yp_ref[...] = (jnp.dot(a1 * mult, w2s_ref[...], preferred_element_type=jnp.float32)
                   + jnp.dot(mult, bsel_ref[...], preferred_element_type=jnp.float32)
                   + bout_ref[...])


def pack_params(params):
    """Pack the 15 raw (in,out)-layout params into 5 lane-dense fused buffers,
    folding input_layer (w_in,b_in) and output_layer (w_out) into the MoE weights."""
    (w_in, b_in, wg, w1, b1, w2, b2, wm1, bm1, wm2, bm2, wc, bc, w_out, b_out) = params
    H, E, W, P = HID, NUM_EXPERTS, TOK_WIDE, TOKENS_PER_ROW

    # stage-1 fused weight/bias in (16 -> 128) layout: [w1[0..3] | wm1 | wg | wc | 0]
    w1cat = jnp.zeros((H, W), jnp.float32)
    w1cat = w1cat.at[:, 0:E * H].set(jnp.concatenate([w1[e] for e in range(E)], axis=1))
    w1cat = w1cat.at[:, MLP_OFF:MLP_OFF + H].set(wm1)
    w1cat = w1cat.at[:, GATE_OFF:GATE_OFF + E].set(wg)
    w1cat = w1cat.at[:, COEF_OFF:COEF_OFF + 2].set(wc)
    b1cat = jnp.zeros((1, W), jnp.float32)
    b1cat = b1cat.at[0, 0:E * H].set(b1.reshape(-1))
    b1cat = b1cat.at[0, MLP_OFF:MLP_OFF + H].set(bm1.reshape(-1))
    b1cat = b1cat.at[0, COEF_OFF:COEF_OFF + 2].set(bc.reshape(-1))   # gate has no bias

    # fold input_layer:  s1 = x @ (w_in @ w1cat) + (b_in @ w1cat + b1cat)
    W1 = w_in @ w1cat                                                # (16, 128)
    B1 = b_in @ w1cat + b1cat                                        # (1, 128)

    # fold output_layer into the per-expert second matmuls (scalars gate/coef commute)
    w2o = [w2[e] @ w_out for e in range(E)]
    wm2o = wm2 @ w_out
    b2o = [b2[e] @ w_out for e in range(E)]
    bm2o = (bm2 @ w_out).reshape(-1)

    # stacked second-stage weights (selector already applied): rows >= GATE_OFF stay zero,
    # so relu-ing the gate/coef/pad columns in the kernel is harmless.
    W2S = jnp.zeros((W, H), jnp.float32)
    Bsel = jnp.zeros((W, H), jnp.float32)
    for e in range(E):
        W2S = W2S.at[e * H:(e + 1) * H, :].set(w2o[e])
        Bsel = Bsel.at[e * H:(e + 1) * H, :].set(jnp.diag(b2o[e]))
    W2S = W2S.at[MLP_OFF:MLP_OFF + H, :].set(wm2o)
    Bsel = Bsel.at[MLP_OFF:MLP_OFF + H, :].set(jnp.diag(bm2o))

    # 8-tokens-per-row block-diagonal "big" weights for lane-dense packed I/O
    W1_big = jnp.zeros((P * H, P * W), jnp.float32)                  # (128, 1024)
    W2S_big = jnp.zeros((P * W, P * H), jnp.float32)                 # (1024, 128)
    Bsel_big = jnp.zeros((P * W, P * H), jnp.float32)                # (1024, 128)
    for t in range(P):
        W1_big = W1_big.at[t * H:(t + 1) * H, t * W:(t + 1) * W].set(W1)
        W2S_big = W2S_big.at[t * W:(t + 1) * W, t * H:(t + 1) * H].set(W2S)
        Bsel_big = Bsel_big.at[t * W:(t + 1) * W, t * H:(t + 1) * H].set(Bsel)
    B1_big = jnp.tile(B1, (1, P))                                    # (1, 1024)
    Bout_big = jnp.tile(b_out, (1, P))                               # (1, 128)
    return (W1_big, B1_big, W2S_big, Bsel_big, Bout_big)


def tiny_moe_forward(x, packed_params):
    B, T, H = x.shape
    assert H == HID
    N = B * T
    W1_big, B1_big, W2S_big, Bsel_big, Bout_big = packed_params

    # Token tile: large (amortize ~0.35us/step), but always >= 2 roughly balanced grid steps
    # so ("parallel",) can shard across both v7x TensorCores. Tile is a multiple of 64 tokens
    # (8 packed rows) so packed blocks satisfy the (8,128) constraint.
    desired_steps = max(2, _cdiv(N, MAX_TOKEN_TILE))
    tile = min(MAX_TOKEN_TILE, _round_up(_cdiv(N, desired_steps), TOKENS_PER_ROW * 8))
    n_tiles = max(2, _cdiv(N, tile))
    n_pad = n_tiles * tile
    tp = tile // TOKENS_PER_ROW                                      # packed rows per step

    xf = x.reshape(N, H)
    if n_pad != N:
        xf = jnp.pad(xf, ((0, n_pad - N), (0, 0)))                   # zero-padded tail, sliced off
    xp = xf.reshape(n_pad // TOKENS_PER_ROW, TOKENS_PER_ROW * H)     # lane-dense: 8 tokens / row

    def const_spec(shape):
        return pl.BlockSpec(shape, lambda i, _n=len(shape): (0,) * _n)

    yp = pl.pallas_call(
        tiny_moe_kernel,
        out_shape=jax.ShapeDtypeStruct(xp.shape, jnp.float32),
        grid_spec=pltpu.PrefetchScalarGridSpec(
            num_scalar_prefetch=0,
            grid=(n_tiles,),
            in_specs=[
                pl.BlockSpec((tp, TOKENS_PER_ROW * H), lambda i: (i, 0)),   # packed tokens
                const_spec(W1_big.shape),                                    # (128, 1024)
                const_spec(B1_big.shape),                                    # (1, 1024)
                const_spec(W2S_big.shape),                                   # (1024, 128)
                const_spec(Bsel_big.shape),                                  # (1024, 128)
                const_spec(Bout_big.shape),                                  # (1, 128)
            ],
            out_specs=pl.BlockSpec((tp, TOKENS_PER_ROW * H), lambda i: (i, 0)),
        ),
        compiler_params=pltpu.CompilerParams(
            dimension_semantics=("parallel",),
            vmem_limit_bytes=32 * 1024 * 1024),
    )(xp, W1_big, B1_big, W2S_big, Bsel_big, Bout_big)

    return yp.reshape(n_pad, H)[:N].reshape(B, T, H)


def make_params(key):
    """Deterministic synthetic params, pre-transposed to (in, out) layout."""
    ks = list(jax.random.split(key, 16))

    def lin(k, din, dout, scale=0.1):
        return jax.random.normal(k, (din, dout), jnp.float32) * scale

    w_in = lin(ks[0], HID, HID); b_in = lin(ks[1], 1, HID)
    wg = lin(ks[2], HID, NUM_EXPERTS)                                # gate: no bias
    w1 = jax.random.normal(ks[3], (NUM_EXPERTS, HID, HID), jnp.float32) * 0.1
    b1 = jax.random.normal(ks[4], (NUM_EXPERTS, HID), jnp.float32) * 0.1
    w2 = jax.random.normal(ks[5], (NUM_EXPERTS, HID, HID), jnp.float32) * 0.1
    b2 = jax.random.normal(ks[6], (NUM_EXPERTS, HID), jnp.float32) * 0.1
    wm1 = lin(ks[7], HID, HID); bm1 = lin(ks[8], 1, HID)
    wm2 = lin(ks[9], HID, HID); bm2 = lin(ks[10], 1, HID)
    wc = lin(ks[11], HID, 2); bc = lin(ks[12], 1, 2)
    w_out = lin(ks[13], HID, HID); b_out = lin(ks[14], 1, HID)
    return (w_in, b_in, wg, w1, b1, w2, b2, wm1, bm1, wm2, bm2,
            wc, bc, w_out, b_out)


def tiny_moe_ref(x, params):
    """Pure-JAX reference mirroring the torch forward semantics."""
    (w_in, b_in, wg, w1, b1, w2, b2, wm1, bm1, wm2, bm2,
     wc, bc, w_out, b_out) = params
    B, T, H = x.shape
    xf = x.reshape(-1, H)
    h = xf @ w_in + b_in
    probs = jax.nn.softmax(h @ wg, axis=-1)
    top1 = jnp.argmax(probs, axis=-1)
    gate_val = jnp.take_along_axis(probs, top1[:, None], axis=-1)
    expert_outs = []
    for e in range(NUM_EXPERTS):
        eo = jnp.maximum(h @ w1[e] + b1[e], 0.0) @ w2[e] + b2[e]
        expert_outs.append(eo)
    expert_outs = jnp.stack(expert_outs, axis=1)
    sel = jnp.take_along_axis(expert_outs, top1[:, None, None], axis=1)[:, 0, :]
    out_moe = gate_val * sel
    mlp_out = jnp.maximum(h @ wm1 + bm1, 0.0) @ wm2 + bm2
    coef = jax.nn.softmax(h @ wc + bc, axis=-1)
    combined = out_moe * coef[:, 0:1] + mlp_out * coef[:, 1:2]
    y = combined @ w_out + b_out
    return y.reshape(B, T, H)


if __name__ == "__main__":
    key = jax.random.PRNGKey(0)
    k_x, k_p, k_x2 = jax.random.split(key, 3)
    params = make_params(k_p)
    packed = pack_params(params)

    # small shape from the spec: batch=2, seq=8, hidden=16 (exercises heavy tail padding)
    batch, seq = 2, 8
    x = jax.random.normal(k_x, (batch, seq, HID), jnp.float32)
    y = tiny_moe_forward(x, packed)
    jax.block_until_ready(y)
    y_ref = tiny_moe_ref(x, params)
    assert y.shape == (batch, seq, HID)
    assert jnp.allclose(y, y_ref, atol=2e-5, rtol=2e-5), "mismatch vs reference (small)"

    # second check exercising balanced multi-tile grid + non-multiple-of-tile padding
    batch2, seq2 = 2, 700                                            # N=1400 -> 2 tiles of 704
    x2 = jax.random.normal(k_x2, (batch2, seq2, HID), jnp.float32)
    y2 = tiny_moe_forward(x2, packed)
    jax.block_until_ready(y2)
    y2_ref = tiny_moe_ref(x2, params)
    assert jnp.allclose(y2, y2_ref, atol=2e-5, rtol=2e-5), "mismatch vs reference (tiled)"

    print("KERNEL_OK")
</pallas_src>

<mosaic_0001>
module attributes {stable_mosaic.version = 11 : i64} {
  func.func @tiny_moe_kernel(%arg0: i32, %arg1: memref<8x128xf32, #tpu.memory_space<vmem>>, %arg2: memref<128x1024xf32, #tpu.memory_space<vmem>>, %arg3: memref<1x1024xf32, #tpu.memory_space<vmem>>, %arg4: memref<1024x128xf32, #tpu.memory_space<vmem>>, %arg5: memref<1024x128xf32, #tpu.memory_space<vmem>>, %arg6: memref<1x128xf32, #tpu.memory_space<vmem>>, %arg7: memref<8x128xf32, #tpu.memory_space<vmem>>) attributes {dimension_semantics = [#tpu.dimension_semantics<parallel>], iteration_bounds = array<i64: 2>, scalar_prefetch = 0 : i64, scratch_operands = 0 : i64, tpu.core_type = #tpu.core_type<tc>, window_params = [{transform_indices = @transform_0, window_bounds = array<i64: 8, 128>}, {pipeline_mode = #tpu.pipeline_mode<synchronous>, transform_indices = @transform_1, window_bounds = array<i64: 128, 1024>}, {pipeline_mode = #tpu.pipeline_mode<synchronous>, transform_indices = @transform_2, window_bounds = array<i64: 1, 1024>}, {pipeline_mode = #tpu.pipeline_mode<synchronous>, transform_indices = @transform_3, window_bounds = array<i64: 1024, 128>}, {pipeline_mode = #tpu.pipeline_mode<synchronous>, transform_indices = @transform_4, window_bounds = array<i64: 1024, 128>}, {pipeline_mode = #tpu.pipeline_mode<synchronous>, transform_indices = @transform_5, window_bounds = array<i64: 1, 128>}, {transform_indices = @transform_6, window_bounds = array<i64: 8, 128>}]} {
    %c0 = arith.constant 0 : index
    %c0_0 = arith.constant 0 : index
    %0 = vector.load %arg1[%c0, %c0_0] : memref<8x128xf32, #tpu.memory_space<vmem>>, vector<8x128xf32>
    %c0_1 = arith.constant 0 : index
    %c0_2 = arith.constant 0 : index
    %1 = vector.load %arg2[%c0_1, %c0_2] : memref<128x1024xf32, #tpu.memory_space<vmem>>, vector<128x1024xf32>
    %cst = arith.constant dense<0.000000e+00> : vector<8x1024xf32>
    %2 = tpu.matmul %0, %1, %cst {dimension_numbers = #tpu.dot_dimension_numbers<[1], [0], [0], [1], [0, 0, 1, 1], [], []>} : vector<8x128xf32>, vector<128x1024xf32>, vector<8x1024xf32> -> vector<8x1024xf32>
    %c0_3 = arith.constant 0 : index
    %c0_4 = arith.constant 0 : index
    %3 = vector.load %arg3[%c0_3, %c0_4] : memref<1x1024xf32, #tpu.memory_space<vmem>>, vector<1x1024xf32>
    %4 = vector.broadcast %3 : vector<1x1024xf32> to vector<8x1024xf32>
    %5 = arith.addf %2, %4 : vector<8x1024xf32>
    %cst_5 = arith.constant 0.000000e+00 : f32
    %6 = vector.broadcast %cst_5 : f32 to vector<8x1024xf32>
    %7 = arith.maximumf %5, %6 : vector<8x1024xf32>
    %8 = tpu.iota {dimensions = array<i32: 1>} : vector<1x128xi32>
    %9 = tpu.iota {dimensions = array<i32: 1>} : vector<1x8xi32>
    %c64_i32 = arith.constant 64 : i32
    %10 = vector.broadcast %c64_i32 : i32 to vector<1x128xi32>
    %11 = arith.cmpi sge, %8, %10 : vector<1x128xi32>
    %c80_i32 = arith.constant 80 : i32
    %12 = vector.broadcast %c80_i32 : i32 to vector<1x128xi32>
    %13 = arith.cmpi slt, %8, %12 : vector<1x128xi32>
    %14 = arith.andi %11, %13 : vector<1x128xi1>
    %15 = vector.extract_strided_slice %5 {offsets = [0, 80], sizes = [8, 8], strides = [1, 1]} : vector<8x1024xf32> to vector<8x8xf32>
    %16 = vector.extract_strided_slice %15 {offsets = [0, 0], sizes = [8, 1], strides = [1, 1]} : vector<8x8xf32> to vector<8x1xf32>
    %17 = vector.extract_strided_slice %15 {offsets = [0, 1], sizes = [8, 1], strides = [1, 1]} : vector<8x8xf32> to vector<8x1xf32>
    %18 = vector.extract_strided_slice %15 {offsets = [0, 2], sizes = [8, 1], strides = [1, 1]} : vector<8x8xf32> to vector<8x1xf32>
    %19 = vector.extract_strided_slice %15 {offsets = [0, 3], sizes = [8, 1], strides = [1, 1]} : vector<8x8xf32> to vector<8x1xf32>
    %20 = arith.maximumf %16, %17 : vector<8x1xf32>
    %21 = arith.maximumf %18, %19 : vector<8x1xf32>
    %22 = arith.maximumf %20, %21 : vector<8x1xf32>
    %23 = vector.extract_strided_slice %15 {offsets = [0, 4], sizes = [8, 1], strides = [1, 1]} : vector<8x8xf32> to vector<8x1xf32>
    %24 = vector.extract_strided_slice %15 {offsets = [0, 5], sizes = [8, 1], strides = [1, 1]} : vector<8x8xf32> to vector<8x1xf32>
    %25 = arith.maximumf %23, %24 : vector<8x1xf32>
    %c4_i32 = arith.constant 4 : i32
    %26 = vector.broadcast %c4_i32 : i32 to vector<1x8xi32>
    %27 = arith.cmpi slt, %9, %26 : vector<1x8xi32>
    %28 = vector.shape_cast %27 : vector<1x8xi1> to vector<1x8xi1>
    %29 = vector.broadcast %28 : vector<1x8xi1> to vector<8x8xi1>
    %30 = vector.shape_cast %22 : vector<8x1xf32> to vector<8x1xf32>
    %31 = vector.broadcast %30 : vector<8x1xf32> to vector<8x8xf32>
    %32 = vector.shape_cast %25 : vector<8x1xf32> to vector<8x1xf32>
    %33 = vector.broadcast %32 : vector<8x1xf32> to vector<8x8xf32>
    %34 = arith.select %29, %31, %33 : vector<8x8xi1>, vector<8x8xf32>
    %35 = arith.subf %15, %34 : vector<8x8xf32>
    %36 = math.exp %35 : vector<8x8xf32>
    %37 = vector.extract_strided_slice %36 {offsets = [0, 0], sizes = [8, 1], strides = [1, 1]} : vector<8x8xf32> to vector<8x1xf32>
    %38 = vector.extract_strided_slice %36 {offsets = [0, 1], sizes = [8, 1], strides = [1, 1]} : vector<8x8xf32> to vector<8x1xf32>
    %39 = arith.addf %37, %38 : vector<8x1xf32>
    %40 = vector.extract_strided_slice %36 {offsets = [0, 2], sizes = [8, 1], strides = [1, 1]} : vector<8x8xf32> to vector<8x1xf32>
    %41 = vector.extract_strided_slice %36 {offsets = [0, 3], sizes = [8, 1], strides = [1, 1]} : vector<8x8xf32> to vector<8x1xf32>
    %42 = arith.addf %40, %41 : vector<8x1xf32>
    %43 = arith.addf %39, %42 : vector<8x1xf32>
    %44 = vector.extract_strided_slice %36 {offsets = [0, 4], sizes = [8, 1], strides = [1, 1]} : vector<8x8xf32> to vector<8x1xf32>
    %45 = vector.extract_strided_slice %36 {offsets = [0, 5], sizes = [8, 1], strides = [1, 1]} : vector<8x8xf32> to vector<8x1xf32>
    %46 = arith.addf %44, %45 : vector<8x1xf32>
    %47 = tpu.reciprocal %46 : vector<8x1xf32> -> vector<8x1xf32>
    %48 = vector.extract_strided_slice %36 {offsets = [0, 5], sizes = [8, 1], strides = [1, 1]} : vector<8x8xf32> to vector<8x1xf32>
    %49 = arith.mulf %48, %47 : vector<8x1xf32>
    %50 = vector.extract_strided_slice %36 {offsets = [0, 4], sizes = [8, 1], strides = [1, 1]} : vector<8x8xf32> to vector<8x1xf32>
    %51 = arith.mulf %50, %47 : vector<8x1xf32>
    %52 = tpu.reciprocal %43 : vector<8x1xf32> -> vector<8x1xf32>
    %53 = arith.mulf %51, %52 : vector<8x1xf32>
    %54 = arith.cmpf oeq, %16, %22 : vector<8x1xf32>
    %55 = arith.cmpf oeq, %17, %22 : vector<8x1xf32>
    %56 = arith.cmpf oeq, %18, %22 : vector<8x1xf32>
    %c2_i32 = arith.constant 2 : i32
    %c3_i32 = arith.constant 3 : i32
    %57 = vector.broadcast %c2_i32 : i32 to vector<8x1xi32>
    %58 = vector.broadcast %c3_i32 : i32 to vector<8x1xi32>
    %59 = arith.select %56, %57, %58 : vector<8x1xi1>, vector<8x1xi32>
    %c1_i32 = arith.constant 1 : i32
    %60 = vector.broadcast %c1_i32 : i32 to vector<8x1xi32>
    %61 = arith.select %55, %60, %59 : vector<8x1xi1>, vector<8x1xi32>
    %c0_i32 = arith.constant 0 : i32
    %62 = vector.broadcast %c0_i32 : i32 to vector<8x1xi32>
    %63 = arith.select %54, %62, %61 : vector<8x1xi1>, vector<8x1xi32>
    %c16_i32 = arith.constant 16 : i32
    %64 = vector.broadcast %c16_i32 : i32 to vector<8x1xi32>
    %65 = arith.muli %63, %64 : vector<8x1xi32>
    %66 = vector.broadcast %8 : vector<1x128xi32> to vector<8x128xi32>
    %67 = vector.broadcast %65 : vector<8x1xi32> to vector<8x128xi32>
    %68 = arith.cmpi sge, %66, %67 : vector<8x128xi32>
    %c16_i32_6 = arith.constant 16 : i32
    %69 = vector.broadcast %c16_i32_6 : i32 to vector<8x1xi32>
    %70 = arith.addi %65, %69 : vector<8x1xi32>
    %71 = vector.broadcast %8 : vector<1x128xi32> to vector<8x128xi32>
    %72 = vector.broadcast %70 : vector<8x1xi32> to vector<8x128xi32>
    %73 = arith.cmpi slt, %71, %72 : vector<8x128xi32>
    %74 = arith.andi %68, %73 : vector<8x128xi1>
    %cst_7 = arith.constant 0.000000e+00 : f32
    %75 = vector.shape_cast %14 : vector<1x128xi1> to vector<1x128xi1>
    %76 = vector.broadcast %75 : vector<1x128xi1> to vector<8x128xi1>
    %77 = vector.shape_cast %49 : vector<8x1xf32> to vector<8x1xf32>
    %78 = vector.broadcast %77 : vector<8x1xf32> to vector<8x128xf32>
    %79 = vector.broadcast %cst_7 : f32 to vector<8x128xf32>
    %80 = arith.select %76, %78, %79 : vector<8x128xi1>, vector<8x128xf32>
    %81 = vector.shape_cast %53 : vector<8x1xf32> to vector<8x1xf32>
    %82 = vector.broadcast %81 : vector<8x1xf32> to vector<8x128xf32>
    %83 = arith.select %74, %82, %80 : vector<8x128xi1>, vector<8x128xf32>
    %84 = vector.extract_strided_slice %5 {offsets = [0, 208], sizes = [8, 8], strides = [1, 1]} : vector<8x1024xf32> to vector<8x8xf32>
    %85 = vector.extract_strided_slice %84 {offsets = [0, 0], sizes = [8, 1], strides = [1, 1]} : vector<8x8xf32> to vector<8x1xf32>
    %86 = vector.extract_strided_slice %84 {offsets = [0, 1], sizes = [8, 1], strides = [1, 1]} : vector<8x8xf32> to vector<8x1xf32>
    %87 = vector.extract_strided_slice %84 {offsets = [0, 2], sizes = [8, 1], strides = [1, 1]} : vector<8x8xf32> to vector<8x1xf32>
    %88 = vector.extract_strided_slice %84 {offsets = [0, 3], sizes = [8, 1], strides = [1, 1]} : vector<8x8xf32> to vector<8x1xf32>
    %89 = arith.maximumf %85, %86 : vector<8x1xf32>
    %90 = arith.maximumf %87, %88 : vector<8x1xf32>
    %91 = arith.maximumf %89, %90 : vector<8x1xf32>
    %92 = vector.extract_strided_slice %84 {offsets = [0, 4], sizes = [8, 1], strides = [1, 1]} : vector<8x8xf32> to vector<8x1xf32>
    %93 = vector.extract_strided_slice %84 {offsets = [0, 5], sizes = [8, 1], strides = [1, 1]} : vector<8x8xf32> to vector<8x1xf32>
    %94 = arith.maximumf %92, %93 : vector<8x1xf32>
    %c4_i32_8 = arith.constant 4 : i32
    %95 = vector.broadcast %c4_i32_8 : i32 to vector<1x8xi32>
    %96 = arith.cmpi slt, %9, %95 : vector<1x8xi32>
    %97 = vector.shape_cast %96 : vector<1x8xi1> to vector<1x8xi1>
    %98 = vector.broadcast %97 : vector<1x8xi1> to vector<8x8xi1>
    %99 = vector.shape_cast %91 : vector<8x1xf32> to vector<8x1xf32>
    %100 = vector.broadcast %99 : vector<8x1xf32> to vector<8x8xf32>
    %101 = vector.shape_cast %94 : vector<8x1xf32> to vector<8x1xf32>
    %102 = vector.broadcast %101 : vector<8x1xf32> to vector<8x8xf32>
    %103 = arith.select %98, %100, %102 : vector<8x8xi1>, vector<8x8xf32>
    %104 = arith.subf %84, %103 : vector<8x8xf32>
    %105 = math.exp %104 : vector<8x8xf32>
    %106 = vector.extract_strided_slice %105 {offsets = [0, 0], sizes = [8, 1], strides = [1, 1]} : vector<8x8xf32> to vector<8x1xf32>
    %107 = vector.extract_strided_slice %105 {offsets = [0, 1], sizes = [8, 1], strides = [1, 1]} : vector<8x8xf32> to vector<8x1xf32>
    %108 = arith.addf %106, %107 : vector<8x1xf32>
    %109 = vector.extract_strided_slice %105 {offsets = [0, 2], sizes = [8, 1], strides = [1, 1]} : vector<8x8xf32> to vector<8x1xf32>
    %110 = vector.extract_strided_slice %105 {offsets = [0, 3], sizes = [8, 1], strides = [1, 1]} : vector<8x8xf32> to vector<8x1xf32>
    %111 = arith.addf %109, %110 : vector<8x1xf32>
    %112 = arith.addf %108, %111 : vector<8x1xf32>
    %113 = vector.extract_strided_slice %105 {offsets = [0, 4], sizes = [8, 1], strides = [1, 1]} : vector<8x8xf32> to vector<8x1xf32>
    %114 = vector.extract_strided_slice %105 {offsets = [0, 5], sizes = [8, 1], strides = [1, 1]} : vector<8x8xf32> to vector<8x1xf32>
    %115 = arith.addf %113, %114 : vector<8x1xf32>
    %116 = tpu.reciprocal %115 : vector<8x1xf32> -> vector<8x1xf32>
    %117 = vector.extract_strided_slice %105 {offsets = [0, 5], sizes = [8, 1], strides = [1, 1]} : vector<8x8xf32> to vector<8x1xf32>
    %118 = arith.mulf %117, %116 : vector<8x1xf32>
    %119 = vector.extract_strided_slice %105 {offsets = [0, 4], sizes = [8, 1], strides = [1, 1]} : vector<8x8xf32> to vector<8x1xf32>
    %120 = arith.mulf %119, %116 : vector<8x1xf32>
    %121 = tpu.reciprocal %112 : vector<8x1xf32> -> vector<8x1xf32>
    %122 = arith.mulf %120, %121 : vector<8x1xf32>
    %123 = arith.cmpf oeq, %85, %91 : vector<8x1xf32>
    %124 = arith.cmpf oeq, %86, %91 : vector<8x1xf32>
    %125 = arith.cmpf oeq, %87, %91 : vector<8x1xf32>
    %c2_i32_9 = arith.constant 2 : i32
    %c3_i32_10 = arith.constant 3 : i32
    %126 = vector.broadcast %c2_i32_9 : i32 to vector<8x1xi32>
    %127 = vector.broadcast %c3_i32_10 : i32 to vector<8x1xi32>
    %128 = arith.select %125, %126, %127 : vector<8x1xi1>, vector<8x1xi32>
    %c1_i32_11 = arith.constant 1 : i32
    %129 = vector.broadcast %c1_i32_11 : i32 to vector<8x1xi32>
    %130 = arith.select %124, %129, %128 : vector<8x1xi1>, vector<8x1xi32>
    %c0_i32_12 = arith.constant 0 : i32
    %131 = vector.broadcast %c0_i32_12 : i32 to vector<8x1xi32>
    %132 = arith.select %123, %131, %130 : vector<8x1xi1>, vector<8x1xi32>
    %c16_i32_13 = arith.constant 16 : i32
    %133 = vector.broadcast %c16_i32_13 : i32 to vector<8x1xi32>
    %134 = arith.muli %132, %133 : vector<8x1xi32>
    %135 = vector.broadcast %8 : vector<1x128xi32> to vector<8x128xi32>
    %136 = vector.broadcast %134 : vector<8x1xi32> to vector<8x128xi32>
    %137 = arith.cmpi sge, %135, %136 : vector<8x128xi32>
    %c16_i32_14 = arith.constant 16 : i32
    %138 = vector.broadcast %c16_i32_14 : i32 to vector<8x1xi32>
    %139 = arith.addi %134, %138 : vector<8x1xi32>
    %140 = vector.broadcast %8 : vector<1x128xi32> to vector<8x128xi32>
    %141 = vector.broadcast %139 : vector<8x1xi32> to vector<8x128xi32>
    %142 = arith.cmpi slt, %140, %141 : vector<8x128xi32>
    %143 = arith.andi %137, %142 : vector<8x128xi1>
    %cst_15 = arith.constant 0.000000e+00 : f32
    %144 = vector.shape_cast %14 : vector<1x128xi1> to vector<1x128xi1>
    %145 = vector.broadcast %144 : vector<1x128xi1> to vector<8x128xi1>
    %146 = vector.shape_cast %118 : vector<8x1xf32> to vector<8x1xf32>
    %147 = vector.broadcast %146 : vector<8x1xf32> to vector<8x128xf32>
    %148 = vector.broadcast %cst_15 : f32 to vector<8x128xf32>
    %149 = arith.select %145, %147, %148 : vector<8x128xi1>, vector<8x128xf32>
    %150 = vector.shape_cast %122 : vector<8x1xf32> to vector<8x1xf32>
    %151 = vector.broadcast %150 : vector<8x1xf32> to vector<8x128xf32>
    %152 = arith.select %143, %151, %149 : vector<8x128xi1>, vector<8x128xf32>
    %153 = vector.extract_strided_slice %5 {offsets = [0, 336], sizes = [8, 8], strides = [1, 1]} : vector<8x1024xf32> to vector<8x8xf32>
    %154 = vector.extract_strided_slice %153 {offsets = [0, 0], sizes = [8, 1], strides = [1, 1]} : vector<8x8xf32> to vector<8x1xf32>
    %155 = vector.extract_strided_slice %153 {offsets = [0, 1], sizes = [8, 1], strides = [1, 1]} : vector<8x8xf32> to vector<8x1xf32>
    %156 = vector.extract_strided_slice %153 {offsets = [0, 2], sizes = [8, 1], strides = [1, 1]} : vector<8x8xf32> to vector<8x1xf32>
    %157 = vector.extract_strided_slice %153 {offsets = [0, 3], sizes = [8, 1], strides = [1, 1]} : vector<8x8xf32> to vector<8x1xf32>
    %158 = arith.maximumf %154, %155 : vector<8x1xf32>
    %159 = arith.maximumf %156, %157 : vector<8x1xf32>
    %160 = arith.maximumf %158, %159 : vector<8x1xf32>
    %161 = vector.extract_strided_slice %153 {offsets = [0, 4], sizes = [8, 1], strides = [1, 1]} : vector<8x8xf32> to vector<8x1xf32>
    %162 = vector.extract_strided_slice %153 {offsets = [0, 5], sizes = [8, 1], strides = [1, 1]} : vector<8x8xf32> to vector<8x1xf32>
    %163 = arith.maximumf %161, %162 : vector<8x1xf32>
    %c4_i32_16 = arith.constant 4 : i32
    %164 = vector.broadcast %c4_i32_16 : i32 to vector<1x8xi32>
    %165 = arith.cmpi slt, %9, %164 : vector<1x8xi32>
    %166 = vector.shape_cast %165 : vector<1x8xi1> to vector<1x8xi1>
    %167 = vector.broadcast %166 : vector<1x8xi1> to vector<8x8xi1>
    %168 = vector.shape_cast %160 : vector<8x1xf32> to vector<8x1xf32>
    %169 = vector.broadcast %168 : vector<8x1xf32> to vector<8x8xf32>
    %170 = vector.shape_cast %163 : vector<8x1xf32> to vector<8x1xf32>
    %171 = vector.broadcast %170 : vector<8x1xf32> to vector<8x8xf32>
    %172 = arith.select %167, %169, %171 : vector<8x8xi1>, vector<8x8xf32>
    %173 = arith.subf %153, %172 : vector<8x8xf32>
    %174 = math.exp %173 : vector<8x8xf32>
    %175 = vector.extract_strided_slice %174 {offsets = [0, 0], sizes = [8, 1], strides = [1, 1]} : vector<8x8xf32> to vector<8x1xf32>
    %176 = vector.extract_strided_slice %174 {offsets = [0, 1], sizes = [8, 1], strides = [1, 1]} : vector<8x8xf32> to vector<8x1xf32>
    %177 = arith.addf %175, %176 : vector<8x1xf32>
    %178 = vector.extract_strided_slice %174 {offsets = [0, 2], sizes = [8, 1], strides = [1, 1]} : vector<8x8xf32> to vector<8x1xf32>
    %179 = vector.extract_strided_slice %174 {offsets = [0, 3], sizes = [8, 1], strides = [1, 1]} : vector<8x8xf32> to vector<8x1xf32>
    %180 = arith.addf %178, %179 : vector<8x1xf32>
    %181 = arith.addf %177, %180 : vector<8x1xf32>
    %182 = vector.extract_strided_slice %174 {offsets = [0, 4], sizes = [8, 1], strides = [1, 1]} : vector<8x8xf32> to vector<8x1xf32>
    %183 = vector.extract_strided_slice %174 {offsets = [0, 5], sizes = [8, 1], strides = [1, 1]} : vector<8x8xf32> to vector<8x1xf32>
    %184 = arith.addf %182, %183 : vector<8x1xf32>
    %185 = tpu.reciprocal %184 : vector<8x1xf32> -> vector<8x1xf32>
    %186 = vector.extract_strided_slice %174 {offsets = [0, 5], sizes = [8, 1], strides = [1, 1]} : vector<8x8xf32> to vector<8x1xf32>
    %187 = arith.mulf %186, %185 : vector<8x1xf32>
    %188 = vector.extract_strided_slice %174 {offsets = [0, 4], sizes = [8, 1], strides = [1, 1]} : vector<8x8xf32> to vector<8x1xf32>
    %189 = arith.mulf %188, %185 : vector<8x1xf32>
    %190 = tpu.reciprocal %181 : vector<8x1xf32> -> vector<8x1xf32>
    %191 = arith.mulf %189, %190 : vector<8x1xf32>
    %192 = arith.cmpf oeq, %154, %160 : vector<8x1xf32>
    %193 = arith.cmpf oeq, %155, %160 : vector<8x1xf32>
    %194 = arith.cmpf oeq, %156, %160 : vector<8x1xf32>
    %c2_i32_17 = arith.constant 2 : i32
    %c3_i32_18 = arith.constant 3 : i32
    %195 = vector.broadcast %c2_i32_17 : i32 to vector<8x1xi32>
    %196 = vector.broadcast %c3_i32_18 : i32 to vector<8x1xi32>
    %197 = arith.select %194, %195, %196 : vector<8x1xi1>, vector<8x1xi32>
    %c1_i32_19 = arith.constant 1 : i32
    %198 = vector.broadcast %c1_i32_19 : i32 to vector<8x1xi32>
    %199 = arith.select %193, %198, %197 : vector<8x1xi1>, vector<8x1xi32>
    %c0_i32_20 = arith.constant 0 : i32
    %200 = vector.broadcast %c0_i32_20 : i32 to vector<8x1xi32>
    %201 = arith.select %192, %200, %199 : vector<8x1xi1>, vector<8x1xi32>
    %c16_i32_21 = arith.constant 16 : i32
    %202 = vector.broadcast %c16_i32_21 : i32 to vector<8x1xi32>
    %203 = arith.muli %201, %202 : vector<8x1xi32>
    %204 = vector.broadcast %8 : vector<1x128xi32> to vector<8x128xi32>
    %205 = vector.broadcast %203 : vector<8x1xi32> to vector<8x128xi32>
    %206 = arith.cmpi sge, %204, %205 : vector<8x128xi32>
    %c16_i32_22 = arith.constant 16 : i32
    %207 = vector.broadcast %c16_i32_22 : i32 to vector<8x1xi32>
    %208 = arith.addi %203, %207 : vector<8x1xi32>
    %209 = vector.broadcast %8 : vector<1x128xi32> to vector<8x128xi32>
    %210 = vector.broadcast %208 : vector<8x1xi32> to vector<8x128xi32>
    %211 = arith.cmpi slt, %209, %210 : vector<8x128xi32>
    %212 = arith.andi %206, %211 : vector<8x128xi1>
    %cst_23 = arith.constant 0.000000e+00 : f32
    %213 = vector.shape_cast %14 : vector<1x128xi1> to vector<1x128xi1>
    %214 = vector.broadcast %213 : vector<1x128xi1> to vector<8x128xi1>
    %215 = vector.shape_cast %187 : vector<8x1xf32> to vector<8x1xf32>
    %216 = vector.broadcast %215 : vector<8x1xf32> to vector<8x128xf32>
    %217 = vector.broadcast %cst_23 : f32 to vector<8x128xf32>
    %218 = arith.select %214, %216, %217 : vector<8x128xi1>, vector<8x128xf32>
    %219 = vector.shape_cast %191 : vector<8x1xf32> to vector<8x1xf32>
    %220 = vector.broadcast %219 : vector<8x1xf32> to vector<8x128xf32>
    %221 = arith.select %212, %220, %218 : vector<8x128xi1>, vector<8x128xf32>
    %222 = vector.extract_strided_slice %5 {offsets = [0, 464], sizes = [8, 8], strides = [1, 1]} : vector<8x1024xf32> to vector<8x8xf32>
    %223 = vector.extract_strided_slice %222 {offsets = [0, 0], sizes = [8, 1], strides = [1, 1]} : vector<8x8xf32> to vector<8x1xf32>
    %224 = vector.extract_strided_slice %222 {offsets = [0, 1], sizes = [8, 1], strides = [1, 1]} : vector<8x8xf32> to vector<8x1xf32>
    %225 = vector.extract_strided_slice %222 {offsets = [0, 2], sizes = [8, 1], strides = [1, 1]} : vector<8x8xf32> to vector<8x1xf32>
    %226 = vector.extract_strided_slice %222 {offsets = [0, 3], sizes = [8, 1], strides = [1, 1]} : vector<8x8xf32> to vector<8x1xf32>
    %227 = arith.maximumf %223, %224 : vector<8x1xf32>
    %228 = arith.maximumf %225, %226 : vector<8x1xf32>
    %229 = arith.maximumf %227, %228 : vector<8x1xf32>
    %230 = vector.extract_strided_slice %222 {offsets = [0, 4], sizes = [8, 1], strides = [1, 1]} : vector<8x8xf32> to vector<8x1xf32>
    %231 = vector.extract_strided_slice %222 {offsets = [0, 5], sizes = [8, 1], strides = [1, 1]} : vector<8x8xf32> to vector<8x1xf32>
    %232 = arith.maximumf %230, %231 : vector<8x1xf32>
    %c4_i32_24 = arith.constant 4 : i32
    %233 = vector.broadcast %c4_i32_24 : i32 to vector<1x8xi32>
    %234 = arith.cmpi slt, %9, %233 : vector<1x8xi32>
    %235 = vector.shape_cast %234 : vector<1x8xi1> to vector<1x8xi1>
    %236 = vector.broadcast %235 : vector<1x8xi1> to vector<8x8xi1>
    %237 = vector.shape_cast %229 : vector<8x1xf32> to vector<8x1xf32>
    %238 = vector.broadcast %237 : vector<8x1xf32> to vector<8x8xf32>
    %239 = vector.shape_cast %232 : vector<8x1xf32> to vector<8x1xf32>
    %240 = vector.broadcast %239 : vector<8x1xf32> to vector<8x8xf32>
    %241 = arith.select %236, %238, %240 : vector<8x8xi1>, vector<8x8xf32>
    %242 = arith.subf %222, %241 : vector<8x8xf32>
    %243 = math.exp %242 : vector<8x8xf32>
    %244 = vector.extract_strided_slice %243 {offsets = [0, 0], sizes = [8, 1], strides = [1, 1]} : vector<8x8xf32> to vector<8x1xf32>
    %245 = vector.extract_strided_slice %243 {offsets = [0, 1], sizes = [8, 1], strides = [1, 1]} : vector<8x8xf32> to vector<8x1xf32>
    %246 = arith.addf %244, %245 : vector<8x1xf32>
    %247 = vector.extract_strided_slice %243 {offsets = [0, 2], sizes = [8, 1], strides = [1, 1]} : vector<8x8xf32> to vector<8x1xf32>
    %248 = vector.extract_strided_slice %243 {offsets = [0, 3], sizes = [8, 1], strides = [1, 1]} : vector<8x8xf32> to vector<8x1xf32>
    %249 = arith.addf %247, %248 : vector<8x1xf32>
    %250 = arith.addf %246, %249 : vector<8x1xf32>
    %251 = vector.extract_strided_slice %243 {offsets = [0, 4], sizes = [8, 1], strides = [1, 1]} : vector<8x8xf32> to vector<8x1xf32>
    %252 = vector.extract_strided_slice %243 {offsets = [0, 5], sizes = [8, 1], strides = [1, 1]} : vector<8x8xf32> to vector<8x1xf32>
    %253 = arith.addf %251, %252 : vector<8x1xf32>
    %254 = tpu.reciprocal %253 : vector<8x1xf32> -> vector<8x1xf32>
    %255 = vector.extract_strided_slice %243 {offsets = [0, 5], sizes = [8, 1], strides = [1, 1]} : vector<8x8xf32> to vector<8x1xf32>
    %256 = arith.mulf %255, %254 : vector<8x1xf32>
    %257 = vector.extract_strided_slice %243 {offsets = [0, 4], sizes = [8, 1], strides = [1, 1]} : vector<8x8xf32> to vector<8x1xf32>
    %258 = arith.mulf %257, %254 : vector<8x1xf32>
    %259 = tpu.reciprocal %250 : vector<8x1xf32> -> vector<8x1xf32>
    %260 = arith.mulf %258, %259 : vector<8x1xf32>
    %261 = arith.cmpf oeq, %223, %229 : vector<8x1xf32>
    %262 = arith.cmpf oeq, %224, %229 : vector<8x1xf32>
    %263 = arith.cmpf oeq, %225, %229 : vector<8x1xf32>
    %c2_i32_25 = arith.constant 2 : i32
    %c3_i32_26 = arith.constant 3 : i32
    %264 = vector.broadcast %c2_i32_25 : i32 to vector<8x1xi32>
    %265 = vector.broadcast %c3_i32_26 : i32 to vector<8x1xi32>
    %266 = arith.select %263, %264, %265 : vector<8x1xi1>, vector<8x1xi32>
    %c1_i32_27 = arith.constant 1 : i32
    %267 = vector.broadcast %c1_i32_27 : i32 to vector<8x1xi32>
    %268 = arith.select %262, %267, %266 : vector<8x1xi1>, vector<8x1xi32>
    %c0_i32_28 = arith.constant 0 : i32
    %269 = vector.broadcast %c0_i32_28 : i32 to vector<8x1xi32>
    %270 = arith.select %261, %269, %268 : vector<8x1xi1>, vector<8x1xi32>
    %c16_i32_29 = arith.constant 16 : i32
    %271 = vector.broadcast %c16_i32_29 : i32 to vector<8x1xi32>
    %272 = arith.muli %270, %271 : vector<8x1xi32>
    %273 = vector.broadcast %8 : vector<1x128xi32> to vector<8x128xi32>
    %274 = vector.broadcast %272 : vector<8x1xi32> to vector<8x128xi32>
    %275 = arith.cmpi sge, %273, %274 : vector<8x128xi32>
    %c16_i32_30 = arith.constant 16 : i32
    %276 = vector.broadcast %c16_i32_30 : i32 to vector<8x1xi32>
    %277 = arith.addi %272, %276 : vector<8x1xi32>
    %278 = vector.broadcast %8 : vector<1x128xi32> to vector<8x128xi32>
    %279 = vector.broadcast %277 : vector<8x1xi32> to vector<8x128xi32>
    %280 = arith.cmpi slt, %278, %279 : vector<8x128xi32>
    %281 = arith.andi %275, %280 : vector<8x128xi1>
    %cst_31 = arith.constant 0.000000e+00 : f32
    %282 = vector.shape_cast %14 : vector<1x128xi1> to vector<1x128xi1>
    %283 = vector.broadcast %282 : vector<1x128xi1> to vector<8x128xi1>
    %284 = vector.shape_cast %256 : vector<8x1xf32> to vector<8x1xf32>
    %285 = vector.broadcast %284 : vector<8x1xf32> to vector<8x128xf32>
    %286 = vector.broadcast %cst_31 : f32 to vector<8x128xf32>
    %287 = arith.select %283, %285, %286 : vector<8x128xi1>, vector<8x128xf32>
    %288 = vector.shape_cast %260 : vector<8x1xf32> to vector<8x1xf32>
    %289 = vector.broadcast %288 : vector<8x1xf32> to vector<8x128xf32>
    %290 = arith.select %281, %289, %287 : vector<8x128xi1>, vector<8x128xf32>
    %291 = vector.extract_strided_slice %5 {offsets = [0, 592], sizes = [8, 8], strides = [1, 1]} : vector<8x1024xf32> to vector<8x8xf32>
    %292 = vector.extract_strided_slice %291 {offsets = [0, 0], sizes = [8, 1], strides = [1, 1]} : vector<8x8xf32> to vector<8x1xf32>
    %293 = vector.extract_strided_slice %291 {offsets = [0, 1], sizes = [8, 1], strides = [1, 1]} : vector<8x8xf32> to vector<8x1xf32>
    %294 = vector.extract_strided_slice %291 {offsets = [0, 2], sizes = [8, 1], strides = [1, 1]} : vector<8x8xf32> to vector<8x1xf32>
    %295 = vector.extract_strided_slice %291 {offsets = [0, 3], sizes = [8, 1], strides = [1, 1]} : vector<8x8xf32> to vector<8x1xf32>
    %296 = arith.maximumf %292, %293 : vector<8x1xf32>
    %297 = arith.maximumf %294, %295 : vector<8x1xf32>
    %298 = arith.maximumf %296, %297 : vector<8x1xf32>
    %299 = vector.extract_strided_slice %291 {offsets = [0, 4], sizes = [8, 1], strides = [1, 1]} : vector<8x8xf32> to vector<8x1xf32>
    %300 = vector.extract_strided_slice %291 {offsets = [0, 5], sizes = [8, 1], strides = [1, 1]} : vector<8x8xf32> to vector<8x1xf32>
    %301 = arith.maximumf %299, %300 : vector<8x1xf32>
    %c4_i32_32 = arith.constant 4 : i32
    %302 = vector.broadcast %c4_i32_32 : i32 to vector<1x8xi32>
    %303 = arith.cmpi slt, %9, %302 : vector<1x8xi32>
    %304 = vector.shape_cast %303 : vector<1x8xi1> to vector<1x8xi1>
    %305 = vector.broadcast %304 : vector<1x8xi1> to vector<8x8xi1>
    %306 = vector.shape_cast %298 : vector<8x1xf32> to vector<8x1xf32>
    %307 = vector.broadcast %306 : vector<8x1xf32> to vector<8x8xf32>
    %308 = vector.shape_cast %301 : vector<8x1xf32> to vector<8x1xf32>
    %309 = vector.broadcast %308 : vector<8x1xf32> to vector<8x8xf32>
    %310 = arith.select %305, %307, %309 : vector<8x8xi1>, vector<8x8xf32>
    %311 = arith.subf %291, %310 : vector<8x8xf32>
    %312 = math.exp %311 : vector<8x8xf32>
    %313 = vector.extract_strided_slice %312 {offsets = [0, 0], sizes = [8, 1], strides = [1, 1]} : vector<8x8xf32> to vector<8x1xf32>
    %314 = vector.extract_strided_slice %312 {offsets = [0, 1], sizes = [8, 1], strides = [1, 1]} : vector<8x8xf32> to vector<8x1xf32>
    %315 = arith.addf %313, %314 : vector<8x1xf32>
    %316 = vector.extract_strided_slice %312 {offsets = [0, 2], sizes = [8, 1], strides = [1, 1]} : vector<8x8xf32> to vector<8x1xf32>
    %317 = vector.extract_strided_slice %312 {offsets = [0, 3], sizes = [8, 1], strides = [1, 1]} : vector<8x8xf32> to vector<8x1xf32>
    %318 = arith.addf %316, %317 : vector<8x1xf32>
    %319 = arith.addf %315, %318 : vector<8x1xf32>
    %320 = vector.extract_strided_slice %312 {offsets = [0, 4], sizes = [8, 1], strides = [1, 1]} : vector<8x8xf32> to vector<8x1xf32>
    %321 = vector.extract_strided_slice %312 {offsets = [0, 5], sizes = [8, 1], strides = [1, 1]} : vector<8x8xf32> to vector<8x1xf32>
    %322 = arith.addf %320, %321 : vector<8x1xf32>
    %323 = tpu.reciprocal %322 : vector<8x1xf32> -> vector<8x1xf32>
    %324 = vector.extract_strided_slice %312 {offsets = [0, 5], sizes = [8, 1], strides = [1, 1]} : vector<8x8xf32> to vector<8x1xf32>
    %325 = arith.mulf %324, %323 : vector<8x1xf32>
    %326 = vector.extract_strided_slice %312 {offsets = [0, 4], sizes = [8, 1], strides = [1, 1]} : vector<8x8xf32> to vector<8x1xf32>
    %327 = arith.mulf %326, %323 : vector<8x1xf32>
    %328 = tpu.reciprocal %319 : vector<8x1xf32> -> vector<8x1xf32>
    %329 = arith.mulf %327, %328 : vector<8x1xf32>
    %330 = arith.cmpf oeq, %292, %298 : vector<8x1xf32>
    %331 = arith.cmpf oeq, %293, %298 : vector<8x1xf32>
    %332 = arith.cmpf oeq, %294, %298 : vector<8x1xf32>
    %c2_i32_33 = arith.constant 2 : i32
    %c3_i32_34 = arith.constant 3 : i32
    %333 = vector.broadcast %c2_i32_33 : i32 to vector<8x1xi32>
    %334 = vector.broadcast %c3_i32_34 : i32 to vector<8x1xi32>
    %335 = arith.select %332, %333, %334 : vector<8x1xi1>, vector<8x1xi32>
    %c1_i32_35 = arith.constant 1 : i32
    %336 = vector.broadcast %c1_i32_35 : i32 to vector<8x1xi32>
    %337 = arith.select %331, %336, %335 : vector<8x1xi1>, vector<8x1xi32>
    %c0_i32_36 = arith.constant 0 : i32
    %338 = vector.broadcast %c0_i32_36 : i32 to vector<8x1xi32>
    %339 = arith.select %330, %338, %337 : vector<8x1xi1>, vector<8x1xi32>
    %c16_i32_37 = arith.constant 16 : i32
    %340 = vector.broadcast %c16_i32_37 : i32 to vector<8x1xi32>
    %341 = arith.muli %339, %340 : vector<8x1xi32>
    %342 = vector.broadcast %8 : vector<1x128xi32> to vector<8x128xi32>
    %343 = vector.broadcast %341 : vector<8x1xi32> to vector<8x128xi32>
    %344 = arith.cmpi sge, %342, %343 : vector<8x128xi32>
    %c16_i32_38 = arith.constant 16 : i32
    %345 = vector.broadcast %c16_i32_38 : i32 to vector<8x1xi32>
    %346 = arith.addi %341, %345 : vector<8x1xi32>
    %347 = vector.broadcast %8 : vector<1x128xi32> to vector<8x128xi32>
    %348 = vector.broadcast %346 : vector<8x1xi32> to vector<8x128xi32>
    %349 = arith.cmpi slt, %347, %348 : vector<8x128xi32>
    %350 = arith.andi %344, %349 : vector<8x128xi1>
    %cst_39 = arith.constant 0.000000e+00 : f32
    %351 = vector.shape_cast %14 : vector<1x128xi1> to vector<1x128xi1>
    %352 = vector.broadcast %351 : vector<1x128xi1> to vector<8x128xi1>
    %353 = vector.shape_cast %325 : vector<8x1xf32> to vector<8x1xf32>
    %354 = vector.broadcast %353 : vector<8x1xf32> to vector<8x128xf32>
    %355 = vector.broadcast %cst_39 : f32 to vector<8x128xf32>
    %356 = arith.select %352, %354, %355 : vector<8x128xi1>, vector<8x128xf32>
    %357 = vector.shape_cast %329 : vector<8x1xf32> to vector<8x1xf32>
    %358 = vector.broadcast %357 : vector<8x1xf32> to vector<8x128xf32>
    %359 = arith.select %350, %358, %356 : vector<8x128xi1>, vector<8x128xf32>
    %360 = vector.extract_strided_slice %5 {offsets = [0, 720], sizes = [8, 8], strides = [1, 1]} : vector<8x1024xf32> to vector<8x8xf32>
    %361 = vector.extract_strided_slice %360 {offsets = [0, 0], sizes = [8, 1], strides = [1, 1]} : vector<8x8xf32> to vector<8x1xf32>
    %362 = vector.extract_strided_slice %360 {offsets = [0, 1], sizes = [8, 1], strides = [1, 1]} : vector<8x8xf32> to vector<8x1xf32>
    %363 = vector.extract_strided_slice %360 {offsets = [0, 2], sizes = [8, 1], strides = [1, 1]} : vector<8x8xf32> to vector<8x1xf32>
    %364 = vector.extract_strided_slice %360 {offsets = [0, 3], sizes = [8, 1], strides = [1, 1]} : vector<8x8xf32> to vector<8x1xf32>
    %365 = arith.maximumf %361, %362 : vector<8x1xf32>
    %366 = arith.maximumf %363, %364 : vector<8x1xf32>
    %367 = arith.maximumf %365, %366 : vector<8x1xf32>
    %368 = vector.extract_strided_slice %360 {offsets = [0, 4], sizes = [8, 1], strides = [1, 1]} : vector<8x8xf32> to vector<8x1xf32>
    %369 = vector.extract_strided_slice %360 {offsets = [0, 5], sizes = [8, 1], strides = [1, 1]} : vector<8x8xf32> to vector<8x1xf32>
    %370 = arith.maximumf %368, %369 : vector<8x1xf32>
    %c4_i32_40 = arith.constant 4 : i32
    %371 = vector.broadcast %c4_i32_40 : i32 to vector<1x8xi32>
    %372 = arith.cmpi slt, %9, %371 : vector<1x8xi32>
    %373 = vector.shape_cast %372 : vector<1x8xi1> to vector<1x8xi1>
    %374 = vector.broadcast %373 : vector<1x8xi1> to vector<8x8xi1>
    %375 = vector.shape_cast %367 : vector<8x1xf32> to vector<8x1xf32>
    %376 = vector.broadcast %375 : vector<8x1xf32> to vector<8x8xf32>
    %377 = vector.shape_cast %370 : vector<8x1xf32> to vector<8x1xf32>
    %378 = vector.broadcast %377 : vector<8x1xf32> to vector<8x8xf32>
    %379 = arith.select %374, %376, %378 : vector<8x8xi1>, vector<8x8xf32>
    %380 = arith.subf %360, %379 : vector<8x8xf32>
    %381 = math.exp %380 : vector<8x8xf32>
    %382 = vector.extract_strided_slice %381 {offsets = [0, 0], sizes = [8, 1], strides = [1, 1]} : vector<8x8xf32> to vector<8x1xf32>
    %383 = vector.extract_strided_slice %381 {offsets = [0, 1], sizes = [8, 1], strides = [1, 1]} : vector<8x8xf32> to vector<8x1xf32>
    %384 = arith.addf %382, %383 : vector<8x1xf32>
    %385 = vector.extract_strided_slice %381 {offsets = [0, 2], sizes = [8, 1], strides = [1, 1]} : vector<8x8xf32> to vector<8x1xf32>
    %386 = vector.extract_strided_slice %381 {offsets = [0, 3], sizes = [8, 1], strides = [1, 1]} : vector<8x8xf32> to vector<8x1xf32>
    %387 = arith.addf %385, %386 : vector<8x1xf32>
    %388 = arith.addf %384, %387 : vector<8x1xf32>
    %389 = vector.extract_strided_slice %381 {offsets = [0, 4], sizes = [8, 1], strides = [1, 1]} : vector<8x8xf32> to vector<8x1xf32>
    %390 = vector.extract_strided_slice %381 {offsets = [0, 5], sizes = [8, 1], strides = [1, 1]} : vector<8x8xf32> to vector<8x1xf32>
    %391 = arith.addf %389, %390 : vector<8x1xf32>
    %392 = tpu.reciprocal %391 : vector<8x1xf32> -> vector<8x1xf32>
    %393 = vector.extract_strided_slice %381 {offsets = [0, 5], sizes = [8, 1], strides = [1, 1]} : vector<8x8xf32> to vector<8x1xf32>
    %394 = arith.mulf %393, %392 : vector<8x1xf32>
    %395 = vector.extract_strided_slice %381 {offsets = [0, 4], sizes = [8, 1], strides = [1, 1]} : vector<8x8xf32> to vector<8x1xf32>
    %396 = arith.mulf %395, %392 : vector<8x1xf32>
    %397 = tpu.reciprocal %388 : vector<8x1xf32> -> vector<8x1xf32>
    %398 = arith.mulf %396, %397 : vector<8x1xf32>
    %399 = arith.cmpf oeq, %361, %367 : vector<8x1xf32>
    %400 = arith.cmpf oeq, %362, %367 : vector<8x1xf32>
    %401 = arith.cmpf oeq, %363, %367 : vector<8x1xf32>
    %c2_i32_41 = arith.constant 2 : i32
    %c3_i32_42 = arith.constant 3 : i32
    %402 = vector.broadcast %c2_i32_41 : i32 to vector<8x1xi32>
    %403 = vector.broadcast %c3_i32_42 : i32 to vector<8x1xi32>
    %404 = arith.select %401, %402, %403 : vector<8x1xi1>, vector<8x1xi32>
    %c1_i32_43 = arith.constant 1 : i32
    %405 = vector.broadcast %c1_i32_43 : i32 to vector<8x1xi32>
    %406 = arith.select %400, %405, %404 : vector<8x1xi1>, vector<8x1xi32>
    %c0_i32_44 = arith.constant 0 : i32
    %407 = vector.broadcast %c0_i32_44 : i32 to vector<8x1xi32>
    %408 = arith.select %399, %407, %406 : vector<8x1xi1>, vector<8x1xi32>
    %c16_i32_45 = arith.constant 16 : i32
    %409 = vector.broadcast %c16_i32_45 : i32 to vector<8x1xi32>
    %410 = arith.muli %408, %409 : vector<8x1xi32>
    %411 = vector.broadcast %8 : vector<1x128xi32> to vector<8x128xi32>
    %412 = vector.broadcast %410 : vector<8x1xi32> to vector<8x128xi32>
    %413 = arith.cmpi sge, %411, %412 : vector<8x128xi32>
    %c16_i32_46 = arith.constant 16 : i32
    %414 = vector.broadcast %c16_i32_46 : i32 to vector<8x1xi32>
    %415 = arith.addi %410, %414 : vector<8x1xi32>
    %416 = vector.broadcast %8 : vector<1x128xi32> to vector<8x128xi32>
    %417 = vector.broadcast %415 : vector<8x1xi32> to vector<8x128xi32>
    %418 = arith.cmpi slt, %416, %417 : vector<8x128xi32>
    %419 = arith.andi %413, %418 : vector<8x128xi1>
    %cst_47 = arith.constant 0.000000e+00 : f32
    %420 = vector.shape_cast %14 : vector<1x128xi1> to vector<1x128xi1>
    %421 = vector.broadcast %420 : vector<1x128xi1> to vector<8x128xi1>
    %422 = vector.shape_cast %394 : vector<8x1xf32> to vector<8x1xf32>
    %423 = vector.broadcast %422 : vector<8x1xf32> to vector<8x128xf32>
    %424 = vector.broadcast %cst_47 : f32 to vector<8x128xf32>
    %425 = arith.select %421, %423, %424 : vector<8x128xi1>, vector<8x128xf32>
    %426 = vector.shape_cast %398 : vector<8x1xf32> to vector<8x1xf32>
    %427 = vector.broadcast %426 : vector<8x1xf32> to vector<8x128xf32>
    %428 = arith.select %419, %427, %425 : vector<8x128xi1>, vector<8x128xf32>
    %429 = vector.extract_strided_slice %5 {offsets = [0, 848], sizes = [8, 8], strides = [1, 1]} : vector<8x1024xf32> to vector<8x8xf32>
    %430 = vector.extract_strided_slice %429 {offsets = [0, 0], sizes = [8, 1], strides = [1, 1]} : vector<8x8xf32> to vector<8x1xf32>
    %431 = vector.extract_strided_slice %429 {offsets = [0, 1], sizes = [8, 1], strides = [1, 1]} : vector<8x8xf32> to vector<8x1xf32>
    %432 = vector.extract_strided_slice %429 {offsets = [0, 2], sizes = [8, 1], strides = [1, 1]} : vector<8x8xf32> to vector<8x1xf32>
    %433 = vector.extract_strided_slice %429 {offsets = [0, 3], sizes = [8, 1], strides = [1, 1]} : vector<8x8xf32> to vector<8x1xf32>
    %434 = arith.maximumf %430, %431 : vector<8x1xf32>
    %435 = arith.maximumf %432, %433 : vector<8x1xf32>
    %436 = arith.maximumf %434, %435 : vector<8x1xf32>
    %437 = vector.extract_strided_slice %429 {offsets = [0, 4], sizes = [8, 1], strides = [1, 1]} : vector<8x8xf32> to vector<8x1xf32>
    %438 = vector.extract_strided_slice %429 {offsets = [0, 5], sizes = [8, 1], strides = [1, 1]} : vector<8x8xf32> to vector<8x1xf32>
    %439 = arith.maximumf %437, %438 : vector<8x1xf32>
    %c4_i32_48 = arith.constant 4 : i32
    %440 = vector.broadcast %c4_i32_48 : i32 to vector<1x8xi32>
    %441 = arith.cmpi slt, %9, %440 : vector<1x8xi32>
    %442 = vector.shape_cast %441 : vector<1x8xi1> to vector<1x8xi1>
    %443 = vector.broadcast %442 : vector<1x8xi1> to vector<8x8xi1>
    %444 = vector.shape_cast %436 : vector<8x1xf32> to vector<8x1xf32>
    %445 = vector.broadcast %444 : vector<8x1xf32> to vector<8x8xf32>
    %446 = vector.shape_cast %439 : vector<8x1xf32> to vector<8x1xf32>
    %447 = vector.broadcast %446 : vector<8x1xf32> to vector<8x8xf32>
    %448 = arith.select %443, %445, %447 : vector<8x8xi1>, vector<8x8xf32>
    %449 = arith.subf %429, %448 : vector<8x8xf32>
    %450 = math.exp %449 : vector<8x8xf32>
    %451 = vector.extract_strided_slice %450 {offsets = [0, 0], sizes = [8, 1], strides = [1, 1]} : vector<8x8xf32> to vector<8x1xf32>
    %452 = vector.extract_strided_slice %450 {offsets = [0, 1], sizes = [8, 1], strides = [1, 1]} : vector<8x8xf32> to vector<8x1xf32>
    %453 = arith.addf %451, %452 : vector<8x1xf32>
    %454 = vector.extract_strided_slice %450 {offsets = [0, 2], sizes = [8, 1], strides = [1, 1]} : vector<8x8xf32> to vector<8x1xf32>
    %455 = vector.extract_strided_slice %450 {offsets = [0, 3], sizes = [8, 1], strides = [1, 1]} : vector<8x8xf32> to vector<8x1xf32>
    %456 = arith.addf %454, %455 : vector<8x1xf32>
    %457 = arith.addf %453, %456 : vector<8x1xf32>
    %458 = vector.extract_strided_slice %450 {offsets = [0, 4], sizes = [8, 1], strides = [1, 1]} : vector<8x8xf32> to vector<8x1xf32>
    %459 = vector.extract_strided_slice %450 {offsets = [0, 5], sizes = [8, 1], strides = [1, 1]} : vector<8x8xf32> to vector<8x1xf32>
    %460 = arith.addf %458, %459 : vector<8x1xf32>
    %461 = tpu.reciprocal %460 : vector<8x1xf32> -> vector<8x1xf32>
    %462 = vector.extract_strided_slice %450 {offsets = [0, 5], sizes = [8, 1], strides = [1, 1]} : vector<8x8xf32> to vector<8x1xf32>
    %463 = arith.mulf %462, %461 : vector<8x1xf32>
    %464 = vector.extract_strided_slice %450 {offsets = [0, 4], sizes = [8, 1], strides = [1, 1]} : vector<8x8xf32> to vector<8x1xf32>
    %465 = arith.mulf %464, %461 : vector<8x1xf32>
    %466 = tpu.reciprocal %457 : vector<8x1xf32> -> vector<8x1xf32>
    %467 = arith.mulf %465, %466 : vector<8x1xf32>
    %468 = arith.cmpf oeq, %430, %436 : vector<8x1xf32>
    %469 = arith.cmpf oeq, %431, %436 : vector<8x1xf32>
    %470 = arith.cmpf oeq, %432, %436 : vector<8x1xf32>
    %c2_i32_49 = arith.constant 2 : i32
    %c3_i32_50 = arith.constant 3 : i32
    %471 = vector.broadcast %c2_i32_49 : i32 to vector<8x1xi32>
    %472 = vector.broadcast %c3_i32_50 : i32 to vector<8x1xi32>
    %473 = arith.select %470, %471, %472 : vector<8x1xi1>, vector<8x1xi32>
    %c1_i32_51 = arith.constant 1 : i32
    %474 = vector.broadcast %c1_i32_51 : i32 to vector<8x1xi32>
    %475 = arith.select %469, %474, %473 : vector<8x1xi1>, vector<8x1xi32>
    %c0_i32_52 = arith.constant 0 : i32
    %476 = vector.broadcast %c0_i32_52 : i32 to vector<8x1xi32>
    %477 = arith.select %468, %476, %475 : vector<8x1xi1>, vector<8x1xi32>
    %c16_i32_53 = arith.constant 16 : i32
    %478 = vector.broadcast %c16_i32_53 : i32 to vector<8x1xi32>
    %479 = arith.muli %477, %478 : vector<8x1xi32>
    %480 = vector.broadcast %8 : vector<1x128xi32> to vector<8x128xi32>
    %481 = vector.broadcast %479 : vector<8x1xi32> to vector<8x128xi32>
    %482 = arith.cmpi sge, %480, %481 : vector<8x128xi32>
    %c16_i32_54 = arith.constant 16 : i32
    %483 = vector.broadcast %c16_i32_54 : i32 to vector<8x1xi32>
    %484 = arith.addi %479, %483 : vector<8x1xi32>
    %485 = vector.broadcast %8 : vector<1x128xi32> to vector<8x128xi32>
    %486 = vector.broadcast %484 : vector<8x1xi32> to vector<8x128xi32>
    %487 = arith.cmpi slt, %485, %486 : vector<8x128xi32>
    %488 = arith.andi %482, %487 : vector<8x128xi1>
    %cst_55 = arith.constant 0.000000e+00 : f32
    %489 = vector.shape_cast %14 : vector<1x128xi1> to vector<1x128xi1>
    %490 = vector.broadcast %489 : vector<1x128xi1> to vector<8x128xi1>
    %491 = vector.shape_cast %463 : vector<8x1xf32> to vector<8x1xf32>
    %492 = vector.broadcast %491 : vector<8x1xf32> to vector<8x128xf32>
    %493 = vector.broadcast %cst_55 : f32 to vector<8x128xf32>
    %494 = arith.select %490, %492, %493 : vector<8x128xi1>, vector<8x128xf32>
    %495 = vector.shape_cast %467 : vector<8x1xf32> to vector<8x1xf32>
    %496 = vector.broadcast %495 : vector<8x1xf32> to vector<8x128xf32>
    %497 = arith.select %488, %496, %494 : vector<8x128xi1>, vector<8x128xf32>
    %498 = vector.extract_strided_slice %5 {offsets = [0, 976], sizes = [8, 8], strides = [1, 1]} : vector<8x1024xf32> to vector<8x8xf32>
    %499 = vector.extract_strided_slice %498 {offsets = [0, 0], sizes = [8, 1], strides = [1, 1]} : vector<8x8xf32> to vector<8x1xf32>
    %500 = vector.extract_strided_slice %498 {offsets = [0, 1], sizes = [8, 1], strides = [1, 1]} : vector<8x8xf32> to vector<8x1xf32>
    %501 = vector.extract_strided_slice %498 {offsets = [0, 2], sizes = [8, 1], strides = [1, 1]} : vector<8x8xf32> to vector<8x1xf32>
    %502 = vector.extract_strided_slice %498 {offsets = [0, 3], sizes = [8, 1], strides = [1, 1]} : vector<8x8xf32> to vector<8x1xf32>
    %503 = arith.maximumf %499, %500 : vector<8x1xf32>
    %504 = arith.maximumf %501, %502 : vector<8x1xf32>
    %505 = arith.maximumf %503, %504 : vector<8x1xf32>
    %506 = vector.extract_strided_slice %498 {offsets = [0, 4], sizes = [8, 1], strides = [1, 1]} : vector<8x8xf32> to vector<8x1xf32>
    %507 = vector.extract_strided_slice %498 {offsets = [0, 5], sizes = [8, 1], strides = [1, 1]} : vector<8x8xf32> to vector<8x1xf32>
    %508 = arith.maximumf %506, %507 : vector<8x1xf32>
    %c4_i32_56 = arith.constant 4 : i32
    %509 = vector.broadcast %c4_i32_56 : i32 to vector<1x8xi32>
    %510 = arith.cmpi slt, %9, %509 : vector<1x8xi32>
    %511 = vector.shape_cast %510 : vector<1x8xi1> to vector<1x8xi1>
    %512 = vector.broadcast %511 : vector<1x8xi1> to vector<8x8xi1>
    %513 = vector.shape_cast %505 : vector<8x1xf32> to vector<8x1xf32>
    %514 = vector.broadcast %513 : vector<8x1xf32> to vector<8x8xf32>
    %515 = vector.shape_cast %508 : vector<8x1xf32> to vector<8x1xf32>
    %516 = vector.broadcast %515 : vector<8x1xf32> to vector<8x8xf32>
    %517 = arith.select %512, %514, %516 : vector<8x8xi1>, vector<8x8xf32>
    %518 = arith.subf %498, %517 : vector<8x8xf32>
    %519 = math.exp %518 : vector<8x8xf32>
    %520 = vector.extract_strided_slice %519 {offsets = [0, 0], sizes = [8, 1], strides = [1, 1]} : vector<8x8xf32> to vector<8x1xf32>
    %521 = vector.extract_strided_slice %519 {offsets = [0, 1], sizes = [8, 1], strides = [1, 1]} : vector<8x8xf32> to vector<8x1xf32>
    %522 = arith.addf %520, %521 : vector<8x1xf32>
    %523 = vector.extract_strided_slice %519 {offsets = [0, 2], sizes = [8, 1], strides = [1, 1]} : vector<8x8xf32> to vector<8x1xf32>
    %524 = vector.extract_strided_slice %519 {offsets = [0, 3], sizes = [8, 1], strides = [1, 1]} : vector<8x8xf32> to vector<8x1xf32>
    %525 = arith.addf %523, %524 : vector<8x1xf32>
    %526 = arith.addf %522, %525 : vector<8x1xf32>
    %527 = vector.extract_strided_slice %519 {offsets = [0, 4], sizes = [8, 1], strides = [1, 1]} : vector<8x8xf32> to vector<8x1xf32>
    %528 = vector.extract_strided_slice %519 {offsets = [0, 5], sizes = [8, 1], strides = [1, 1]} : vector<8x8xf32> to vector<8x1xf32>
    %529 = arith.addf %527, %528 : vector<8x1xf32>
    %530 = tpu.reciprocal %529 : vector<8x1xf32> -> vector<8x1xf32>
    %531 = vector.extract_strided_slice %519 {offsets = [0, 5], sizes = [8, 1], strides = [1, 1]} : vector<8x8xf32> to vector<8x1xf32>
    %532 = arith.mulf %531, %530 : vector<8x1xf32>
    %533 = vector.extract_strided_slice %519 {offsets = [0, 4], sizes = [8, 1], strides = [1, 1]} : vector<8x8xf32> to vector<8x1xf32>
    %534 = arith.mulf %533, %530 : vector<8x1xf32>
    %535 = tpu.reciprocal %526 : vector<8x1xf32> -> vector<8x1xf32>
    %536 = arith.mulf %534, %535 : vector<8x1xf32>
    %537 = arith.cmpf oeq, %499, %505 : vector<8x1xf32>
    %538 = arith.cmpf oeq, %500, %505 : vector<8x1xf32>
    %539 = arith.cmpf oeq, %501, %505 : vector<8x1xf32>
    %c2_i32_57 = arith.constant 2 : i32
    %c3_i32_58 = arith.constant 3 : i32
    %540 = vector.broadcast %c2_i32_57 : i32 to vector<8x1xi32>
    %541 = vector.broadcast %c3_i32_58 : i32 to vector<8x1xi32>
    %542 = arith.select %539, %540, %541 : vector<8x1xi1>, vector<8x1xi32>
    %c1_i32_59 = arith.constant 1 : i32
    %543 = vector.broadcast %c1_i32_59 : i32 to vector<8x1xi32>
    %544 = arith.select %538, %543, %542 : vector<8x1xi1>, vector<8x1xi32>
    %c0_i32_60 = arith.constant 0 : i32
    %545 = vector.broadcast %c0_i32_60 : i32 to vector<8x1xi32>
    %546 = arith.select %537, %545, %544 : vector<8x1xi1>, vector<8x1xi32>
    %c16_i32_61 = arith.constant 16 : i32
    %547 = vector.broadcast %c16_i32_61 : i32 to vector<8x1xi32>
    %548 = arith.muli %546, %547 : vector<8x1xi32>
    %549 = vector.broadcast %8 : vector<1x128xi32> to vector<8x128xi32>
    %550 = vector.broadcast %548 : vector<8x1xi32> to vector<8x128xi32>
    %551 = arith.cmpi sge, %549, %550 : vector<8x128xi32>
    %c16_i32_62 = arith.constant 16 : i32
    %552 = vector.broadcast %c16_i32_62 : i32 to vector<8x1xi32>
    %553 = arith.addi %548, %552 : vector<8x1xi32>
    %554 = vector.broadcast %8 : vector<1x128xi32> to vector<8x128xi32>
    %555 = vector.broadcast %553 : vector<8x1xi32> to vector<8x128xi32>
    %556 = arith.cmpi slt, %554, %555 : vector<8x128xi32>
    %557 = arith.andi %551, %556 : vector<8x128xi1>
    %cst_63 = arith.constant 0.000000e+00 : f32
    %558 = vector.shape_cast %14 : vector<1x128xi1> to vector<1x128xi1>
    %559 = vector.broadcast %558 : vector<1x128xi1> to vector<8x128xi1>
    %560 = vector.shape_cast %532 : vector<8x1xf32> to vector<8x1xf32>
    %561 = vector.broadcast %560 : vector<8x1xf32> to vector<8x128xf32>
    %562 = vector.broadcast %cst_63 : f32 to vector<8x128xf32>
    %563 = arith.select %559, %561, %562 : vector<8x128xi1>, vector<8x128xf32>
    %564 = vector.shape_cast %536 : vector<8x1xf32> to vector<8x1xf32>
    %565 = vector.broadcast %564 : vector<8x1xf32> to vector<8x128xf32>
    %566 = arith.select %557, %565, %563 : vector<8x128xi1>, vector<8x128xf32>
    %567 = tpu.concatenate %83, %152, %221, %290, %359, %428, %497, %566 in 1 : vector<8x128xf32>, vector<8x128xf32>, vector<8x128xf32>, vector<8x128xf32>, vector<8x128xf32>, vector<8x128xf32>, vector<8x128xf32>, vector<8x128xf32> -> vector<8x1024xf32>
    %568 = arith.mulf %7, %567 : vector<8x1024xf32>
    %c0_64 = arith.constant 0 : index
    %c0_65 = arith.constant 0 : index
    %569 = vector.load %arg4[%c0_64, %c0_65] : memref<1024x128xf32, #tpu.memory_space<vmem>>, vector<1024x128xf32>
    %cst_66 = arith.constant dense<0.000000e+00> : vector<8x128xf32>
    %570 = tpu.matmul %568, %569, %cst_66 {dimension_numbers = #tpu.dot_dimension_numbers<[1], [0], [0], [1], [0, 0, 1, 1], [], []>} : vector<8x1024xf32>, vector<1024x128xf32>, vector<8x128xf32> -> vector<8x128xf32>
    %c0_67 = arith.constant 0 : index
    %c0_68 = arith.constant 0 : index
    %571 = vector.load %arg5[%c0_67, %c0_68] : memref<1024x128xf32, #tpu.memory_space<vmem>>, vector<1024x128xf32>
    %cst_69 = arith.constant dense<0.000000e+00> : vector<8x128xf32>
    %572 = tpu.matmul %567, %571, %cst_69 {dimension_numbers = #tpu.dot_dimension_numbers<[1], [0], [0], [1], [0, 0, 1, 1], [], []>} : vector<8x1024xf32>, vector<1024x128xf32>, vector<8x128xf32> -> vector<8x128xf32>
    %573 = arith.addf %570, %572 : vector<8x128xf32>
    %c0_70 = arith.constant 0 : index
    %c0_71 = arith.constant 0 : index
    %574 = vector.load %arg6[%c0_70, %c0_71] : memref<1x128xf32, #tpu.memory_space<vmem>>, vector<1x128xf32>
    %575 = vector.broadcast %574 : vector<1x128xf32> to vector<8x128xf32>
    %576 = arith.addf %573, %575 : vector<8x128xf32>
    %c0_72 = arith.constant 0 : index
    %c0_73 = arith.constant 0 : index
    %577 = vector.load %arg7[%c0_72, %c0_73] : memref<8x128xf32, #tpu.memory_space<vmem>>, vector<8x128xf32>
    tpu.vector_store %arg7[%c0_72, %c0_73], %576 {strides = array<i32>} : memref<8x128xf32, #tpu.memory_space<vmem>>, vector<8x128xf32>,
    return
  }
  func.func @transform_0(%arg0: i32) -> (i32, i32) {
    %c0_i32 = arith.constant 0 : i32
    %c0_i32_0 = arith.constant 0 : i32
    return %arg0, %c0_i32 : i32, i32
  }
  func.func @transform_1(%arg0: i32) -> (i32, i32) {
    %c0_i32 = arith.constant 0 : i32
    %c0_i32_0 = arith.constant 0 : i32
    %c0_i32_1 = arith.constant 0 : i32
    return %c0_i32, %c0_i32_0 : i32, i32
  }
  func.func @transform_2(%arg0: i32) -> (i32, i32) {
    %c0_i32 = arith.constant 0 : i32
    %c0_i32_0 = arith.constant 0 : i32
    %c0_i32_1 = arith.constant 0 : i32
    return %c0_i32, %c0_i32_0 : i32, i32
  }
  func.func @transform_3(%arg0: i32) -> (i32, i32) {
    %c0_i32 = arith.constant 0 : i32
    %c0_i32_0 = arith.constant 0 : i32
    %c0_i32_1 = arith.constant 0 : i32
    return %c0_i32, %c0_i32_0 : i32, i32
  }
  func.func @transform_4(%arg0: i32) -> (i32, i32) {
    %c0_i32 = arith.constant 0 : i32
    %c0_i32_0 = arith.constant 0 : i32
    %c0_i32_1 = arith.constant 0 : i32
    return %c0_i32, %c0_i32_0 : i32, i32
  }
  func.func @transform_5(%arg0: i32) -> (i32, i32) {
    %c0_i32 = arith.constant 0 : i32
    %c0_i32_0 = arith.constant 0 : i32
    %c0_i32_1 = arith.constant 0 : i32
    return %c0_i32, %c0_i32_0 : i32, i32
  }
  func.func @transform_6(%arg0: i32) -> (i32, i32) {
    %c0_i32 = arith.constant 0 : i32
    %c0_i32_0 = arith.constant 0 : i32
    return %arg0, %c0_i32 : i32, i32
  }
}

</mosaic_0001>

<bundles_post_ra>
// kernel: tpu_custom_call.1
= control target key start
LH: loop header
LB: loop body
LE: loop exit
PB: predicated region body
PF: predicated region fallthrough
CT: control target
= control target key end

     0   :  { %s3570_s0 = inlined_call_operand.hbm [shape: f32[16,128], index: 0, kind: input, shape index: {}]   ;;  %s3571_s1 = inlined_call_operand.hbm [shape: f32[128,1024], index: 1, kind: input, shape index: {}]   ;;  %s3572_s2 = inlined_call_operand.hbm [shape: f32[1,1024], index: 2, kind: input, shape index: {}]   ;;  %s3573_s3 = inlined_call_operand.hbm [shape: f32[1024,128], index: 3, kind: input, shape index: {}]   ;;  %s3574_s4 = inlined_call_operand.hbm [shape: f32[1024,128], index: 4, kind: input, shape index: {}]   ;;  %s3575_s5 = inlined_call_operand.vmem [shape: f32[1,128], index: 5, kind: input, shape index: {}]   ;;  %s3576_s6 = inlined_call_operand.hbm [shape: f32[16,128], index: 6, kind: output, shape index: {}]  }
   0x1   :  { %3577 = sst [smem:[#allocation16_spill]] %s3571_s1 }
   0x2   :  { %11 = vsyncpa [#allocation3], 0 }
   0x3   :  { %13 = vsyncpa [#allocation3 + $0x1], 0 }
   0x4   :  { %14 = vsyncpa [#allocation6], 0 }
   0x5   :  { %15 = vsyncpa [#allocation9], 0 }
   0x6   :  { %16 = vsyncpa [#allocation4], 0 }
   0x7   :  { %18 = vsyncpa [#allocation4 + $0x1], 0  ;;  %s2760_s21 = smov 0   ;;  %s2762_s22 = smov 0  }
   0x8   :  { %s2764_s23 = smov 0   ;;  %s2766_s24 = smov 0  }
   0x9 LB: > { %s3578_s1 = sld [smem:[#allocation16_spill]]  ;;  %s2784_s28 = sadd.s32 4294967295, %s2705_s24   ;;  %s2705_s24 = sphi %s2766_s24, %s3604_s24   ;;  %s2701_s23 = sphi %s2764_s23, %s3603_s23   ;;  %s2697_s22 = sphi %s2762_s22, %s3602_s22   ;;  %s2693_s21 = sphi %s2760_s21, %s3601_s21  }
   0xa   : > { %p2293_p0 = scmp.ge.s32.totalorder %s2705_s24, 1  ;;  %p45_p1 = scmp.eq.s32.totalorder %s2784_s28, 0 }
   0xb   : > { %p186_p2 = scmp.lt.s32.totalorder %s2705_s24, 3  ;;  %s2707_s30 = smov [#allocation5]  }
   0xc   : > { %s199_s7 = sshll.u32 %s2707_s30, 4  ;;  %s223_s10 = sshll.u32 %s3573_s3, 4  ;;  %s200_s7 = int_to_ptr.vmem [resolvable:$true] %s199_s7  ;;  %s224_s10 = int_to_ptr.hbm [resolvable:$true] %s223_s10 }
   0xd   : > { %p2789_p3 = pnand %p2293_p0, %p186_p2  ;;  %s2708_s12 = smov [#allocation8]  }
   0xe   : > { %s225_s13 = sshll.u32 %s2708_s12, 4  ;;  %s2709_s14 = smov 1024   ;;  %s226_s13 = int_to_ptr.vmem [resolvable:$true] %s225_s13 }
   0xf   : > { %s197_s27 = sshll.u32 %s3578_s1, 4  ;;  %p2332_p4 = pneg %p2789_p3  ;;  %s198_s27 = int_to_ptr.hbm [resolvable:$true] %s197_s27 }
  0x10   : > { %s2710_s15 = smov 64   ;;  %s2711_s16 = smov 128  }
  0x11   : > { %p2801_p6 = pnand %p2332_p4, %p45_p1  ;;  %s2712_s17 = smov 8  }
  0x12   : > { %s212_s20 = sshll.u32 %s3572_s2, 4  ;;  %s2713_s25 = smov [#allocation7]   ;;  %s213_s20 = int_to_ptr.hbm [resolvable:$true] %s212_s20 }
  0x13   : > { %2335 = dma.hbm_to_vmem [thread:$0]  (!%p2801_p6), %s198_s27, 16384, %s200_s7, [#allocation6], %s2709_s14, %s2709_s14, %s2710_s15  }
  0x14   : > { %2341 = dma.hbm_to_vmem [thread:$0]  (!%p2801_p6), %s224_s10, 16384, %s226_s13, [#allocation9], %s2711_s16, %s2711_s16, %s2712_s17  }
  0x15   : > { %s214_s26 = sshll.u32 %s2713_s25, 4  ;;  %s237_s7 = sshll.u32 %s3574_s4, 4  ;;  %s215_s26 = int_to_ptr.vmem [resolvable:$true] %s214_s26  ;;  %s238_s7 = int_to_ptr.hbm [resolvable:$true] %s237_s7 }
  0x16   : > { %2338 = dma.hbm_to_vmem [thread:$0]  (!%p2801_p6), %s213_s20, 128, %s215_s26, [#allocation6]  }
  0x17   : > { %s2714_s8 = smov [#allocation10]   ;;  %s2292_s10 = sadd.s32 4294967294, %s2705_s24  }
  0x18   : > { %s239_s9 = sshll.u32 %s2714_s8, 4  ;;  %s2821_s12 = sadd.s32 1, %s2705_s24   ;;  %s240_s9 = int_to_ptr.vmem [resolvable:$true] %s239_s9 }
  0x19   : > { %2344 = dma.hbm_to_vmem [thread:$0]  (!%p2801_p6), %s238_s7, 16384, %s240_s9, [#allocation9], %s2711_s16, %s2711_s16, %s2712_s17  }
  0x1a   : > { %s28_s13 = ssub.s32 %s2705_s24, %s2821_s12  ;;  %s31_s14 = sadd.s32 1, %s2701_s23 }
  0x1b   : > { %p29_p7 = scmp.eq.s32.totalorder %s28_s13, 0  ;;  %p38_p8 = scmp.ne.s32.totalorder %s2701_s23, %s2697_s22 }
  0x1c   : > { %p39_p9 = scmp.eq.s32.totalorder %s2705_s24, 0  ;;  %p44_p10 = scmp.ne.s32.totalorder %s2697_s22, %s2693_s21 }
  0x1d   : > { %s2832_s15 = scalar_select %p29_p7, %s2701_s23, %s31_s14  }
  0x1e   : > { %p2834_p11 = por %p39_p9, %p38_p8  ;;  %p2840_p12 = por %p45_p1, %p44_p10 }
  0x1f   : > { %p173_p13 = scmp.eq.s32.totalorder %s2784_s28, 1  ;;  %p179_p0 = scmp.eq.s32.totalorder %s2292_s10, 1 }
  0x20   : > { %p2357_p2 = scmp.lt.s32.totalorder %s2705_s24, 2  ;;  %s256_s16 = sand.u32 1, %s2701_s23  }
  0x21   : > { %p2847_p4 = por %p173_p13, %p38_p8  ;;  %p2851_p6 = por %p179_p0, %p44_p10 }
  0x22   : > { %s2299_s20 = sshll.u32 %s256_s16, 3  ;;  %s2300_s25 = sshll.u32 %s2705_s24, 3 }
  0x23   : > { %s264_s30 = scalar_lea.hbm %s3570_s0, %s2300_s25  ;;  %s260_s7 = scalar_lea.vmem [#allocation2], %s2299_s20 }
  0x24   : > { %s268_s8 = sshll.u32 %s260_s7, 4  ;;  %s266_s9 = sshll.u32 %s264_s30, 4  ;;  %s269_s8 = int_to_ptr.vmem [resolvable:$true] %s268_s8  ;;  %s267_s9 = int_to_ptr.hbm [resolvable:$true] %s266_s9 }
  0x25   : > { %p2861_p7 = pnand %p2357_p2, %p2834_p11  ;;  %s257_s13 = scalar_lea.sflag [#allocation3], %s256_s16 }
  0x26   : > { %s2601_s14 = sshra.s32 %s267_s9, 4  ;;  %s2608_s26 = scalar_lea.hbm %s3570_s0, 16  ;;  %s2602_s14 = int_to_ptr.hbm [resolvable:$true] %s2601_s14 }
  0x27   : > { %s2603_s1 = scalar_lea.hbm %s2602_s14, 8  ;;  %p2605_p9 = pneg %p2861_p7 }
  0x28   : > { %p2604_p8 = scmp.ne.s32.totalorder %s2602_s14, %s2603_s1  ;;  %p2609_p11 = scmp.lt.s32.totalorder %s2602_s14, %s3570_s0 }
  0x29   : > { %p2610_p0 = scmp.lt.s32.totalorder %s2608_s26, %s2603_s1 }
  0x2a   : > { %p2606_p10 = pnand %p2605_p9, %p2604_p8 }
  0x2b   : > { %p2611_p2 = por %p2610_p0, %p2609_p11 }
  0x2c   : > { %p2607_p13 = pneg %p2606_p10 }
  0x2e   : > { %p2612_p5 = pnand %p2611_p2, %p2607_p13 }
  0x30   : > { %2615 = shalt.err (!%p2612_p5)
}
  0x31   : > { %2348 = dma.hbm_to_vmem [thread:$0]  (!%p2861_p7), %s267_s9, 128, %s269_s8, %s257_s13  }
  0x32   : > { %277 = sbr.rel (%p2789_p3) target bundleno = 1457 (0x5b1), region = 44  ;;  %s2878_s16 = sand.u32 (!%p2789_p3), 1, %s2697_s22  }
  0x33   : > { %s2302_s30 = sshll.u32 (!%p2789_p3), %s2878_s16, 3  ;;  %s280_s7 = scalar_lea.sflag (!%p2789_p3), [#allocation3], %s2878_s16 }
  0x34   : > { %s2884_s1 = scalar_lea.vmem (!%p2789_p3), [#allocation2], %s2302_s30 }
  0x37   : > { %2676 = dma.done.wait (%p2840_p12), %s280_s7, 128  }
  0x38   : > { %2678 = vsyncadd (%p2840_p12), %s280_s7, 4294967168 }
  0x39   : > { %2680 = dma.done.wait (%p45_p1), [#allocation6], 16512  }
  0x3a   : > { %2682 = vsyncadd (%p45_p1), [#allocation6], 4294950784 }
  0x3b   : > { %2684 = dma.done.wait (%p45_p1), [#allocation9], 32768  }
  0x3c   : > { %2686 = vsyncadd (%p45_p1), [#allocation9], 4294934528  ;;  %v454_v0 = vld [vmem:[#allocation5 + $0x3c0] sm:$0xff]  ;;  %v455_v1 = vld [vmem:[#allocation5 + $0x3c8] sm:$0xff]  ;;  %s2715_s29 = smov 127   ;;  %s2717_s11 = smov 126  }
  0x3d   : > { %v457_v2 = vld [vmem:[#allocation5 + $0x3d8] sm:$0xff]  ;;  %480 = vmatpush.msra.mxu0 %v454_v0  ;;  %500 = vmatpush.msra.mxu1 %v455_v1  ;;  %v446_v3 = vld [vmem:[#allocation5 + $0x380] sm:$0xff]  ;;  %v447_v4 = vld [vmem:[#allocation5 + $0x388] sm:$0xff]  ;;  %s2719_s8 = smov 2   ;;  %s2720_s9 = smov 1  }
  0x3e   : > { %v456_v5 = vld [vmem:[#allocation5 + $0x3d0] sm:$0xff]  ;;  %540 = vmatpush.msra.mxu3 %v457_v2  ;;  %v449_v6 = vld [vmem:[#allocation5 + $0x398] sm:$0xff]  ;;  %v438_v7 = vld [vmem:[#allocation5 + $0x340] sm:$0xff]  ;;  %s2722_s10 = smov 80   ;;  %s2724_s13 = smov 4  }
  0x3f   : > { %520 = vmatpush.msra.mxu2 %v456_v5  ;;  %v439_v8 = vld [vmem:[#allocation5 + $0x348] sm:$0xff]  ;;  %481 = vmatpush.msra.mxu0 %v446_v3  ;;  %v448_v9 = vld [vmem:[#allocation5 + $0x390] sm:$0xff]  ;;  %v441_v10 = vld [vmem:[#allocation5 + $0x358] sm:$0xff]  ;;  %s2309_s14 = sshll.u32 %s2784_s28, 3  ;;  %s332_s7 = scalar_lea.vmem [#allocation11], %s2302_s30 }
  0x40   : > { %501 = vmatpush.msra.mxu1 %v447_v4  ;;  %541 = vmatpush.msra.mxu3 %v449_v6  ;;  %v430_v11 = vld [vmem:[#allocation5 + $0x300] sm:$0xff]  ;;  %v431_v12 = vld [vmem:[#allocation5 + $0x308] sm:$0xff]  ;;  %v440_v13 = vld [vmem:[#allocation5 + $0x350] sm:$0xff]  ;;  %s2179_s26 = scalar_lea.hbm %s3576_s6, %s2309_s14  ;;  %s2169_s28 = scalar_lea.sflag [#allocation4], %s2878_s16 }
  0x41   : > { %521 = vmatpush.msra.mxu2 %v448_v9  ;;  %482 = vmatpush.msra.mxu0 %v438_v7  ;;  %v433_v14 = vld [vmem:[#allocation5 + $0x318] sm:$0xff]  ;;  %v432_v15 = vld [vmem:[#allocation5 + $0x310] sm:$0xff]  ;;  %v422_v16 = vld [vmem:[#allocation5 + $0x2c0] sm:$0xff] }
  0x42   : > { %502 = vmatpush.msra.mxu1 %v439_v8  ;;  %542 = vmatpush.msra.mxu3 %v441_v10  ;;  %v423_v17 = vld [vmem:[#allocation5 + $0x2c8] sm:$0xff]  ;;  %v425_v18 = vld [vmem:[#allocation5 + $0x2d8] sm:$0xff]  ;;  %v424_v19 = vld [vmem:[#allocation5 + $0x2d0] sm:$0xff] }
  0x43   : > { %522 = vmatpush.msra.mxu2 %v440_v13  ;;  %483 = vmatpush.msra.mxu0 %v430_v11  ;;  %v414_v20 = vld [vmem:[#allocation5 + $0x280] sm:$0xff]  ;;  %v415_v21 = vld [vmem:[#allocation5 + $0x288] sm:$0xff]  ;;  %v417_v22 = vld [vmem:[#allocation5 + $0x298] sm:$0xff] }
  0x44   : > { %503 = vmatpush.msra.mxu1 %v431_v12  ;;  %543 = vmatpush.msra.mxu3 %v433_v14  ;;  %v416_v23 = vld [vmem:[#allocation5 + $0x290] sm:$0xff]  ;;  %v406_v24 = vld [vmem:[#allocation5 + $0x240] sm:$0xff]  ;;  %v407_v25 = vld [vmem:[#allocation5 + $0x248] sm:$0xff] }
  0x45   : > { %523 = vmatpush.msra.mxu2 %v432_v15  ;;  %484 = vmatpush.msra.mxu0 %v422_v16  ;;  %v409_v26 = vld [vmem:[#allocation5 + $0x258] sm:$0xff]  ;;  %v408_v27 = vld [vmem:[#allocation5 + $0x250] sm:$0xff]  ;;  %v398_v28 = vld [vmem:[#allocation5 + $0x200] sm:$0xff] }
  0x46   : > { %504 = vmatpush.msra.mxu1 %v423_v17  ;;  %544 = vmatpush.msra.mxu3 %v425_v18  ;;  %v399_v29 = vld [vmem:[#allocation5 + $0x208] sm:$0xff]  ;;  %v401_v30 = vld [vmem:[#allocation5 + $0x218] sm:$0xff]  ;;  %v400_v31 = vld [vmem:[#allocation5 + $0x210] sm:$0xff] }
  0x47   : > { %524 = vmatpush.msra.mxu2 %v424_v19  ;;  %485 = vmatpush.msra.mxu0 %v414_v20  ;;  %v390_v32 = vld [vmem:[#allocation5 + $0x1c0] sm:$0xff]  ;;  %v391_v33 = vld [vmem:[#allocation5 + $0x1c8] sm:$0xff]  ;;  %v393_v34 = vld [vmem:[#allocation5 + $0x1d8] sm:$0xff] }
  0x48   : > { %505 = vmatpush.msra.mxu1 %v415_v21  ;;  %545 = vmatpush.msra.mxu3 %v417_v22  ;;  %v392_v35 = vld [vmem:[#allocation5 + $0x1d0] sm:$0xff]  ;;  %v382_v36 = vld [vmem:[#allocation5 + $0x180] sm:$0xff]  ;;  %v383_v37 = vld [vmem:[#allocation5 + $0x188] sm:$0xff] }
  0x49   : > { %525 = vmatpush.msra.mxu2 %v416_v23  ;;  %486 = vmatpush.msra.mxu0 %v406_v24  ;;  %v385_v38 = vld [vmem:[#allocation5 + $0x198] sm:$0xff]  ;;  %v384_v39 = vld [vmem:[#allocation5 + $0x190] sm:$0xff]  ;;  %v374_v40 = vld [vmem:[#allocation5 + $0x140] sm:$0xff] }
  0x4a   : > { %506 = vmatpush.msra.mxu1 %v407_v25  ;;  %546 = vmatpush.msra.mxu3 %v409_v26  ;;  %v375_v41 = vld [vmem:[#allocation5 + $0x148] sm:$0xff]  ;;  %v377_v42 = vld [vmem:[#allocation5 + $0x158] sm:$0xff]  ;;  %v376_v43 = vld [vmem:[#allocation5 + $0x150] sm:$0xff] }
  0x4b   : > { %526 = vmatpush.msra.mxu2 %v408_v27  ;;  %487 = vmatpush.msra.mxu0 %v398_v28  ;;  %v366_v44 = vld [vmem:[#allocation5 + $0x100] sm:$0xff]  ;;  %v367_v45 = vld [vmem:[#allocation5 + $0x108] sm:$0xff]  ;;  %v369_v46 = vld [vmem:[#allocation5 + $0x118] sm:$0xff] }
  0x4c   : > { %507 = vmatpush.msra.mxu1 %v399_v29  ;;  %547 = vmatpush.msra.mxu3 %v401_v30  ;;  %v368_v47 = vld [vmem:[#allocation5 + $0x110] sm:$0xff]  ;;  %v358_v48 = vld [vmem:[#allocation5 + $0xc0] sm:$0xff]  ;;  %v359_v49 = vld [vmem:[#allocation5 + $0xc8] sm:$0xff] }
  0x4d   : > { %527 = vmatpush.msra.mxu2 %v400_v31  ;;  %488 = vmatpush.msra.mxu0 %v390_v32  ;;  %v361_v50 = vld [vmem:[#allocation5 + $0xd8] sm:$0xff]  ;;  %v360_v51 = vld [vmem:[#allocation5 + $0xd0] sm:$0xff]  ;;  %v350_v52 = vld [vmem:[#allocation5 + $0x80] sm:$0xff] }
  0x4e   : > { %508 = vmatpush.msra.mxu1 %v391_v33  ;;  %548 = vmatpush.msra.mxu3 %v393_v34  ;;  %v351_v53 = vld [vmem:[#allocation5 + $0x88] sm:$0xff]  ;;  %v353_v54 = vld [vmem:[#allocation5 + $0x98] sm:$0xff]  ;;  %v352_v55 = vld [vmem:[#allocation5 + $0x90] sm:$0xff] }
  0x4f   : > { %528 = vmatpush.msra.mxu2 %v392_v35  ;;  %489 = vmatpush.msra.mxu0 %v382_v36  ;;  %v342_v56 = vld [vmem:[#allocation5 + $0x40] sm:$0xff]  ;;  %v343_v57 = vld [vmem:[#allocation5 + $0x48] sm:$0xff]  ;;  %v345_v58 = vld [vmem:[#allocation5 + $0x58] sm:$0xff] }
  0x50   : > { %509 = vmatpush.msra.mxu1 %v383_v37  ;;  %549 = vmatpush.msra.mxu3 %v385_v38  ;;  %v344_v59 = vld [vmem:[#allocation5 + $0x50] sm:$0xff]  ;;  %v334_v60 = vld [vmem:[#allocation5] sm:$0xff]  ;;  %v335_v61 = vld [vmem:[#allocation5 + $0x8] sm:$0xff] }
  0x51   : > { %529 = vmatpush.msra.mxu2 %v384_v39  ;;  %490 = vmatpush.msra.mxu0 %v374_v40  ;;  %v337_v62 = vld [vmem:[#allocation5 + $0x18] sm:$0xff]  ;;  %v458_v0 = vld [vmem:[#allocation5 + $0x3e0] sm:$0xff]  ;;  %v459_v1 = vld [vmem:[#allocation5 + $0x3e8] sm:$0xff] }
  0x52   : > { %510 = vmatpush.msra.mxu1 %v375_v41  ;;  %550 = vmatpush.msra.mxu3 %v377_v42  ;;  %v2899_v63 = vld [vmem:[%s2884_s1] sm:$0xff]  ;;  %v450_v4 = vld [vmem:[#allocation5 + $0x3a0] sm:$0xff]  ;;  %v451_v5 = vld [vmem:[#allocation5 + $0x3a8] sm:$0xff]  ;;  %s2181_s1 = sshll.u32 %s332_s7, 4  ;;  %s2182_s1 = int_to_ptr.vmem [resolvable:$true] %s2181_s1 }
  0x53   : > { %530 = vmatpush.msra.mxu2 %v376_v43  ;;  %491 = vmatpush.msra.mxu0 %v366_v44  ;;  %v461_v2 = vld [vmem:[#allocation5 + $0x3f8] sm:$0xff]  ;;  %v336_v3 = vld [vmem:[#allocation5 + $0x10] sm:$0xff]  ;;  %v442_v8 = vld [vmem:[#allocation5 + $0x360] sm:$0xff] }
  0x54   : > { %511 = vmatpush.msra.mxu1 %v367_v45  ;;  %551 = vmatpush.msra.mxu3 %v369_v46  ;;  %v460_v6 = vld [vmem:[#allocation5 + $0x3f0] sm:$0xff]  ;;  %v453_v7 = vld [vmem:[#allocation5 + $0x3b8] sm:$0xff]  ;;  %v443_v9 = vld [vmem:[#allocation5 + $0x368] sm:$0xff] }
  0x55   : > { %531 = vmatpush.msra.mxu2 %v368_v47  ;;  %492 = vmatpush.msra.mxu0 %v358_v48  ;;  %v452_v10 = vld [vmem:[#allocation5 + $0x3b0] sm:$0xff]  ;;  %v445_v11 = vld [vmem:[#allocation5 + $0x378] sm:$0xff]  ;;  %v434_v12 = vld [vmem:[#allocation5 + $0x320] sm:$0xff] }
  0x56   : > { %512 = vmatpush.msra.mxu1 %v359_v49  ;;  %552 = vmatpush.msra.mxu3 %v361_v50  ;;  %v435_v13 = vld [vmem:[#allocation5 + $0x328] sm:$0xff]  ;;  %v444_v14 = vld [vmem:[#allocation5 + $0x370] sm:$0xff]  ;;  %v437_v15 = vld [vmem:[#allocation5 + $0x338] sm:$0xff] }
  0x57   : > { %532 = vmatpush.msra.mxu2 %v360_v51  ;;  %493 = vmatpush.msra.mxu0 %v350_v52  ;;  %v426_v16 = vld [vmem:[#allocation5 + $0x2e0] sm:$0xff]  ;;  %v427_v17 = vld [vmem:[#allocation5 + $0x2e8] sm:$0xff]  ;;  %v436_v18 = vld [vmem:[#allocation5 + $0x330] sm:$0xff] }
  0x58   : > { %513 = vmatpush.msra.mxu1 %v351_v53  ;;  %553 = vmatpush.msra.mxu3 %v353_v54  ;;  %v429_v19 = vld [vmem:[#allocation5 + $0x2f8] sm:$0xff]  ;;  %v418_v20 = vld [vmem:[#allocation5 + $0x2a0] sm:$0xff]  ;;  %v419_v21 = vld [vmem:[#allocation5 + $0x2a8] sm:$0xff] }
  0x59   : > { %533 = vmatpush.msra.mxu2 %v352_v55  ;;  %494 = vmatpush.msra.mxu0 %v342_v56  ;;  %v428_v22 = vld [vmem:[#allocation5 + $0x2f0] sm:$0xff]  ;;  %v421_v23 = vld [vmem:[#allocation5 + $0x2b8] sm:$0xff]  ;;  %v410_v24 = vld [vmem:[#allocation5 + $0x260] sm:$0xff] }
  0x5a   : > { %514 = vmatpush.msra.mxu1 %v343_v57  ;;  %554 = vmatpush.msra.mxu3 %v345_v58  ;;  %v411_v25 = vld [vmem:[#allocation5 + $0x268] sm:$0xff]  ;;  %v420_v26 = vld [vmem:[#allocation5 + $0x2b0] sm:$0xff]  ;;  %v413_v27 = vld [vmem:[#allocation5 + $0x278] sm:$0xff] }
  0x5b   : > { %534 = vmatpush.msra.mxu2 %v344_v59  ;;  %495 = vmatpush.msra.mxu0 %v334_v60  ;;  %v402_v28 = vld [vmem:[#allocation5 + $0x220] sm:$0xff]  ;;  %v403_v29 = vld [vmem:[#allocation5 + $0x228] sm:$0xff]  ;;  %v412_v30 = vld [vmem:[#allocation5 + $0x270] sm:$0xff] }
  0x5c   : > { %515 = vmatpush.msra.mxu1 %v335_v61  ;;  %555 = vmatpush.msra.mxu3 %v337_v62  ;;  %v405_v31 = vld [vmem:[#allocation5 + $0x238] sm:$0xff]  ;;  %v394_v32 = vld [vmem:[#allocation5 + $0x1e0] sm:$0xff]  ;;  %v395_v33 = vld [vmem:[#allocation5 + $0x1e8] sm:$0xff] }
  0x5d   : > { %496 = vmatmul.f32.vlgmr.msra.gmra.mxu0 %v2899_v63  ;;  %516 = vmatmul.f32.vlgmr.msra.gmra.mxu1 %v2899_v63  ;;  %v404_v34 = vld [vmem:[#allocation5 + $0x230] sm:$0xff]  ;;  %v397_v35 = vld [vmem:[#allocation5 + $0x1f8] sm:$0xff]  ;;  %v386_v36 = vld [vmem:[#allocation5 + $0x1a0] sm:$0xff] }
  0x5e   : > { %556 = vmatmul.f32.vlgmr.msra.gmra.mxu3 %v2899_v63  ;;  %560 = vmatpush.msrb.mxu0 %v458_v0  ;;  %v387_v37 = vld [vmem:[#allocation5 + $0x1a8] sm:$0xff]  ;;  %v396_v38 = vld [vmem:[#allocation5 + $0x1f0] sm:$0xff]  ;;  %v389_v39 = vld [vmem:[#allocation5 + $0x1b8] sm:$0xff] }
  0x5f   : > { %580 = vmatpush.msrb.mxu1 %v459_v1  ;;  %620 = vmatpush.msrb.mxu3 %v461_v2  ;;  %v378_v40 = vld [vmem:[#allocation5 + $0x160] sm:$0xff]  ;;  %v379_v41 = vld [vmem:[#allocation5 + $0x168] sm:$0xff]  ;;  %v388_v42 = vld [vmem:[#allocation5 + $0x1b0] sm:$0xff] }
  0x60   : > { %535 = vmatpush.msra.mxu2 %v336_v3  ;;  %561 = vmatpush.msrb.mxu0 %v450_v4  ;;  %v381_v43 = vld [vmem:[#allocation5 + $0x178] sm:$0xff]  ;;  %v370_v44 = vld [vmem:[#allocation5 + $0x120] sm:$0xff]  ;;  %v371_v45 = vld [vmem:[#allocation5 + $0x128] sm:$0xff] }
  0x61   : > { %536 = vmatmul.f32.vlgmr.msra.gmra.mxu2 %v2899_v63  ;;  %581 = vmatpush.msrb.mxu1 %v451_v5  ;;  %v380_v46 = vld [vmem:[#allocation5 + $0x170] sm:$0xff]  ;;  %v373_v47 = vld [vmem:[#allocation5 + $0x138] sm:$0xff]  ;;  %v362_v48 = vld [vmem:[#allocation5 + $0xe0] sm:$0xff] }
  0x62   : > { %600 = vmatpush.msrb.mxu2 %v460_v6  ;;  %621 = vmatpush.msrb.mxu3 %v453_v7  ;;  %v363_v49 = vld [vmem:[#allocation5 + $0xe8] sm:$0xff]  ;;  %v372_v50 = vld [vmem:[#allocation5 + $0x130] sm:$0xff]  ;;  %v365_v51 = vld [vmem:[#allocation5 + $0xf8] sm:$0xff] }
  0x63   : > { %562 = vmatpush.msrb.mxu0 %v442_v8  ;;  %582 = vmatpush.msrb.mxu1 %v443_v9  ;;  %v354_v52 = vld [vmem:[#allocation5 + $0xa0] sm:$0xff]  ;;  %v355_v53 = vld [vmem:[#allocation5 + $0xa8] sm:$0xff]  ;;  %v364_v54 = vld [vmem:[#allocation5 + $0xf0] sm:$0xff] }
  0x64   : > { %601 = vmatpush.msrb.mxu2 %v452_v10  ;;  %622 = vmatpush.msrb.mxu3 %v445_v11  ;;  %v357_v55 = vld [vmem:[#allocation5 + $0xb8] sm:$0xff]  ;;  %v346_v56 = vld [vmem:[#allocation5 + $0x60] sm:$0xff]  ;;  %v347_v57 = vld [vmem:[#allocation5 + $0x68] sm:$0xff] }
  0x65   : > { %563 = vmatpush.msrb.mxu0 %v434_v12  ;;  %583 = vmatpush.msrb.mxu1 %v435_v13  ;;  %v356_v58 = vld [vmem:[#allocation5 + $0xb0] sm:$0xff]  ;;  %v349_v59 = vld [vmem:[#allocation5 + $0x78] sm:$0xff]  ;;  %v338_v60 = vld [vmem:[#allocation5 + $0x20] sm:$0xff] }
  0x66   : > { %602 = vmatpush.msrb.mxu2 %v444_v14  ;;  %623 = vmatpush.msrb.mxu3 %v437_v15  ;;  %v339_v61 = vld [vmem:[#allocation5 + $0x28] sm:$0xff]  ;;  %v348_v62 = vld [vmem:[#allocation5 + $0x70] sm:$0xff]  ;;  %v341_v0 = vld [vmem:[#allocation5 + $0x38] sm:$0xff] }
  0x67   : > { %564 = vmatpush.msrb.mxu0 %v426_v16  ;;  %584 = vmatpush.msrb.mxu1 %v427_v17  ;;  %v340_v1 = vld [vmem:[#allocation5 + $0x30] sm:$0xff]  ;;  %v462_v2 = vld [vmem:[#allocation7] sm:$0xff] }
  0x68   : > { %603 = vmatpush.msrb.mxu2 %v436_v18  ;;  %624 = vmatpush.msrb.mxu3 %v429_v19  ;;  %v464_v3 = vperm.slane %v462_v2, 0  ;;  %v465_v4 = vperm.slane %v462_v2, 1  ;;  %v467_v9 = vperm.slane %v462_v2, 3  ;;  %v466_v11 = vperm.slane %v462_v2, 2 }
  0x69   : > { %565 = vmatpush.msrb.mxu0 %v418_v20  ;;  %585 = vmatpush.msrb.mxu1 %v419_v21  ;;  %v468_v14 = vperm.slane %v462_v2, 4  ;;  %v469_v15 = vperm.slane %v462_v2, 5  ;;  %v471_v20 = vperm.slane %v462_v2, 7  ;;  %v470_v21 = vperm.slane %v462_v2, 6 }
  0x6a   : > { %604 = vmatpush.msrb.mxu2 %v428_v22  ;;  %625 = vmatpush.msrb.mxu3 %v421_v23 }
  0x6b   : > { %566 = vmatpush.msrb.mxu0 %v410_v24  ;;  %586 = vmatpush.msrb.mxu1 %v411_v25 }
  0x6c   : > { %605 = vmatpush.msrb.mxu2 %v420_v26  ;;  %626 = vmatpush.msrb.mxu3 %v413_v27  ;;  %v2716_v26 = vmov 84  }
  0x6d   : > { %567 = vmatpush.msrb.mxu0 %v402_v28  ;;  %587 = vmatpush.msrb.mxu1 %v403_v29 }
  0x6e   : > { %606 = vmatpush.msrb.mxu2 %v412_v30  ;;  %627 = vmatpush.msrb.mxu3 %v405_v31 }
  0x6f   : > { %568 = vmatpush.msrb.mxu0 %v394_v32  ;;  %588 = vmatpush.msrb.mxu1 %v395_v33 }
  0x70   : > { %607 = vmatpush.msrb.mxu2 %v404_v34  ;;  %628 = vmatpush.msrb.mxu3 %v397_v35 }
  0x71   : > { %569 = vmatpush.msrb.mxu0 %v386_v36  ;;  %589 = vmatpush.msrb.mxu1 %v387_v37 }
  0x72   : > { %608 = vmatpush.msrb.mxu2 %v396_v38  ;;  %629 = vmatpush.msrb.mxu3 %v389_v39 }
  0x73   : > { %570 = vmatpush.msrb.mxu0 %v378_v40  ;;  %590 = vmatpush.msrb.mxu1 %v379_v41 }
  0x74   : > { %609 = vmatpush.msrb.mxu2 %v388_v42  ;;  %630 = vmatpush.msrb.mxu3 %v381_v43  ;;  %v2718_v43 = vmov 80  }
  0x75   : > { %571 = vmatpush.msrb.mxu0 %v370_v44  ;;  %591 = vmatpush.msrb.mxu1 %v371_v45 }
  0x76   : > { %610 = vmatpush.msrb.mxu2 %v380_v46  ;;  %631 = vmatpush.msrb.mxu3 %v373_v47 }
  0x77   : > { %572 = vmatpush.msrb.mxu0 %v362_v48  ;;  %592 = vmatpush.msrb.mxu1 %v363_v49 }
  0x78   : > { %611 = vmatpush.msrb.mxu2 %v372_v50  ;;  %632 = vmatpush.msrb.mxu3 %v365_v51 }
  0x79   : > { %573 = vmatpush.msrb.mxu0 %v354_v52  ;;  %593 = vmatpush.msrb.mxu1 %v355_v53 }
  0x7a   : > { %612 = vmatpush.msrb.mxu2 %v364_v54  ;;  %633 = vmatpush.msrb.mxu3 %v357_v55 }
  0x7b   : > { %574 = vmatpush.msrb.mxu0 %v346_v56  ;;  %594 = vmatpush.msrb.mxu1 %v347_v57 }
  0x7c   : > { %613 = vmatpush.msrb.mxu2 %v356_v58  ;;  %634 = vmatpush.msrb.mxu3 %v349_v59 }
  0x7d   : > { %575 = vmatpush.msrb.mxu0 %v338_v60  ;;  %595 = vmatpush.msrb.mxu1 %v339_v61 }
  0x7e   : > { %614 = vmatpush.msrb.mxu2 %v348_v62  ;;  %635 = vmatpush.msrb.mxu3 %v341_v0 }
  0x7f   : > { %576 = vmatmul.f32.vlgmr.msrb.gmra.mxu0 %v2899_v63  ;;  %596 = vmatmul.f32.vlgmr.msrb.gmra.mxu1 %v2899_v63 }
  0x80   : > { %636 = vmatmul.f32.vlgmr.msrb.gmra.mxu3 %v2899_v63  ;;  %615 = vmatpush.msrb.mxu2 %v340_v1 }
  0x81   : > { %616 = vmatmul.f32.vlgmr.msrb.gmra.mxu2 %v2899_v63  ;;  %2413 = vset.pattern.permute.xlu1 %v2716_v26 }
  0x82   : > { %2415 = vset.pattern.permute.xlu2 %v2716_v26  ;;  %2414 = vset.pattern.permute.xlu0 %v2716_v26 }
  0xda   : > { %v497_v5 = vpop.f32.mrf.mxu0  ;;  %v517_v7 = vpop.f32.mrf.mxu1 }
  0xdb   : > { %v2909_v6 = vadd.f32 %v497_v5, %v464_v3  ;;  %v2911_v8 = vadd.f32 %v517_v7, %v465_v4  ;;  %v648_v4 = vlaneseq  ;;  %v2721_v7 = vmov 3  }
  0xdd   : > { %654 = vrot.lane.b32.xlu0 %v2909_v6, %s2715_s29  ;;  %774 = vrot.lane.b32.xlu2 %v2911_v8, %s2715_s29 }
  0xe1   : > { %v557_v10 = vpop.f32.mrf.mxu3 }
  0xe2   : > { %v2917_v63 = vadd.f32 %v557_v10, %v467_v9  ;;  %v3021_v10 = vand.u32 127, %v648_v4 }
  0xe4   : > { %v537_v12 = vpop.f32.mrf.mxu2  ;;  %1004 = vrot.lane.b32.xlu1 %v2917_v63, %s2715_s29  ;;  %vm663_vm1 = vcmp.lt.s32.totalorder %v3021_v10, 4 }
  0xe5   : > { %v2921_v13 = vadd.f32 %v537_v12, %v466_v11 }
  0xe7   : > { %889 = vrot.lane.b32.xlu0 %v2921_v13, %s2715_s29 }
  0xfc   : > { %v577_v16 = vpop.f32.mrf.mxu0  ;;  %v597_v18 = vpop.f32.mrf.mxu1 }
  0xfd   : > { %v2925_v17 = vadd.f32 %v577_v16, %v468_v14  ;;  %v2927_v19 = vadd.f32 %v597_v18, %v469_v15 }
  0xff   : > { %1119 = vrot.lane.b32.xlu1 %v2925_v17, %s2715_s29  ;;  %1234 = vrot.lane.b32.xlu0 %v2927_v19, %s2715_s29 }
 0x103   : > { %v637_v22 = vpop.f32.mrf.mxu3 }
 0x104   : > { %v2933_v23 = vadd.f32 %v637_v22, %v471_v20  ;;  %v617_v24 = vpop.f32.mrf.mxu2 }
 0x105   : > { %v2935_v25 = vadd.f32 %v617_v24, %v470_v21 }
 0x106   : > { %1464 = vrot.lane.b32.xlu2 %v2933_v23, %s2715_s29 }
 0x107   : > { %1349 = vrot.lane.b32.xlu0 %v2935_v25, %s2715_s29 }
 0x137   : > { %v775_v29 = vpop.permute.xlu2 %774 }
 0x138   : > { %v777_v32 = vmax.f32 %v2911_v8, %v775_v29 }
 0x14f   : > { %v655_v27 = vpop.permute.xlu0 %654 }
 0x150   : > { %v657_v28 = vmax.f32 %v2909_v6, %v655_v27 }
 0x152   : > { %672 = vperm.xlu1 %2413, %v657_v28   ;;  %659 = vrot.lane.b32.xlu0 %v657_v28, %s2717_s11 }
 0x156   : > { %v1005_v30 = vpop.permute.xlu1 %1004 }
 0x157   : > { %v1007_v31 = vmax.f32 %v2917_v63, %v1005_v30 }
 0x159   : > { %v890_v33 = vpop.permute.xlu0 %889  ;;  %1009 = vrot.lane.b32.xlu2 %v1007_v31, %s2717_s11 }
 0x15a   : > { %v892_v34 = vmax.f32 %v2921_v13, %v890_v33  ;;  %779 = vrot.lane.b32.xlu0 %v777_v32, %s2717_s11 }
 0x15c   : > { %894 = vrot.lane.b32.xlu1 %v892_v34, %s2717_s11 }
 0x160   : > { %v1465_v35 = vpop.permute.xlu2 %1464 }
 0x161   : > { %904 = vperm.xlu2 %2415, %v892_v34   ;;  %v1467_v36 = vmax.f32 %v2933_v23, %v1465_v35 }
 0x162   : > { %789 = vperm.xlu0 %2414, %v777_v32  }
 0x164   : > { %1019 = vperm.xlu1 %2413, %v1007_v31  }
 0x16a   : > { %1469 = vrot.lane.b32.xlu0 %v1467_v36, %s2717_s11 }
 0x16b   : > { %2418 = vset.pattern.permute.xlu0 %v2718_v43 }
 0x171   : > { %v1120_v37 = vpop.permute.xlu1 %1119  ;;  %v1235_v39 = vpop.permute.xlu0 %1234 }
 0x172   : > { %v1122_v38 = vmax.f32 %v2925_v17, %v1120_v37  ;;  %v1237_v40 = vmax.f32 %v2927_v19, %v1235_v39 }
 0x174   : > { %1124 = vrot.lane.b32.xlu2 %v1122_v38, %s2717_s11  ;;  %1239 = vrot.lane.b32.xlu1 %v1237_v40, %s2717_s11 }
 0x179   : > { %v1350_v41 = vpop.permute.xlu0 %1349 }
 0x17a   : > { %v1352_v42 = vmax.f32 %v2935_v25, %v1350_v41 }
 0x17c   : > { %1134 = vperm.xlu2 %2415, %v1122_v38   ;;  %1249 = vperm.xlu1 %2413, %v1237_v40  }
 0x184   : > { %1364 = vperm.xlu2 %2415, %v1352_v42   ;;  %1354 = vrot.lane.b32.xlu1 %v1352_v42, %s2717_s11 }
 0x18c   : > { %1479 = vperm.xlu1 %2413, %v1467_v36   ;;  %2417 = vset.pattern.permute.xlu2 %v2718_v43 }
 0x194   : > { %2416 = vset.pattern.permute.xlu1 %v2718_v43 }
 0x1b3   : > { %v1010_v49 = vpop.permute.xlu2 %1009 }
 0x1b4   : > { %v2975_v50 = vmax.f32 %v1007_v31, %v1010_v49 }
 0x1bb   : > { %v905_v54 = vpop.permute.xlu2 %904 }
 0x1c4   : > { %v660_v44 = vpop.permute.xlu0 %659  ;;  %v673_v46 = vpop.permute.xlu1 %672 }
 0x1c5   : > { %v2963_v45 = vmax.f32 %v657_v28, %v660_v44 }
 0x1c7   : > { %737 = vrot.lane.b32.xlu2 %v2963_v45, %s2719_s8  ;;  %668 = vperm.xlu1 %2416, %v2963_v45  }
 0x1cc   : > { %v780_v47 = vpop.permute.xlu0 %779 }
 0x1cd   : > { %v2968_v48 = vmax.f32 %v777_v32, %v780_v47 }
 0x1ce   : > { %v895_v51 = vpop.permute.xlu1 %894  ;;  %v1125_v58 = vpop.permute.xlu2 %1124 }
 0x1cf   : > { %733 = vrot.lane.b32.xlu1 %v2963_v45, %s2720_s9  ;;  %854 = vrot.lane.b32.xlu0 %v2968_v48, %s2719_s8  ;;  %v2982_v52 = vmax.f32 %v892_v34, %v895_v51  ;;  %v2995_v59 = vmax.f32 %v1122_v38, %v1125_v58 }
 0x1d0   : > { %785 = vperm.xlu2 %2417, %v2968_v48  }
 0x1d4   : > { %v790_v55 = vpop.permute.xlu0 %789 }
 0x1d6   : > { %v1020_v53 = vpop.permute.xlu1 %1019  ;;  %v1135_v2 = vpop.permute.xlu2 %1134 }
 0x1d7   : > { %850 = vrot.lane.b32.xlu1 %v2968_v48, %s2720_s9  ;;  %1015 = vperm.xlu0 %2418, %v2975_v50  }
 0x1d8   : > { %1084 = vrot.lane.b32.xlu2 %v2975_v50, %s2719_s8 }
 0x1dc   : > { %v1470_v60 = vpop.permute.xlu0 %1469 }
 0x1dd   : > { %v2998_v61 = vmax.f32 %v1467_v36, %v1470_v60 }
 0x1de   : > { %v1365_v3 = vpop.permute.xlu2 %1364 }
 0x1df   : > { %900 = vperm.xlu1 %2416, %v2982_v52  }
 0x1e0   : > { %965 = vrot.lane.b32.xlu2 %v2982_v52, %s2720_s9 }
 0x1e6   : > { %v1240_v56 = vpop.permute.xlu1 %1239 }
 0x1e7   : > { %969 = vrot.lane.b32.xlu1 %v2982_v52, %s2719_s8  ;;  %v2989_v57 = vmax.f32 %v1237_v40, %v1240_v56 }
 0x1e8   : > { %1080 = vrot.lane.b32.xlu2 %v2975_v50, %s2720_s9 }
 0x1e9   : > { %1310 = vrot.lane.b32.xlu0 %v2989_v57, %s2720_s9 }
 0x1ee   : > { %v1250_v62 = vpop.permute.xlu1 %1249 }
 0x1ef   : > { %1130 = vperm.xlu1 %2416, %v2995_v59  }
 0x1f0   : > { %1245 = vperm.xlu2 %2417, %v2989_v57  }
 0x1f1   : > { %1475 = vperm.xlu0 %2418, %v2998_v61  }
 0x1f6   : > { %v1355_v0 = vpop.permute.xlu1 %1354 }
 0x1f7   : > { %1314 = vrot.lane.b32.xlu1 %v2989_v57, %s2719_s8  ;;  %v3008_v1 = vmax.f32 %v1352_v42, %v1355_v0 }
 0x1f8   : > { %1199 = vrot.lane.b32.xlu2 %v2995_v59, %s2719_s8 }
 0x1f9   : > { %1544 = vrot.lane.b32.xlu0 %v2998_v61, %s2719_s8 }
 0x1fe   : > { %v1480_v14 = vpop.permute.xlu1 %1479 }
 0x1ff   : > { %1360 = vperm.xlu1 %2416, %v3008_v1  }
 0x200   : > { %1195 = vrot.lane.b32.xlu2 %v2995_v59, %s2720_s9 }
 0x201   : > { %1425 = vrot.lane.b32.xlu0 %v3008_v1, %s2720_s9 }
 0x207   : > { %1429 = vrot.lane.b32.xlu1 %v3008_v1, %s2719_s8 }
 0x209   : > { %1540 = vrot.lane.b32.xlu0 %v2998_v61, %s2720_s9 }
 0x221   : > { %v738_v5 = vpop.permute.xlu2 %737 }
 0x222   : > { %vm740_vm0 = vcmp.eq.f32.partialorder %v2909_v6, %v738_v5 }
 0x223   : > { %v741_v9 = vsel %vm740_vm0, 2, %v2721_v7  ;;  %vm732_vm0 = vcmp.eq.f32.partialorder %v2909_v6, %v2963_v45 }
 0x224   : > { %742 = vrot.lane.b32.xlu0 %v741_v9, %s2715_s29 }
 0x22a   : > { %v786_v11 = vpop.permute.xlu2 %785 }
 0x22b   : > { %v792_v12 = vsel %vm663_vm1, %v786_v11, %v790_v55 }
 0x22c   : > { %794 = vrot.lane.b32.xlu1 %v792_v12, %s2722_s10 }
 0x232   : > { %v1085_v15 = vpop.permute.xlu2 %1084 }
 0x233   : > { %vm1087_vm3 = vcmp.eq.f32.partialorder %v2917_v63, %v1085_v15 }
 0x234   : > { %v1088_v32 = vsel %vm1087_vm3, 2, %v2721_v7  ;;  %vm1079_vm3 = vcmp.eq.f32.partialorder %v2917_v63, %v2975_v50 }
 0x239   : > { %v669_v16 = vpop.permute.xlu1 %668 }
 0x23a   : > { %v675_v18 = vsel %vm663_vm1, %v669_v16, %v673_v46  ;;  %v3030_v20 = vpop.permute.xlu2 %965 }
 0x23b   : > { %677 = vrot.lane.b32.xlu2 %v675_v18, %s2722_s10  ;;  %vm968_vm12 = vcmp.eq.f32.partialorder %v2921_v13, %v3030_v20 }
 0x241   : > { %v734_v21 = vpop.permute.xlu1 %733  ;;  %v855_v22 = vpop.permute.xlu0 %854 }
 0x242   : > { %vm857_vm2 = vcmp.eq.f32.partialorder %v2911_v8, %v855_v22  ;;  %v1081_v27 = vpop.permute.xlu2 %1080  ;;  %vm736_vm9 = vcmp.eq.f32.partialorder %v2909_v6, %v734_v21 }
 0x243   : > { %v858_v24 = vsel %vm857_vm2, 2, %v2721_v7  ;;  %vm1083_vm11 = vcmp.eq.f32.partialorder %v2917_v63, %v1081_v27  ;;  %vm964_vm2 = vcmp.eq.f32.partialorder %v2921_v13, %v2982_v52 }
 0x244   : > { %859 = vrot.lane.b32.xlu2 %v858_v24, %s2715_s29 }
 0x249   : > { %v851_v28 = vpop.permute.xlu1 %850  ;;  %v1016_v29 = vpop.permute.xlu0 %1015 }
 0x24a   : > { %v1022_v30 = vsel %vm663_vm1, %v1016_v29, %v1020_v53  ;;  %v1246_v34 = vpop.permute.xlu2 %1245  ;;  %vm853_vm10 = vcmp.eq.f32.partialorder %v2911_v8, %v851_v28 }
 0x24b   : > { %1024 = vrot.lane.b32.xlu0 %v1022_v30, %s2722_s10  ;;  %v1252_v36 = vsel %vm663_vm1, %v1246_v34, %v1250_v62 }
 0x251   : > { %v901_v31 = vpop.permute.xlu1 %900 }
 0x252   : > { %v907_v33 = vsel %vm663_vm1, %v901_v31, %v905_v54  ;;  %v1200_v38 = vpop.permute.xlu2 %1199 }
 0x253   : > { %909 = vrot.lane.b32.xlu2 %v907_v33, %s2722_s10  ;;  %1089 = vrot.lane.b32.xlu0 %v1088_v32, %s2715_s29  ;;  %vm1202_vm5 = vcmp.eq.f32.partialorder %v2925_v17, %v1200_v38 }
 0x254   : > { %v1203_v42 = vsel %vm1202_vm5, 2, %v2721_v7  ;;  %vm1194_vm5 = vcmp.eq.f32.partialorder %v2925_v17, %v2995_v59 }
 0x259   : > { %v970_v35 = vpop.permute.xlu1 %969 }
 0x25a   : > { %vm972_vm4 = vcmp.eq.f32.partialorder %v2921_v13, %v970_v35  ;;  %v1196_v62 = vpop.permute.xlu2 %1195 }
 0x25b   : > { %v973_v37 = vsel %vm972_vm4, 2, %v2721_v7  ;;  %1254 = vrot.lane.b32.xlu2 %v1252_v36, %s2722_s10  ;;  %v3048_v39 = vpop.permute.xlu0 %1310  ;;  %vm1198_vm13 = vcmp.eq.f32.partialorder %v2925_v17, %v1196_v62  ;;  %vm1309_vm4 = vcmp.eq.f32.partialorder %v2927_v19, %v2989_v57 }
 0x25c   : > { %974 = vrot.lane.b32.xlu1 %v973_v37, %s2715_s29  ;;  %vm1313_vm14 = vcmp.eq.f32.partialorder %v2927_v19, %v3048_v39 }
 0x261   : > { %v1131_v40 = vpop.permute.xlu1 %1130 }
 0x262   : > { %v1137_v41 = vsel %vm663_vm1, %v1131_v40, %v1135_v2 }
 0x263   : > { %1139 = vrot.lane.b32.xlu0 %v1137_v41, %s2722_s10  ;;  %v1476_v46 = vpop.permute.xlu0 %1475 }
 0x264   : > { %1204 = vrot.lane.b32.xlu1 %v1203_v42, %s2715_s29  ;;  %v1482_v53 = vsel %vm663_vm1, %v1476_v46, %v1480_v14 }
 0x269   : > { %v1315_v44 = vpop.permute.xlu1 %1314 }
 0x26a   : > { %vm1317_vm6 = vcmp.eq.f32.partialorder %v2927_v19, %v1315_v44 }
 0x26b   : > { %v1318_v47 = vsel %vm1317_vm6, 2, %v2721_v7  ;;  %v1545_v54 = vpop.permute.xlu0 %1544  ;;  %vm849_vm6 = vcmp.eq.f32.partialorder %v2911_v8, %v2968_v48 }
 0x26c   : > { %1319 = vrot.lane.b32.xlu1 %v1318_v47, %s2715_s29  ;;  %vm1547_vm7 = vcmp.eq.f32.partialorder %v2933_v23, %v1545_v54 }
 0x26d   : > { %v1548_v56 = vsel %vm1547_vm7, 2, %v2721_v7  ;;  %vm1424_vm7 = vcmp.eq.f32.partialorder %v2935_v25, %v3008_v1 }
 0x271   : > { %v1361_v49 = vpop.permute.xlu1 %1360 }
 0x272   : > { %v1367_v51 = vsel %vm663_vm1, %v1361_v49, %v1365_v3 }
 0x273   : > { %1369 = vrot.lane.b32.xlu2 %v1367_v51, %s2722_s10  ;;  %v1426_v60 = vpop.permute.xlu0 %1425 }
 0x274   : > { %1484 = vrot.lane.b32.xlu1 %v1482_v53, %s2722_s10  ;;  %vm1428_vm15 = vcmp.eq.f32.partialorder %v2935_v25, %v1426_v60 }
 0x279   : > { %v1430_v55 = vpop.permute.xlu1 %1429 }
 0x27a   : > { %vm1432_vm8 = vcmp.eq.f32.partialorder %v2935_v25, %v1430_v55 }
 0x27b   : > { %v1433_v58 = vsel %vm1432_vm8, 2, %v2721_v7  ;;  %1549 = vrot.lane.b32.xlu2 %v1548_v56, %s2715_s29  ;;  %v3066_v0 = vpop.permute.xlu0 %1540  ;;  %vm1539_vm8 = vcmp.eq.f32.partialorder %v2933_v23, %v2998_v61 }
 0x27c   : > { %1434 = vrot.lane.b32.xlu1 %v1433_v58, %s2715_s29  ;;  %vm1543_vm1 = vcmp.eq.f32.partialorder %v2933_v23, %v3066_v0 }
 0x295   : > { %v678_v2 = vpop.permute.xlu2 %677 }
 0x296   : > { %v743_v3 = vpop.permute.xlu0 %742  ;;  %v680_v29 = vsub.f32 %v2909_v6, %v678_v2 }
 0x297   : > { %v744_v4 = vsel %vm736_vm9, 1, %v743_v3 }
 0x298   : > { %745 = vrot.lane.b32.xlu2 %v744_v4, %s2715_s29  ;;  %v681_v20 = vmul.f32 1.442695, %v680_v29 }
 0x29e   : > { %v860_v5 = vpop.permute.xlu2 %859  ;;  %v795_v12 = vpop.permute.xlu1 %794 }
 0x29f   : > { %v861_v9 = vsel %vm853_vm10, 1, %v860_v5  ;;  %v797_v36 = vsub.f32 %v2911_v8, %v795_v12 }
 0x2a0   : > { %862 = vrot.lane.b32.xlu1 %v861_v9, %s2715_s29 }
 0x2a1   : > { %v798_v38 = vmul.f32 1.442695, %v797_v36 }
 0x2ad   : > { %v910_v15 = vpop.permute.xlu2 %909 }
 0x2ae   : > { %v912_v21 = vsub.f32 %v2921_v13, %v910_v15 }
 0x2b0   : > { %v913_v22 = vmul.f32 1.442695, %v912_v21 }
 0x2b2   : > { %2433 = vpow2.f32 %v913_v22 }
 0x2b3   : > { %2435 = vpow2.f32 %v681_v20 }
 0x2b5   : > { %v1255_v24 = vpop.permute.xlu2 %1254 }
 0x2b6   : > { %v1257_v30 = vsub.f32 %v2927_v19, %v1255_v24 }
 0x2b8   : > { %v1258_v31 = vmul.f32 1.442695, %v1257_v30  ;;  %v3084_v33 = vpop.eup %2433 }
 0x2b9   : > { %v3091_v40 = vpop.eup %2435 }
 0x2ba   : > { %2437 = vpow2.f32 %v1258_v31 }
 0x2bb   : > { %2439 = vpow2.f32 %v798_v38 }
 0x2bd   : > { %v1025_v7 = vpop.permute.xlu0 %1024 }
 0x2be   : > { %v1027_v55 = vsub.f32 %v2917_v63, %v1025_v7 }
 0x2c0   : > { %v3093_v42 = vpop.eup %2437  ;;  %v1028_v60 = vmul.f32 1.442695, %v1027_v55 }
 0x2c1   : > { %v3101_v51 = vpop.eup %2439 }
 0x2c5   : > { %v1090_v11 = vpop.permute.xlu0 %1089 }
 0x2c6   : > { %v1091_v14 = vsel %vm1083_vm11, 1, %v1090_v11 }
 0x2c7   : > { %1092 = vrot.lane.b32.xlu0 %v1091_v14, %s2715_s29 }
 0x2cd   : > { %v1370_v34 = vpop.permute.xlu2 %1369 }
 0x2ce   : > { %v975_v16 = vpop.permute.xlu1 %974  ;;  %v1372_v37 = vsub.f32 %v2935_v25, %v1370_v34 }
 0x2cf   : > { %v976_v18 = vsel %vm968_vm12, 1, %v975_v16 }
 0x2d0   : > { %977 = vrot.lane.b32.xlu2 %v976_v18, %s2715_s29  ;;  %v1373_v39 = vmul.f32 1.442695, %v1372_v37 }
 0x2d2   : > { %2441 = vpow2.f32 %v1373_v39 }
 0x2d5   : > { %v1550_v46 = vpop.permute.xlu2 %1549  ;;  %v1140_v62 = vpop.permute.xlu0 %1139 }
 0x2d6   : > { %v1205_v27 = vpop.permute.xlu1 %1204  ;;  %v1551_v3 = vsel %vm1543_vm1, 1, %v1550_v46  ;;  %v1142_v5 = vsub.f32 %v2925_v17, %v1140_v62 }
 0x2d7   : > { %v1206_v28 = vsel %vm1198_vm13, 1, %v1205_v27 }
 0x2d8   : > { %1207 = vrot.lane.b32.xlu0 %v1206_v28, %s2715_s29  ;;  %v3103_v54 = vpop.eup %2441  ;;  %v1143_v45 = vmul.f32 1.442695, %v1142_v5 }
 0x2de   : > { %v1320_v32 = vpop.permute.xlu1 %1319 }
 0x2df   : > { %v1321_v35 = vsel %vm1313_vm14, 1, %v1320_v32 }
 0x2e0   : > { %1322 = vrot.lane.b32.xlu2 %v1321_v35, %s2715_s29  ;;  %916 = vrot.lane.b32.xlu0 %v3084_v33, %s2715_s29 }
 0x2e6   : > { %v1485_v41 = vpop.permute.xlu1 %1484 }
 0x2e7   : > { %v1487_v44 = vsub.f32 %v2933_v23, %v1485_v41 }
 0x2e8   : > { %684 = vrot.lane.b32.xlu2 %v3091_v40, %s2715_s29  ;;  %1261 = vrot.lane.b32.xlu0 %v3093_v42, %s2715_s29 }
 0x2e9   : > { %v1488_v47 = vmul.f32 1.442695, %v1487_v44 }
 0x2eb   : > { %2443 = vpow2.f32 %v1488_v47 }
 0x2ec   : > { %2445 = vpow2.f32 %v1028_v60 }
 0x2ed   : > { %2447 = vpow2.f32 %v1143_v45 }
 0x2ee   : > { %v1435_v49 = vpop.permute.xlu1 %1434 }
 0x2ef   : > { %v1436_v53 = vsel %vm1428_vm15, 1, %v1435_v49 }
 0x2f0   : > { %1437 = vrot.lane.b32.xlu1 %v1436_v53, %s2715_s29  ;;  %801 = vrot.lane.b32.xlu2 %v3101_v51, %s2715_s29 }
 0x2f1   : > { %1376 = vrot.lane.b32.xlu0 %v3103_v54, %s2715_s29  ;;  %v3115_v2 = vpop.eup %2443 }
 0x2f2   : > { %v746_v56 = vpop.permute.xlu2 %745  ;;  %v3121_v9 = vpop.eup %2445 }
 0x2f3   : > { %v747_v58 = vsel %vm732_vm0, 0, %v746_v56  ;;  %v3125_v0 = vpop.eup %2447 }
 0x2f4   : > { %v748_v4 = vmul.u32 16, %v747_v58 }
 0x2f6   : > { %v753_v7 = vadd.s32 16, %v748_v4 }
 0x2f8   : > { %1552 = vrot.lane.b32.xlu1 %v1551_v3, %s2715_s29  ;;  %1491 = vrot.lane.b32.xlu2 %v3115_v2, %s2715_s29 }
 0x2f9   : > { %750 = vperm.xlu0 %2418, %v748_v4  }
 0x300   : > { %1031 = vrot.lane.b32.xlu1 %v3121_v9, %s2715_s29 }
 0x308   : > { %1146 = vrot.lane.b32.xlu1 %v3125_v0, %s2715_s29  ;;  %s2183_s29 = sshll.u32 %s2179_s26, 4  ;;  %s2184_s29 = int_to_ptr.hbm [resolvable:$true] %s2183_s29 }
 0x310   : > { %755 = vperm.xlu1 %2416, %v753_v7  }
 0x312   : > { %v863_v59 = vpop.permute.xlu1 %862 }
 0x313   : > { %v864_v36 = vsel %vm849_vm6, 0, %v863_v59 }
 0x314   : > { %v865_v38 = vmul.u32 16, %v864_v36 }
 0x316   : > { %v870_v55 = vadd.s32 16, %v865_v38 }
 0x32a   : > { %v978_v11 = vpop.permute.xlu2 %977 }
 0x32b   : > { %v979_v12 = vsel %vm964_vm2, 0, %v978_v11 }
 0x32c   : > { %v980_v14 = vmul.u32 16, %v979_v12 }
 0x32e   : > { %982 = vperm.xlu2 %2417, %v980_v14   ;;  %v985_v27 = vadd.s32 16, %v980_v14 }
 0x339   : > { %v1093_v15 = vpop.permute.xlu0 %1092 }
 0x33a   : > { %v1094_v16 = vsel %vm1079_vm3, 0, %v1093_v15  ;;  %v1323_v18 = vpop.permute.xlu2 %1322 }
 0x33b   : > { %v1095_v21 = vmul.u32 16, %v1094_v16  ;;  %v3135_v22 = vsel %vm1309_vm4, 0, %v1323_v18 }
 0x33d   : > { %1097 = vperm.xlu0 %2418, %v1095_v21   ;;  %v1100_v20 = vadd.s32 16, %v1095_v21 }
 0x342   : > { %v685_v24 = vpop.permute.xlu2 %684 }
 0x343   : > { %v3138_v52 = vadd.f32 %v3091_v40, %v685_v24 }
 0x345   : > { %689 = vrot.lane.b32.xlu1 %v3138_v52, %s2717_s11  ;;  %987 = vperm.xlu0 %2418, %v985_v27   ;;  %2449 = vrcp.f32 %v3138_v52  ;;  %v704_v11 = vand.u32 2147483648, %v3138_v52  ;;  %vm698_vm10 = vweird.f32 %v3138_v52  ;;  %v702_v12 = vand.u32 2147483647, %v3138_v52 }
 0x347   : > { %v705_v27 = vor.u32 1.1754944e-38, %v704_v11  ;;  %vm703_vm12 = vcmp.eq.f32.partialorder %v702_v12, 8.507059e+37 }
 0x34a   : > { %v802_v50 = vpop.permute.xlu2 %801  ;;  %v1208_v28 = vpop.permute.xlu0 %1207 }
 0x34b   : > { %v3145_v57 = vadd.f32 %v3101_v51, %v802_v50  ;;  %v3147_v29 = vsel %vm1194_vm5, 0, %v1208_v28  ;;  %v2450_v44 = vpop.eup %2449 }
 0x34c   : > { %v694_v47 = vmul.f32 %v2450_v44, %v3138_v52  ;;  %vm699_vm9 = vweird.f32 %v2450_v44 }
 0x34d   : > { %806 = vrot.lane.b32.xlu1 %v3145_v57, %s2717_s11  ;;  %vm700_vm11 = vmor %vm698_vm10, %vm699_vm9  ;;  %v821_v12 = vand.u32 2147483648, %v3145_v57  ;;  %vm815_vm6 = vweird.f32 %v3145_v57 }
 0x34e   : > { %v695_v56 = vsub.f32 1.0, %v694_v47 }
 0x350   : > { %v696_v60 = vmul.f32 %v2450_v44, %v695_v56 }
 0x352   : > { %v917_v30 = vpop.permute.xlu0 %916  ;;  %v1492_v32 = vpop.permute.xlu2 %1491  ;;  %v697_v45 = vadd.f32 %v2450_v44, %v696_v60 }
 0x353   : > { %v3152_v31 = vadd.f32 %v3084_v33, %v917_v30  ;;  %v3157_v35 = vadd.f32 %v3115_v2, %v1492_v32 }
 0x354   : > { %v701_v16 = vsel %vm700_vm11, %v2450_v44, %v697_v45 }
 0x355   : > { %1102 = vperm.xlu1 %2416, %v1100_v20   ;;  %921 = vrot.lane.b32.xlu2 %v3152_v31, %s2717_s11  ;;  %2451 = vrcp.f32 %v3152_v31  ;;  %v3207_v28 = vsel %vm703_vm12, %v705_v27, %v701_v16  ;;  %vm930_vm14 = vweird.f32 %v3152_v31  ;;  %v936_v36 = vand.u32 2147483648, %v3152_v31 }
 0x356   : > { %2453 = vrcp.f32 %v3145_v57 }
 0x357   : > { %v937_v56 = vor.u32 1.1754944e-38, %v936_v36 }
 0x35a   : > { %v1262_v34 = vpop.permute.xlu0 %1261 }
 0x35b   : > { %v3177_v58 = vpop.eup %2451  ;;  %v3186_v3 = vadd.f32 %v3093_v42, %v1262_v34  ;;  %v934_v34 = vand.u32 2147483647, %v3152_v31 }
 0x35c   : > { %v926_v62 = vmul.f32 %v3177_v58, %v3152_v31  ;;  %v3191_v5 = vpop.eup %2453  ;;  %vm931_vm13 = vweird.f32 %v3177_v58 }
 0x35d   : > { %1496 = vrot.lane.b32.xlu1 %v3157_v35, %s2717_s11  ;;  %v811_v14 = vmul.f32 %v3191_v5, %v3145_v57  ;;  %vm3221_vm0 = vmor %vm930_vm14, %vm931_vm13  ;;  %vm816_vm3 = vweird.f32 %v3191_v5  ;;  %vm935_vm4 = vcmp.eq.f32.partialorder %v934_v34, 8.507059e+37  ;;  %vm1275_vm14 = vweird.f32 %v3186_v3 }
 0x35e   : > { %v927_v7 = vsub.f32 1.0, %v926_v62 }
 0x35f   : > { %v812_v30 = vsub.f32 1.0, %v811_v14 }
 0x360   : > { %v928_v18 = vmul.f32 %v3177_v58, %v927_v7 }
 0x362   : > { %v1438_v37 = vpop.permute.xlu1 %1437  ;;  %v929_v32 = vadd.f32 %v3177_v58, %v928_v18 }
 0x363   : > { %v1377_v39 = vpop.permute.xlu0 %1376  ;;  %v1439_v46 = vsel %vm1424_vm7, 0, %v1438_v37  ;;  %vm817_vm7 = vmor %vm815_vm6, %vm816_vm3  ;;  %vm1505_vm6 = vweird.f32 %v3157_v35 }
 0x364   : > { %v3165_v41 = vadd.f32 %v3103_v54, %v1377_v39  ;;  %v1440_v49 = vmul.u32 16, %v1439_v46  ;;  %v813_v46 = vmul.f32 %v3191_v5, %v812_v30  ;;  %v933_v47 = vsel %vm3221_vm0, %v3177_v58, %v929_v32 }
 0x365   : > { %867 = vperm.xlu1 %2416, %v865_v38   ;;  %v822_v32 = vor.u32 1.1754944e-38, %v821_v12 }
 0x366   : > { %1381 = vrot.lane.b32.xlu2 %v3165_v41, %s2717_s11  ;;  %v1445_v4 = vadd.s32 16, %v1440_v49  ;;  %v814_v45 = vadd.f32 %v3191_v5, %v813_v46  ;;  %v1281_v46 = vand.u32 2147483648, %v3186_v3 }
 0x368   : > { %v818_v27 = vsel %vm817_vm7, %v3191_v5, %v814_v45  ;;  %v1396_v45 = vand.u32 2147483648, %v3165_v41 }
 0x36a   : > { %v1553_v48 = vpop.permute.xlu1 %1552 }
 0x36b   : > { %v3175_v53 = vsel %vm1539_vm8, 0, %v1553_v48 }
 0x36d   : > { %1442 = vperm.xlu1 %2416, %v1440_v49  }
 0x36e   : > { %872 = vperm.xlu2 %2417, %v870_v55  }
 0x372   : > { %v1032_v1 = vpop.permute.xlu1 %1031 }
 0x373   : > { %v3183_v61 = vadd.f32 %v3121_v9, %v1032_v1 }
 0x375   : > { %2455 = vrcp.f32 %v3183_v61  ;;  %1036 = vrot.lane.b32.xlu0 %v3183_v61, %s2717_s11  ;;  %v1051_v37 = vand.u32 2147483648, %v3183_v61  ;;  %v1049_v39 = vand.u32 2147483647, %v3183_v61  ;;  %vm1045_vm1 = vweird.f32 %v3183_v61 }
 0x376   : > { %1447 = vperm.xlu2 %2417, %v1445_v4   ;;  %2457 = vrcp.f32 %v3186_v3  ;;  %v3236_v4 = vsel %vm935_vm4, %v937_v56, %v933_v47  ;;  %v1282_v56 = vor.u32 1.1754944e-38, %v1281_v46 }
 0x377   : > { %v1052_v1 = vor.u32 1.1754944e-38, %v1051_v37  ;;  %vm1050_vm5 = vcmp.eq.f32.partialorder %v1049_v39, 8.507059e+37 }
 0x37a   : > { %v1147_v15 = vpop.permute.xlu1 %1146 }
 0x37b   : > { %v2456_v21 = vpop.eup %2455  ;;  %v3201_v24 = vadd.f32 %v3125_v0, %v1147_v15  ;;  %v819_v15 = vand.u32 2147483647, %v3145_v57 }
 0x37c   : > { %v1041_v50 = vmul.f32 %v2456_v21, %v3183_v61  ;;  %v3209_v20 = vpop.eup %2457  ;;  %vm1046_vm15 = vweird.f32 %v2456_v21 }
 0x37d   : > { %2459 = vrcp.f32 %v3201_v24  ;;  %1151 = vrot.lane.b32.xlu0 %v3201_v24, %s2717_s11  ;;  %v1271_v48 = vmul.f32 %v3209_v20, %v3186_v3  ;;  %vm1047_vm2 = vmor %vm1045_vm1, %vm1046_vm15  ;;  %v1166_v16 = vand.u32 2147483648, %v3201_v24  ;;  %vm1160_vm9 = vweird.f32 %v3201_v24 }
 0x37e   : > { %708 = vrot.lane.b32.xlu2 %v3207_v28, %s2720_s9  ;;  %v1042_v59 = vsub.f32 1.0, %v1041_v50  ;;  %2461 = vrcp.f32 %v3165_v41  ;;  %vm820_vm10 = vcmp.eq.f32.partialorder %v819_v15, 8.507059e+37  ;;  %vm1276_vm13 = vweird.f32 %v3209_v20 }
 0x37f   : > { %v1272_v7 = vsub.f32 1.0, %v1271_v48  ;;  %2463 = vrcp.f32 %v3157_v35  ;;  %v1167_v34 = vor.u32 1.1754944e-38, %v1166_v16  ;;  %v3257_v36 = vsel %vm820_vm10, %v822_v32, %v818_v27  ;;  %vm1277_vm15 = vmor %vm1275_vm14, %vm1276_vm13 }
 0x380   : > { %v1043_v38 = vmul.f32 %v2456_v21, %v1042_v59  ;;  %v1279_v48 = vand.u32 2147483647, %v3186_v3 }
 0x381   : > { %v1273_v50 = vmul.f32 %v3209_v20, %v1272_v7  ;;  %v1394_v7 = vand.u32 2147483647, %v3165_v41 }
 0x382   : > { %v1044_v49 = vadd.f32 %v2456_v21, %v1043_v38  ;;  %vm1280_vm0 = vcmp.eq.f32.partialorder %v1279_v48, 8.507059e+37  ;;  %v1780_v48 = vld [vmem:[#allocation10 + $0x210] sm:$0xff] }
 0x383   : > { %v2460_v55 = vpop.eup %2459  ;;  %v1274_v5 = vadd.f32 %v3209_v20, %v1273_v50  ;;  %vm1395_vm4 = vcmp.eq.f32.partialorder %v1394_v7, 8.507059e+37 }
 0x384   : > { %v1048_v60 = vsel %vm1047_vm2, %v2456_v21, %v1044_v49  ;;  %v1156_v62 = vmul.f32 %v2460_v55, %v3201_v24  ;;  %v2462_v11 = vpop.eup %2461  ;;  %vm1161_vm8 = vweird.f32 %v2460_v55  ;;  %v1164_v21 = vand.u32 2147483647, %v3201_v24 }
 0x385   : > { %1266 = vrot.lane.b32.xlu0 %v3186_v3, %s2717_s11  ;;  %v3238_v58 = vsel %vm1050_vm5, %v1052_v1, %v1048_v60  ;;  %v1386_v30 = vmul.f32 %v2462_v11, %v3165_v41  ;;  %vm1162_vm11 = vmor %vm1160_vm9, %vm1161_vm8  ;;  %v2464_v44 = vpop.eup %2463  ;;  %v1278_v47 = vsel %vm1277_vm15, %v3209_v20, %v1274_v5  ;;  %vm1391_vm1 = vweird.f32 %v2462_v11  ;;  %s2645_s11 = sshra.s32 %s2184_s29, 4  ;;  %s2646_s11 = int_to_ptr.hbm [resolvable:$true] %s2645_s11 }
 0x386   : > { %940 = vrot.lane.b32.xlu2 %v3236_v4, %s2720_s9  ;;  %1055 = vrot.lane.b32.xlu1 %v3238_v58, %s2720_s9  ;;  %v1157_v14 = vsub.f32 1.0, %v1156_v62  ;;  %vm1165_vm12 = vcmp.eq.f32.partialorder %v1164_v21, 8.507059e+37  ;;  %v3272_v1 = vsel %vm1280_vm0, %v1282_v56, %v1278_v47  ;;  %vm1390_vm2 = vweird.f32 %v3165_v41  ;;  %s2647_s8 = scalar_lea.hbm %s2646_s11, 8  ;;  %p2652_p12 = scmp.lt.s32.totalorder %s2646_s11, %s3576_s6 }
 0x387   : > { %v1387_v39 = vsub.f32 1.0, %v1386_v30  ;;  %vm1392_vm3 = vmor %vm1390_vm2, %vm1391_vm1  ;;  %vm1506_vm5 = vweird.f32 %v2464_v44  ;;  %v1509_v21 = vand.u32 2147483647, %v3157_v35  ;;  %v3290_v30 = vpop.permute.xlu0 %750  ;;  %v2723_v47 = vmov 85   ;;  %p2648_p1 = scmp.ne.s32.totalorder %s2646_s11, %s2647_s8 }
 0x388   : > { %v1158_v18 = vmul.f32 %v2460_v55, %v1157_v14  ;;  %v1397_v14 = vor.u32 1.1754944e-38, %v1396_v45  ;;  %vm1507_vm7 = vmor %vm1505_vm6, %vm1506_vm5  ;;  %v983_v32 = vpop.permute.xlu2 %982  ;;  %2419 = vset.pattern.permute.xlu2 %v2723_v47  ;;  %2420 = vset.pattern.permute.xlu1 %v2723_v47 }
 0x389   : > { %v1388_v49 = vmul.f32 %v2462_v11, %v1387_v39  ;;  %vm1510_vm8 = vcmp.eq.f32.partialorder %v1509_v21, 8.507059e+37  ;;  %vm984_vm9 = vcmp.ge.s32.totalorder %v3021_v10, %v983_v32  ;;  %p2649_p3 = pnand %p2648_p1, %p2847_p4 }
 0x38a   : > { %v1159_v59 = vadd.f32 %v2460_v55, %v1158_v18  ;;  %v1511_v18 = vand.u32 2147483648, %v3157_v35 }
 0x38b   : > { %v1389_v60 = vadd.f32 %v2462_v11, %v1388_v49  ;;  %p2650_p5 = pneg %p2649_p3 }
 0x38c   : > { %v1163_v37 = vsel %vm1162_vm11, %v2460_v55, %v1159_v59  ;;  %v1501_v55 = vmul.f32 %v2464_v44, %v3157_v35  ;;  %v1512_v50 = vor.u32 1.1754944e-38, %v1511_v18  ;;  %v3292_v59 = vpop.permute.xlu1 %755 }
 0x38d   : > { %825 = vrot.lane.b32.xlu0 %v3257_v36, %s2720_s9  ;;  %v3261_v38 = vsel %vm1165_vm12, %v1167_v34, %v1163_v37  ;;  %v1393_v20 = vsel %vm1392_vm3, %v2462_v11, %v1389_v60 }
 0x38e   : > { %1170 = vrot.lane.b32.xlu2 %v3261_v38, %s2720_s9  ;;  %v1502_v62 = vsub.f32 1.0, %v1501_v55  ;;  %v3279_v15 = vsel %vm1395_vm4, %v1397_v14, %v1393_v20 }
 0x390   : > { %v1503_v12 = vmul.f32 %v2464_v44, %v1502_v62 }
 0x392   : > { %v1504_v16 = vadd.f32 %v2464_v44, %v1503_v12 }
 0x394   : > { %v1508_v27 = vsel %vm1507_vm7, %v2464_v44, %v1504_v16 }
 0x395   : > { %1285 = vrot.lane.b32.xlu0 %v3272_v1, %s2720_s9  ;;  %v3286_v11 = vsel %vm1510_vm8, %v1512_v50, %v1508_v27  ;;  %v1644_v50 = vld [vmem:[#allocation8 + $0x1d0] sm:$0xff] }
 0x39d   : > { %1400 = vrot.lane.b32.xlu0 %v3279_v15, %s2720_s9 }
 0x3a5   : > { %1515 = vrot.lane.b32.xlu0 %v3286_v11, %s2720_s9 }
 0x3af   : > { %v922_v34 = vpop.permute.xlu2 %921  ;;  %v1098_v37 = vpop.permute.xlu0 %1097 }
 0x3b0   : > { %v924_v5 = vadd.f32 %v922_v34, %v3152_v31  ;;  %vm1099_vm14 = vcmp.ge.s32.totalorder %v3021_v10, %v1098_v37 }
 0x3b2   : > { %2465 = vrcp.f32 %v924_v5  ;;  %vm950_vm4 = vweird.f32 %v924_v5  ;;  %v954_v37 = vand.u32 2147483647, %v924_v5 }
 0x3b4   : > { %vm955_vm6 = vcmp.eq.f32.partialorder %v954_v37, 8.507059e+37 }
 0x3b7   : > { %v690_v39 = vpop.permute.xlu1 %689  ;;  %v988_v46 = vpop.permute.xlu0 %987 }
 0x3b8   : > { %v692_v44 = vadd.f32 %v690_v39, %v3138_v52  ;;  %vm989_vm10 = vcmp.lt.s32.totalorder %v3021_v10, %v988_v46  ;;  %v2466_v31 = vpop.eup %2465 }
 0x3b9   : > { %vm3298_vm11 = vmand %vm984_vm9, %vm989_vm10  ;;  %v946_v55 = vmul.f32 %v2466_v31, %v924_v5  ;;  %vm951_vm3 = vweird.f32 %v2466_v31 }
 0x3ba   : > { %2467 = vrcp.f32 %v692_v44  ;;  %v724_v20 = vand.u32 2147483648, %v692_v44  ;;  %v722_v14 = vand.u32 2147483647, %v692_v44  ;;  %vm718_vm13 = vweird.f32 %v692_v44  ;;  %vm952_vm5 = vmor %vm950_vm4, %vm951_vm3 }
 0x3bb   : > { %v947_v7 = vsub.f32 1.0, %v946_v55 }
 0x3bc   : > { %vm723_vm2 = vcmp.eq.f32.partialorder %v722_v14, 8.507059e+37 }
 0x3bd   : > { %v948_v21 = vmul.f32 %v2466_v31, %v947_v7 }
 0x3bf   : > { %v807_v49 = vpop.permute.xlu1 %806  ;;  %v949_v39 = vadd.f32 %v2466_v31, %v948_v21 }
 0x3c0   : > { %v2468_v56 = vpop.eup %2467  ;;  %v3304_v60 = vpop.permute.xlu2 %1381  ;;  %v3307_v52 = vadd.f32 %v807_v49, %v3145_v57  ;;  %v725_v57 = vor.u32 1.1754944e-38, %v724_v20 }
 0x3c1   : > { %v714_v62 = vmul.f32 %v2468_v56, %v692_v44  ;;  %vm719_vm12 = vweird.f32 %v2468_v56  ;;  %v956_v44 = vand.u32 2147483648, %v924_v5  ;;  %v953_v55 = vsel %vm952_vm5, %v2466_v31, %v949_v39 }
 0x3c2   : > { %2469 = vrcp.f32 %v3307_v52  ;;  %vm720_vm0 = vmor %vm718_vm13, %vm719_vm12  ;;  %vm835_vm12 = vweird.f32 %v3307_v52 }
 0x3c3   : > { %v715_v45 = vsub.f32 1.0, %v714_v62  ;;  %v957_v7 = vor.u32 1.1754944e-38, %v956_v44 }
 0x3c5   : > { %v716_v12 = vmul.f32 %v2468_v56, %v715_v45 }
 0x3c7   : > { %v1103_v16 = vpop.permute.xlu1 %1102  ;;  %v717_v18 = vadd.f32 %v2468_v56, %v716_v12  ;;  %v1555_v12 = vmul.u32 16, %v3175_v53 }
 0x3c8   : > { %vm1104_vm15 = vcmp.lt.s32.totalorder %v3021_v10, %v1103_v16  ;;  %v873_v27 = vpop.permute.xlu2 %872  ;;  %v2470_v46 = vpop.eup %2469 }
 0x3c9   : > { %vm3312_vm1 = vmand %vm1099_vm14, %vm1104_vm15  ;;  %v721_v32 = vsel %vm720_vm0, %v2468_v56, %v717_v18  ;;  %v831_v62 = vmul.f32 %v2470_v46, %v3307_v52  ;;  %v958_v56 = vsel %vm955_vm6, %v957_v7, %v953_v55  ;;  %vm874_vm7 = vcmp.lt.s32.totalorder %v3021_v10, %v873_v27  ;;  %v1633_v18 = vld [vmem:[#allocation8 + $0x178] sm:$0xff]  ;;  %v1695_v55 = vld [vmem:[#allocation8 + $0x368] sm:$0xff] }
 0x3ca   : > { %v726_v34 = vsel %vm723_vm2, %v725_v57, %v721_v32  ;;  %v1560_v31 = vadd.s32 16, %v1555_v12  ;;  %vm836_vm10 = vweird.f32 %v2470_v46  ;;  %v841_v32 = vand.u32 2147483648, %v3307_v52 }
 0x3cb   : > { %728 = vrot.lane.b32.xlu0 %v726_v34, %s2724_s13  ;;  %v832_v20 = vsub.f32 1.0, %v831_v62  ;;  %v839_v27 = vand.u32 2147483647, %v3307_v52  ;;  %vm837_vm13 = vmor %vm835_vm12, %vm836_vm10 }
 0x3cc   : > { %v842_v37 = vor.u32 1.1754944e-38, %v841_v32 }
 0x3cd   : > { %v833_v16 = vmul.f32 %v2470_v46, %v832_v20  ;;  %vm840_vm2 = vcmp.eq.f32.partialorder %v839_v27, 8.507059e+37  ;;  %v3346_v20 = vadd.f32 %v3304_v60, %v3165_v41 }
 0x3cf   : > { %v1497_v49 = vpop.permute.xlu1 %1496  ;;  %v834_v57 = vadd.f32 %v2470_v46, %v833_v16 }
 0x3d0   : > { %v1448_v45 = vpop.permute.xlu2 %1447 }
 0x3d1   : > { %v838_v39 = vsel %vm837_vm13, %v2470_v46, %v834_v57  ;;  %vm1449_vm14 = vcmp.lt.s32.totalorder %v3021_v10, %v1448_v45 }
 0x3d2   : > { %v843_v7 = vsel %vm840_vm2, %v842_v37, %v838_v39 }
 0x3d3   : > { %960 = vrot.lane.b32.xlu0 %v958_v56, %s2724_s13 }
 0x3d7   : > { %v868_v14 = vpop.permute.xlu1 %867 }
 0x3d8   : > { %vm869_vm8 = vcmp.ge.s32.totalorder %v3021_v10, %v868_v14  ;;  %v709_v5 = vpop.permute.xlu2 %708 }
 0x3d9   : > { %vm3324_vm9 = vmand %vm869_vm8, %vm874_vm7  ;;  %v711_v21 = vmul.f32 %v3091_v40, %v709_v5 }
 0x3db   : > { %763 = vperm.xlu2 %2419, %v711_v21   ;;  %1562 = vperm.xlu0 %2418, %v1560_v31  }
 0x3df   : > { %v1443_v34 = vpop.permute.xlu1 %1442 }
 0x3e0   : > { %vm1444_vm15 = vcmp.ge.s32.totalorder %v3021_v10, %v1443_v34  ;;  %v941_v44 = vpop.permute.xlu2 %940 }
 0x3e1   : > { %vm3334_vm0 = vmand %vm1444_vm15, %vm1449_vm14  ;;  %v943_v62 = vmul.f32 %v3084_v33, %v941_v44 }
 0x3e3   : > { %845 = vrot.lane.b32.xlu2 %v843_v7, %s2724_s13  ;;  %993 = vperm.xlu1 %2420, %v943_v62  }
 0x3e4   : > { %2424 = vset.pattern.permute.xlu0 %v2723_v47 }
 0x3e7   : > { %v1037_v52 = vpop.permute.xlu0 %1036 }
 0x3e8   : > { %v1039_v46 = vadd.f32 %v1037_v52, %v3183_v61  ;;  %v3351_v61 = vadd.f32 %v1497_v49, %v3157_v35 }
 0x3ea   : > { %2471 = vrcp.f32 %v1039_v46  ;;  %vm1065_vm8 = vweird.f32 %v1039_v46 }
 0x3eb   : > { %2421 = vset.pattern.permute.xlu1 %v2718_v43 }
 0x3ef   : > { %v1152_v45 = vpop.permute.xlu0 %1151 }
 0x3f0   : > { %v1154_v56 = vadd.f32 %v1152_v45, %v3201_v24  ;;  %v2472_v14 = vpop.eup %2471 }
 0x3f1   : > { %v1061_v16 = vmul.f32 %v2472_v14, %v1039_v46  ;;  %vm1066_vm7 = vweird.f32 %v2472_v14 }
 0x3f2   : > { %2473 = vrcp.f32 %v1154_v56  ;;  %v1186_v41 = vand.u32 2147483648, %v1154_v56  ;;  %v1184_v34 = vand.u32 2147483647, %v1154_v56  ;;  %vm1180_vm4 = vweird.f32 %v1154_v56  ;;  %vm1067_vm10 = vmor %vm1065_vm8, %vm1066_vm7 }
 0x3f3   : > { %2475 = vrcp.f32 %v3346_v20  ;;  %v1062_v32 = vsub.f32 1.0, %v1061_v16  ;;  %vm1525_vm8 = vweird.f32 %v3351_v61 }
 0x3f4   : > { %v1187_v62 = vor.u32 1.1754944e-38, %v1186_v41  ;;  %vm1185_vm6 = vcmp.eq.f32.partialorder %v1184_v34, 8.507059e+37 }
 0x3f5   : > { %v1063_v39 = vmul.f32 %v2472_v14, %v1062_v32 }
 0x3f7   : > { %v1267_v5 = vpop.permute.xlu0 %1266  ;;  %v1064_v16 = vadd.f32 %v2472_v14, %v1063_v39 }
 0x3f8   : > { %v2474_v31 = vpop.eup %2473  ;;  %v1269_v21 = vadd.f32 %v1267_v5, %v3186_v3 }
 0x3f9   : > { %v1176_v57 = vmul.f32 %v2474_v31, %v1154_v56  ;;  %v3353_v27 = vpop.eup %2475  ;;  %vm1181_vm3 = vweird.f32 %v2474_v31 }
 0x3fa   : > { %2477 = vrcp.f32 %v1269_v21  ;;  %v1406_v35 = vmul.f32 %v3353_v27, %v3346_v20  ;;  %vm1182_vm5 = vmor %vm1180_vm4, %vm1181_vm3  ;;  %v1299_v41 = vand.u32 2147483647, %v1269_v21  ;;  %vm1295_vm13 = vweird.f32 %v1269_v21 }
 0x3fb   : > { %v1177_v24 = vsub.f32 1.0, %v1176_v57  ;;  %2479 = vrcp.f32 %v3351_v61  ;;  %v1071_v57 = vand.u32 2147483648, %v1039_v46  ;;  %vm1411_vm3 = vweird.f32 %v3353_v27 }
 0x3fc   : > { %v1407_v32 = vsub.f32 1.0, %v1406_v35  ;;  %vm1300_vm2 = vcmp.eq.f32.partialorder %v1299_v41, 8.507059e+37  ;;  %vm1410_vm4 = vweird.f32 %v3346_v20 }
 0x3fd   : > { %v1178_v60 = vmul.f32 %v2474_v31, %v1177_v24  ;;  %v1069_v24 = vand.u32 2147483647, %v1039_v46  ;;  %v1072_v39 = vor.u32 1.1754944e-38, %v1071_v57  ;;  %v1414_v57 = vand.u32 2147483647, %v3346_v20 }
 0x3ff   : > { %v826_v44 = vpop.permute.xlu0 %825  ;;  %v1179_v37 = vadd.f32 %v2474_v31, %v1178_v60  ;;  %v1301_v60 = vand.u32 2147483648, %v1269_v21  ;;  %vm1070_vm14 = vcmp.eq.f32.partialorder %v1069_v24, 8.507059e+37 }
 0x400   : > { %v2478_v3 = vpop.eup %2477  ;;  %v828_v49 = vmul.f32 %v3101_v51, %v826_v44 }
 0x401   : > { %v1183_v7 = vsel %vm1182_vm5, %v2474_v31, %v1179_v37  ;;  %v1291_v52 = vmul.f32 %v2478_v3, %v1269_v21  ;;  %v2480_v5 = vpop.eup %2479  ;;  %vm1296_vm12 = vweird.f32 %v2478_v3  ;;  %v1068_v31 = vsel %vm1067_vm10, %v2472_v14, %v1064_v16  ;;  %v1056_v16 = vpop.permute.xlu1 %1055  ;;  %vm1412_vm5 = vmor %vm1410_vm4, %vm1411_vm3 }
 0x402   : > { %878 = vperm.xlu2 %2419, %v828_v49   ;;  %v1188_v45 = vsel %vm1185_vm6, %v1187_v62, %v1183_v7  ;;  %v1521_v34 = vmul.f32 %v2480_v5, %v3351_v61  ;;  %v1408_v62 = vmul.f32 %v3353_v27, %v1407_v32  ;;  %vm1297_vm15 = vmor %vm1295_vm13, %vm1296_vm12  ;;  %v1302_v35 = vor.u32 1.1754944e-38, %v1301_v60 }
 0x403   : > { %1190 = vrot.lane.b32.xlu1 %v1188_v45, %s2724_s13  ;;  %v1292_v56 = vsub.f32 1.0, %v1291_v52  ;;  %v1073_v7 = vsel %vm1070_vm14, %v1072_v39, %v1068_v31  ;;  %v1416_v21 = vand.u32 2147483648, %v3346_v20  ;;  %v1058_v24 = vmul.f32 %v3121_v9, %v1056_v16 }
 0x404   : > { %v1522_v45 = vsub.f32 1.0, %v1521_v34  ;;  %v1409_v14 = vadd.f32 %v3353_v27, %v1408_v62  ;;  %vm1415_vm6 = vcmp.eq.f32.partialorder %v1414_v57, 8.507059e+37  ;;  %vm1526_vm7 = vweird.f32 %v2480_v5 }
 0x405   : > { %v1293_v44 = vmul.f32 %v2478_v3, %v1292_v56  ;;  %v1531_v20 = vand.u32 2147483648, %v3351_v61  ;;  %v1529_v34 = vand.u32 2147483647, %v3351_v61  ;;  %vm1527_vm10 = vmor %vm1525_vm8, %vm1526_vm7  ;;  %v944_v16 = vmul.f32 %v3084_v33, %v3236_v4  ;;  %v1761_v4 = vld [vmem:[#allocation10 + $0x178] sm:$0xff] }
 0x406   : > { %v1413_v32 = vsel %vm1412_vm5, %v3353_v27, %v1409_v14  ;;  %v1325_v27 = vmul.u32 16, %v3135_v22  ;;  %1882 = vmatpush.msra.mxu2 %v1761_v4  ;;  %v1404_v4 = vmul.f32 %v3103_v54, %v3279_v15  ;;  %v1777_v15 = vld [vmem:[#allocation10 + $0x1f8] sm:$0xff]  ;;  %vm651_vm3 = vcmp.lt.s32.totalorder %v3021_v10, 80 }
 0x407   : > { %v3361_v37 = vpop.permute.xlu0 %1285  ;;  %v1294_v49 = vadd.f32 %v2478_v3, %v1293_v44  ;;  %v1417_v44 = vor.u32 1.1754944e-38, %v1416_v21  ;;  %vm1530_vm12 = vcmp.eq.f32.partialorder %v1529_v34, 8.507059e+37  ;;  %1902 = vmatpush.msra.mxu3 %v1777_v15  ;;  %v1824_v15 = vld [vmem:[#allocation10 + $0x370] sm:$0xff]  ;;  %vm752_vm5 = vcmp.ge.s32.totalorder %v3021_v10, %v3290_v30 }
 0x408   : > { %v1330_v62 = vadd.s32 16, %v1325_v27  ;;  %v1600_v30 = vld [vmem:[#allocation8 + $0x70] sm:$0xff] }
 0x409   : > { %v1298_v46 = vsel %vm1297_vm15, %v2478_v3, %v1294_v49  ;;  %v1523_v3 = vmul.f32 %v2480_v5, %v1522_v45  ;;  %v1418_v41 = vsel %vm1415_vm6, %v1417_v44, %v1413_v32  ;;  %v1532_v49 = vor.u32 1.1754944e-38, %v1531_v20  ;;  %v1759_v32 = vld [vmem:[#allocation10 + $0x168] sm:$0xff]  ;;  %v1756_v44 = vld [vmem:[#allocation10 + $0x150] sm:$0xff]  ;;  %v1726_v20 = vld [vmem:[#allocation10 + $0x60] sm:$0xff] }
 0x40a   : > { %1075 = vrot.lane.b32.xlu2 %v1073_v7, %s2724_s13  ;;  %v1303_v52 = vsel %vm1300_vm2, %v1302_v35, %v1298_v46  ;;  %v1210_v35 = vmul.u32 16, %v3147_v29  ;;  %v1171_v46 = vpop.permute.xlu2 %1170  ;;  %v712_v45 = vmul.f32 %v3091_v40, %v3207_v28  ;;  %vm650_vm2 = vcmp.ge.s32.totalorder %v3021_v10, 64 }
 0x40b   : > { %1305 = vrot.lane.b32.xlu1 %v1303_v52, %s2724_s13  ;;  %v1524_v31 = vadd.f32 %v2480_v5, %v1523_v3  ;;  %v1173_v22 = vmul.f32 %v3125_v0, %v1171_v46  ;;  %v1752_v46 = vld [vmem:[#allocation10 + $0x130] sm:$0xff]  ;;  %vm3441_vm4 = vmand %vm650_vm2, %vm651_vm3 }
 0x40c   : > { %v1215_v61 = vadd.s32 16, %v1210_v35 }
 0x40d   : > { %v1528_v39 = vsel %vm1527_vm10, %v2480_v5, %v1524_v31  ;;  %v1754_v31 = vld [vmem:[#allocation10 + $0x140] sm:$0xff] }
 0x40e   : > { %v1533_v7 = vsel %vm1530_vm12, %v1532_v49, %v1528_v39  ;;  %v1753_v39 = vld [vmem:[#allocation10 + $0x138] sm:$0xff] }
 0x40f   : > { %v1401_v56 = vpop.permute.xlu0 %1400 }
 0x410   : > { %v1403_v60 = vmul.f32 %v3103_v54, %v1401_v56  ;;  %v1737_v54 = vld [vmem:[#allocation10 + $0xb8] sm:$0xff] }
 0x412   : > { %1108 = vperm.xlu2 %2419, %v1058_v24   ;;  %1453 = vperm.xlu0 %2424, %v1403_v60   ;;  %v1729_v60 = vld [vmem:[#allocation10 + $0x78] sm:$0xff] }
 0x413   : > { %1420 = vrot.lane.b32.xlu1 %v1418_v41, %s2724_s13  ;;  %1842 = vmatpush.msra.mxu0 %v1729_v60  ;;  %v1727_v41 = vld [vmem:[#allocation10 + $0x68] sm:$0xff]  ;;  %v1718_v60 = vld [vmem:[#allocation10 + $0x20] sm:$0xff] }
 0x417   : > { %v1516_v29 = vpop.permute.xlu0 %1515 }
 0x418   : > { %v1518_v5 = vmul.f32 %v3115_v2, %v1516_v29  ;;  %v1751_v29 = vld [vmem:[#allocation10 + $0x128] sm:$0xff] }
 0x41a   : > { %1535 = vrot.lane.b32.xlu2 %v1533_v7, %s2724_s13  ;;  %2428 = vset.pattern.permute.xlu0 %v2718_v43  ;;  %v1745_v7 = vld [vmem:[#allocation10 + $0xf8] sm:$0xff]  ;;  %s2651_s13 = scalar_lea.hbm %s3576_s6, 16 }
 0x41b   : > { %1212 = vperm.xlu1 %2421, %v1210_v35   ;;  %1332 = vperm.xlu0 %2428, %v1330_v62   ;;  %v1725_v35 = vld [vmem:[#allocation10 + $0x58] sm:$0xff]  ;;  %p2653_p7 = scmp.lt.s32.totalorder %s2651_s13, %s2647_s8 }
 0x41c   : > { %2422 = vset.pattern.permute.xlu2 %v2718_v43  ;;  %1862 = vmatpush.msra.mxu1 %v1745_v7  ;;  %v1714_v7 = vld [vmem:[#allocation10] sm:$0xff] }
 0x41d   : > { %p2654_p8 = por %p2653_p7, %p2652_p12 }
 0x41f   : > { %p2655_p9 = pnand %p2654_p8, %p2650_p5 }
 0x422   : > { %1217 = vperm.xlu2 %2422, %v1215_v61   ;;  %v1724_v61 = vld [vmem:[#allocation10 + $0x50] sm:$0xff] }
 0x423   : > { %2423 = vset.pattern.permute.xlu1 %v2723_v47  ;;  %2429 = vset.pattern.permute.xlu0 %v2716_v26 }
 0x424   : > { %1223 = vperm.xlu1 %2423, %v1173_v22   ;;  %v1744_v22 = vld [vmem:[#allocation10 + $0xf0] sm:$0xff] }
 0x425   : > { %1863 = vmatpush.msra.mxu1 %v1744_v22 }
 0x42a   : > { %1557 = vperm.xlu2 %2422, %v1555_v12   ;;  %v829_v12 = vmul.f32 %v3101_v51, %v3257_v36  ;;  %v1059_v51 = vmul.f32 %v3121_v9, %v3238_v58  ;;  %v1760_v36 = vld [vmem:[#allocation10 + $0x170] sm:$0xff]  ;;  %v1755_v58 = vld [vmem:[#allocation10 + $0x148] sm:$0xff] }
 0x42b   : > { %1883 = vmatpush.msra.mxu2 %v1760_v36  ;;  %v1728_v9 = vld [vmem:[#allocation10 + $0x70] sm:$0xff]  ;;  %v1719_v36 = vld [vmem:[#allocation10 + $0x28] sm:$0xff] }
 0x42c   : > { %2430 = vset.pattern.permute.xlu1 %v2716_v26  ;;  %1843 = vmatpush.msra.mxu0 %v1728_v9  ;;  %v1717_v9 = vld [vmem:[#allocation10 + $0x18] sm:$0xff] }
 0x42d   : > { %1884 = vmatpush.msra.mxu2 %v1759_v32  ;;  %v1739_v32 = vld [vmem:[#allocation10 + $0xc8] sm:$0xff] }
 0x42e   : > { %1844 = vmatpush.msra.mxu0 %v1727_v41 }
 0x430   : > { %1845 = vmatpush.msra.mxu0 %v1726_v20  ;;  %v1716_v20 = vld [vmem:[#allocation10 + $0x10] sm:$0xff] }
 0x432   : > { %2425 = vset.pattern.permute.xlu2 %v2723_v47  ;;  %1846 = vmatpush.msra.mxu0 %v1725_v35  ;;  %v1519_v35 = vmul.f32 %v3115_v2, %v3286_v11  ;;  %v1791_v2 = vld [vmem:[#allocation10 + $0x268] sm:$0xff] }
 0x433   : > { %1568 = vperm.xlu2 %2425, %v1518_v5   ;;  %v1723_v5 = vld [vmem:[#allocation10 + $0x48] sm:$0xff] }
 0x434   : > { %1847 = vmatpush.msra.mxu0 %v1724_v61  ;;  %v1774_v61 = vld [vmem:[#allocation10 + $0x1e0] sm:$0xff]  ;;  %v1731_v11 = vld [vmem:[#allocation10 + $0x88] sm:$0xff] }
 0x435   : > { %v3391_v52 = vpop.permute.xlu2 %763 }
 0x436   : > { %1848 = vmatpush.msra.mxu0 %v1723_v5  ;;  %v1733_v5 = vld [vmem:[#allocation10 + $0x98] sm:$0xff] }
 0x43b   : > { %2426 = vset.pattern.permute.xlu2 %v2716_v26  ;;  %v1288_v26 = vmul.f32 %v3093_v42, %v3361_v37  ;;  %v1757_v37 = vld [vmem:[#allocation10 + $0x158] sm:$0xff] }
 0x43d   : > { %v729_v14 = vpop.permute.xlu0 %728  ;;  %v846_v53 = vpop.permute.xlu2 %845 }
 0x43e   : > { %v731_v21 = vmul.f32 %v729_v14, %v712_v45  ;;  %v848_v3 = vmul.f32 %v846_v53, %v829_v12  ;;  %v1722_v45 = vld [vmem:[#allocation10 + $0x40] sm:$0xff]  ;;  %v1749_v12 = vld [vmem:[#allocation10 + $0x118] sm:$0xff] }
 0x43f   : > { %v1742_v53 = vld [vmem:[#allocation10 + $0xe0] sm:$0xff]  ;;  %1849 = vmatpush.msra.mxu0 %v1722_v45  ;;  %v1732_v45 = vld [vmem:[#allocation10 + $0x90] sm:$0xff] }
 0x440   : > { %769 = vperm.xlu0 %2429, %v731_v21   ;;  %v1289_v21 = vmul.f32 %v3093_v42, %v3272_v1 }
 0x445   : > { %v961_v57 = vpop.permute.xlu0 %960 }
 0x446   : > { %v963_v56 = vmul.f32 %v961_v57, %v944_v16  ;;  %v1721_v57 = vld [vmem:[#allocation10 + $0x38] sm:$0xff] }
 0x447   : > { %1850 = vmatpush.msra.mxu0 %v1721_v57  ;;  %v1789_v57 = vld [vmem:[#allocation10 + $0x258] sm:$0xff] }
 0x448   : > { %884 = vperm.xlu0 %2429, %v848_v3   ;;  %999 = vperm.xlu2 %2426, %v963_v56   ;;  %v1741_v56 = vld [vmem:[#allocation10 + $0xd8] sm:$0xff] }
 0x44d   : > { %v1563_v42 = vpop.permute.xlu0 %1562 }
 0x44e   : > { %vm1564_vm13 = vcmp.lt.s32.totalorder %v3021_v10, %v1563_v42  ;;  %v1807_v42 = vld [vmem:[#allocation10 + $0x2e8] sm:$0xff] }
 0x450   : > { %2427 = vset.pattern.permute.xlu2 %v2718_v43  ;;  %v1758_v43 = vld [vmem:[#allocation10 + $0x160] sm:$0xff] }
 0x451   : > { %1327 = vperm.xlu2 %2427, %v1325_v27   ;;  %1885 = vmatpush.msra.mxu2 %v1758_v43  ;;  %v1174_v27 = vmul.f32 %v3125_v0, %v3261_v38  ;;  %v1743_v0 = vld [vmem:[#allocation10 + $0xe8] sm:$0xff]  ;;  %v1750_v38 = vld [vmem:[#allocation10 + $0x120] sm:$0xff] }
 0x452   : > { %1864 = vmatpush.msra.mxu1 %v1743_v0  ;;  %v1746_v43 = vld [vmem:[#allocation10 + $0x100] sm:$0xff]  ;;  %v1773_v0 = vld [vmem:[#allocation10 + $0x1d8] sm:$0xff] }
 0x453   : > { %1886 = vmatpush.msra.mxu2 %v1757_v37 }
 0x454   : > { %1865 = vmatpush.msra.mxu1 %v1742_v53  ;;  %v1790_v53 = vld [vmem:[#allocation10 + $0x260] sm:$0xff] }
 0x455   : > { %1887 = vmatpush.msra.mxu2 %v1756_v44  ;;  %v1738_v44 = vld [vmem:[#allocation10 + $0xc0] sm:$0xff] }
 0x456   : > { %1866 = vmatpush.msra.mxu1 %v1741_v56  ;;  %v1769_v56 = vld [vmem:[#allocation10 + $0x1b8] sm:$0xff] }
 0x457   : > { %1888 = vmatpush.msra.mxu2 %v1755_v58  ;;  %v1671_v58 = vld [vmem:[#allocation8 + $0x2a8] sm:$0xff] }
 0x459   : > { %2431 = vset.pattern.permute.xlu2 %v2723_v47  ;;  %v3410_v47 = vpop.permute.xlu1 %993  ;;  %1889 = vmatpush.msra.mxu2 %v1754_v31  ;;  %v1776_v31 = vld [vmem:[#allocation10 + $0x1f0] sm:$0xff] }
 0x45a   : > { %1338 = vperm.xlu2 %2431, %v1288_v26   ;;  %v1748_v26 = vld [vmem:[#allocation10 + $0x110] sm:$0xff]  ;;  %1903 = vmatpush.msra.mxu3 %v1776_v31 }
 0x45b   : > { %1890 = vmatpush.msra.mxu2 %v1753_v39  ;;  %v1775_v39 = vld [vmem:[#allocation10 + $0x1e8] sm:$0xff] }
 0x45c   : > { %v3404_v40 = vpop.permute.xlu2 %878  ;;  %1904 = vmatpush.msra.mxu3 %v1775_v39  ;;  %v1692_v39 = vld [vmem:[#allocation8 + $0x350] sm:$0xff] }
 0x45d   : > { %1891 = vmatpush.msra.mxu2 %v1752_v46  ;;  %v1734_v46 = vld [vmem:[#allocation10 + $0xa0] sm:$0xff] }
 0x45e   : > { %1905 = vmatpush.msra.mxu3 %v1774_v61 }
 0x45f   : > { %1892 = vmatpush.msra.mxu2 %v1751_v29  ;;  %v1793_v29 = vld [vmem:[#allocation10 + $0x278] sm:$0xff] }
 0x460   : > { %1906 = vmatpush.msra.mxu3 %v1773_v0  ;;  %v1762_v0 = vld [vmem:[#allocation10 + $0x180] sm:$0xff] }
 0x461   : > { %1893 = vmatpush.msra.mxu2 %v1750_v38  ;;  %v1792_v38 = vld [vmem:[#allocation10 + $0x270] sm:$0xff] }
 0x463   : > { %1894 = vmatpush.msra.mxu2 %v1749_v12  ;;  %v1730_v12 = vld [vmem:[#allocation10 + $0x80] sm:$0xff] }
 0x464   : > { %v1076_v33 = vpop.permute.xlu2 %1075 }
 0x465   : > { %v1078_v28 = vmul.f32 %v1076_v33, %v1059_v51  ;;  %v1720_v51 = vld [vmem:[#allocation10 + $0x30] sm:$0xff]  ;;  %1895 = vmatpush.msra.mxu2 %v1748_v26 }
 0x466   : > { %v1740_v33 = vld [vmem:[#allocation10 + $0xd0] sm:$0xff]  ;;  %1851 = vmatpush.msra.mxu0 %v1720_v51 }
 0x467   : > { %1114 = vperm.xlu1 %2430, %v1078_v28   ;;  %v1747_v28 = vld [vmem:[#allocation10 + $0x108] sm:$0xff]  ;;  %1867 = vmatpush.msra.mxu1 %v1740_v33  ;;  %v1788_v26 = vld [vmem:[#allocation10 + $0x250] sm:$0xff] }
 0x468   : > { %1896 = vmatpush.msra.mxu2 %v1747_v28  ;;  %1852 = vmatpush.msra.mxu0 %v1719_v36  ;;  %v1808_v51 = vld [vmem:[#allocation10 + $0x2f0] sm:$0xff]  ;;  %v1787_v28 = vld [vmem:[#allocation10 + $0x248] sm:$0xff]  ;;  %v1786_v36 = vld [vmem:[#allocation10 + $0x240] sm:$0xff] }
 0x469   : > { %1868 = vmatpush.msra.mxu1 %v1739_v32  ;;  %v1768_v33 = vld [vmem:[#allocation10 + $0x1b0] sm:$0xff]  ;;  %v1806_v32 = vld [vmem:[#allocation10 + $0x2e0] sm:$0xff] }
 0x46a   : > { %1897 = vmatpush.msra.mxu2 %v1746_v43  ;;  %1853 = vmatpush.msra.mxu0 %v1718_v60  ;;  %v1766_v43 = vld [vmem:[#allocation10 + $0x1a0] sm:$0xff]  ;;  %v1805_v60 = vld [vmem:[#allocation10 + $0x2d8] sm:$0xff] }
 0x46b   : > { %1869 = vmatpush.msra.mxu1 %v1738_v44  ;;  %v1825_v44 = vld [vmem:[#allocation10 + $0x378] sm:$0xff] }
 0x46c   : > { %v3408_v24 = vpop.permute.xlu2 %1108  ;;  %1854 = vmatpush.msra.mxu0 %v1717_v9  ;;  %v1765_v9 = vld [vmem:[#allocation10 + $0x198] sm:$0xff]  ;;  %1962 = vmatpush.msrb.mxu2 %v1825_v44 }
 0x46d   : > { %1870 = vmatpush.msra.mxu1 %v1737_v54  ;;  %v1804_v54 = vld [vmem:[#allocation10 + $0x2d0] sm:$0xff] }
 0x46e   : > { %1855 = vmatpush.msra.mxu0 %v1716_v20  ;;  %v1764_v20 = vld [vmem:[#allocation10 + $0x190] sm:$0xff]  ;;  %1963 = vmatpush.msrb.mxu2 %v1824_v15  ;;  %v1814_v15 = vld [vmem:[#allocation10 + $0x320] sm:$0xff] }
 0x474   : > { %v3412_v34 = vpop.permute.xlu2 %1535 }
 0x475   : > { %v1191_v49 = vpop.permute.xlu1 %1190  ;;  %v1538_v22 = vmul.f32 %v3412_v34, %v1519_v35  ;;  %v1771_v34 = vld [vmem:[#allocation10 + $0x1c8] sm:$0xff] }
 0x476   : > { %v1193_v62 = vmul.f32 %v1191_v49, %v1174_v27  ;;  %v1736_v27 = vld [vmem:[#allocation10 + $0xb0] sm:$0xff]  ;;  %v1715_v49 = vld [vmem:[#allocation10 + $0x8] sm:$0xff] }
 0x477   : > { %1871 = vmatpush.msra.mxu1 %v1736_v27  ;;  %1856 = vmatpush.msra.mxu0 %v1715_v49  ;;  %v1823_v27 = vld [vmem:[#allocation10 + $0x368] sm:$0xff] }
 0x478   : > { %1229 = vperm.xlu1 %2430, %v1193_v62   ;;  %v1735_v62 = vld [vmem:[#allocation10 + $0xa8] sm:$0xff]  ;;  %1964 = vmatpush.msrb.mxu2 %v1823_v27  ;;  %v1834_v27 = vld [vmem:[#allocation10 + $0x3c0] sm:$0xff] }
 0x479   : > { %1872 = vmatpush.msra.mxu1 %v1735_v62  ;;  %1857 = vmatpush.msra.mxu0 %v1714_v7  ;;  %v1783_v49 = vld [vmem:[#allocation10 + $0x228] sm:$0xff]  ;;  %v996_v62 = vsel %vm3441_vm4, %v3410_v47, 0.0  ;;  %v1781_v47 = vld [vmem:[#allocation10 + $0x218] sm:$0xff] }
 0x47a   : > { %v1803_v7 = vld [vmem:[#allocation10 + $0x2c8] sm:$0xff] }
 0x47b   : > { %1873 = vmatpush.msra.mxu1 %v1734_v46  ;;  %1922 = vmatpush.msrb.mxu0 %v1793_v29  ;;  %v1763_v46 = vld [vmem:[#allocation10 + $0x188] sm:$0xff]  ;;  %v1822_v29 = vld [vmem:[#allocation10 + $0x360] sm:$0xff] }
 0x47c   : > { %v3416_v14 = vpop.permute.xlu2 %1217  ;;  %1965 = vmatpush.msrb.mxu2 %v1822_v29 }
 0x47d   : > { %v1306_v16 = vpop.permute.xlu1 %1305  ;;  %1874 = vmatpush.msra.mxu1 %v1733_v5  ;;  %1923 = vmatpush.msrb.mxu0 %v1792_v38  ;;  %v1802_v5 = vld [vmem:[#allocation10 + $0x2c0] sm:$0xff]  ;;  %v1821_v38 = vld [vmem:[#allocation10 + $0x358] sm:$0xff] }
 0x47e   : > { %v1308_v3 = vmul.f32 %v1306_v16, %v1289_v21  ;;  %v1772_v21 = vld [vmem:[#allocation10 + $0x1d0] sm:$0xff]  ;;  %v1770_v16 = vld [vmem:[#allocation10 + $0x1c0] sm:$0xff]  ;;  %1966 = vmatpush.msrb.mxu2 %v1821_v38  ;;  %v1811_v38 = vld [vmem:[#allocation10 + $0x308] sm:$0xff] }
 0x47f   : > { %1875 = vmatpush.msra.mxu1 %v1732_v45  ;;  %1907 = vmatpush.msra.mxu3 %v1772_v21  ;;  %v1801_v45 = vld [vmem:[#allocation10 + $0x2b8] sm:$0xff] }
 0x480   : > { %1344 = vperm.xlu0 %2429, %v1308_v3   ;;  %1924 = vmatpush.msrb.mxu0 %v1791_v2  ;;  %v1809_v3 = vld [vmem:[#allocation10 + $0x2f8] sm:$0xff]  ;;  %v1820_v2 = vld [vmem:[#allocation10 + $0x350] sm:$0xff] }
 0x481   : > { %1876 = vmatpush.msra.mxu1 %v1731_v11  ;;  %1908 = vmatpush.msra.mxu3 %v1771_v34  ;;  %v1841_v21 = vld [vmem:[#allocation10 + $0x3f8] sm:$0xff]  ;;  %v1800_v11 = vld [vmem:[#allocation10 + $0x2b0] sm:$0xff] }
 0x482   : > { %1925 = vmatpush.msrb.mxu0 %v1790_v53  ;;  %v1840_v34 = vld [vmem:[#allocation10 + $0x3f0] sm:$0xff]  ;;  %v1779_v53 = vld [vmem:[#allocation10 + $0x208] sm:$0xff]  ;;  %1967 = vmatpush.msrb.mxu2 %v1820_v2  ;;  %v1830_v2 = vld [vmem:[#allocation10 + $0x3a0] sm:$0xff] }
 0x483   : > { %1877 = vmatpush.msra.mxu1 %v1730_v12  ;;  %1909 = vmatpush.msra.mxu3 %v1770_v16  ;;  %v1819_v12 = vld [vmem:[#allocation10 + $0x348] sm:$0xff] }
 0x484   : > { %v1558_v1 = vpop.permute.xlu2 %1557  ;;  %1926 = vmatpush.msrb.mxu0 %v1789_v57  ;;  %v3435_v31 = vpop.permute.xlu0 %1453  ;;  %v1799_v57 = vld [vmem:[#allocation10 + $0x2a8] sm:$0xff]  ;;  %1968 = vmatpush.msrb.mxu2 %v1819_v12  ;;  %v1594_v12 = vld [vmem:[#allocation8 + $0x40] sm:$0xff] }
 0x485   : > { %vm1559_vm14 = vcmp.ge.s32.totalorder %v3021_v10, %v1558_v1  ;;  %v1421_v37 = vpop.permute.xlu1 %1420  ;;  %1942 = vmatpush.msrb.mxu1 %v1809_v3  ;;  %1910 = vmatpush.msra.mxu3 %v1769_v56  ;;  %v1839_v3 = vld [vmem:[#allocation10 + $0x3e8] sm:$0xff]  ;;  %v1778_v56 = vld [vmem:[#allocation10 + $0x200] sm:$0xff] }
 0x486   : > { %vm3424_vm15 = vmand %vm1559_vm14, %vm1564_vm13  ;;  %v1423_v41 = vmul.f32 %v1421_v37, %v1404_v4  ;;  %1927 = vmatpush.msrb.mxu0 %v1788_v26  ;;  %v1767_v4 = vld [vmem:[#allocation10 + $0x1a8] sm:$0xff]  ;;  %v1785_v37 = vld [vmem:[#allocation10 + $0x238] sm:$0xff] }
 0x487   : > { %1943 = vmatpush.msrb.mxu1 %v1808_v51  ;;  %1911 = vmatpush.msra.mxu3 %v1768_v33  ;;  %v1818_v26 = vld [vmem:[#allocation10 + $0x340] sm:$0xff] }
 0x488   : > { %1459 = vperm.xlu1 %2430, %v1423_v41   ;;  %1928 = vmatpush.msrb.mxu0 %v1787_v28  ;;  %v1784_v41 = vld [vmem:[#allocation10 + $0x230] sm:$0xff]  ;;  %v1798_v51 = vld [vmem:[#allocation10 + $0x2a0] sm:$0xff]  ;;  %v1817_v28 = vld [vmem:[#allocation10 + $0x338] sm:$0xff] }
 0x489   : > { %1944 = vmatpush.msrb.mxu1 %v1807_v42  ;;  %1912 = vmatpush.msra.mxu3 %v1767_v4  ;;  %v1838_v33 = vld [vmem:[#allocation10 + $0x3e0] sm:$0xff]  ;;  %v1797_v42 = vld [vmem:[#allocation10 + $0x298] sm:$0xff] }
 0x48a   : > { %1929 = vmatpush.msrb.mxu0 %v1786_v36  ;;  %1969 = vmatpush.msrb.mxu2 %v1818_v26  ;;  %v1837_v4 = vld [vmem:[#allocation10 + $0x3d8] sm:$0xff]  ;;  %v1816_v36 = vld [vmem:[#allocation10 + $0x330] sm:$0xff] }
 0x48b   : > { %1945 = vmatpush.msrb.mxu1 %v1806_v32  ;;  %1913 = vmatpush.msra.mxu3 %v1766_v43  ;;  %v1796_v32 = vld [vmem:[#allocation10 + $0x290] sm:$0xff]  ;;  %v1593_v26 = vld [vmem:[#allocation8 + $0x38] sm:$0xff] }
 0x48c   : > { %1930 = vmatpush.msrb.mxu0 %v1785_v37  ;;  %1970 = vmatpush.msrb.mxu2 %v1817_v28  ;;  %v1836_v43 = vld [vmem:[#allocation10 + $0x3d0] sm:$0xff]  ;;  %v1815_v37 = vld [vmem:[#allocation10 + $0x328] sm:$0xff] }
 0x48d   : > { %v3431_v1 = vpop.permute.xlu2 %1568  ;;  %1946 = vmatpush.msrb.mxu1 %v1805_v60  ;;  %1914 = vmatpush.msra.mxu3 %v1765_v9  ;;  %v3453_v16 = vpop.permute.xlu0 %1332  ;;  %v766_v60 = vsel %vm3441_vm4, %v3391_v52, 0.0  ;;  %v1601_v9 = vld [vmem:[#allocation8 + $0x78] sm:$0xff]  ;;  %v1599_v52 = vld [vmem:[#allocation8 + $0x68] sm:$0xff] }
 0x48e   : > { %1931 = vmatpush.msrb.mxu0 %v1784_v41  ;;  %1971 = vmatpush.msrb.mxu2 %v1816_v36  ;;  %v1827_v28 = vld [vmem:[#allocation10 + $0x388] sm:$0xff]  ;;  %v1630_v36 = vld [vmem:[#allocation8 + $0x160] sm:$0xff]  ;;  %vm1334_vm10 = vcmp.lt.s32.totalorder %v3021_v10, %v3453_v16  ;;  %v1636_v16 = vld [vmem:[#allocation8 + $0x190] sm:$0xff] }
 0x48f   : > { %1947 = vmatpush.msrb.mxu1 %v1804_v54  ;;  %1915 = vmatpush.msra.mxu3 %v1764_v20  ;;  %v1835_v54 = vld [vmem:[#allocation10 + $0x3c8] sm:$0xff]  ;;  %v1794_v20 = vld [vmem:[#allocation10 + $0x280] sm:$0xff] }
 0x490   : > { %1574 = vperm.xlu1 %2430, %v1538_v22   ;;  %v1782_v22 = vld [vmem:[#allocation10 + $0x220] sm:$0xff]  ;;  %1932 = vmatpush.msrb.mxu0 %v1783_v49  ;;  %v1813_v49 = vld [vmem:[#allocation10 + $0x318] sm:$0xff] }
 0x491   : > { %1948 = vmatpush.msrb.mxu1 %v1803_v7  ;;  %1916 = vmatpush.msra.mxu3 %v1763_v46  ;;  %v1598_v7 = vld [vmem:[#allocation8 + $0x60] sm:$0xff]  ;;  %v1832_v46 = vld [vmem:[#allocation10 + $0x3b0] sm:$0xff] }
 0x492   : > { %1933 = vmatpush.msrb.mxu0 %v1782_v22  ;;  %1972 = vmatpush.msrb.mxu2 %v1815_v37  ;;  %v881_v22 = vsel %vm3441_vm4, %v3404_v40, 0.0  ;;  %v1810_v40 = vld [vmem:[#allocation10 + $0x300] sm:$0xff]  ;;  %v1611_v37 = vld [vmem:[#allocation8 + $0xc8] sm:$0xff] }
 0x493   : > { %1949 = vmatpush.msrb.mxu1 %v1802_v5  ;;  %1917 = vmatpush.msra.mxu3 %v1762_v0  ;;  %v1597_v5 = vld [vmem:[#allocation8 + $0x58] sm:$0xff] }
 0x494   : > { %1934 = vmatpush.msrb.mxu0 %v1781_v47  ;;  %1973 = vmatpush.msrb.mxu2 %v1814_v15  ;;  %v1617_v0 = vld [vmem:[#allocation8 + $0xf8] sm:$0xff] }
 0x495   : > { %1950 = vmatpush.msrb.mxu1 %v1801_v45  ;;  %1982 = vmatpush.msrb.mxu3 %v1841_v21  ;;  %v1596_v45 = vld [vmem:[#allocation8 + $0x50] sm:$0xff]  ;;  %v1589_v15 = vld [vmem:[#allocation8 + $0x18] sm:$0xff] }
 0x496   : > { %1935 = vmatpush.msrb.mxu0 %v1780_v48  ;;  %1974 = vmatpush.msrb.mxu2 %v1813_v49  ;;  %v1616_v21 = vld [vmem:[#allocation8 + $0xf0] sm:$0xff]  ;;  %v1831_v48 = vld [vmem:[#allocation10 + $0x3a8] sm:$0xff] }
 0x497   : > { %1951 = vmatpush.msrb.mxu1 %v1800_v11  ;;  %1983 = vmatpush.msrb.mxu3 %v1840_v34  ;;  %v1595_v11 = vld [vmem:[#allocation8 + $0x48] sm:$0xff]  ;;  %v1608_v49 = vld [vmem:[#allocation8 + $0xb0] sm:$0xff] }
 0x498   : > { %1936 = vmatpush.msrb.mxu0 %v1779_v53  ;;  %v1615_v34 = vld [vmem:[#allocation8 + $0xe8] sm:$0xff]  ;;  %v1829_v53 = vld [vmem:[#allocation10 + $0x398] sm:$0xff] }
 0x499   : > { %1952 = vmatpush.msrb.mxu1 %v1799_v57  ;;  %1984 = vmatpush.msrb.mxu3 %v1839_v3  ;;  %v1614_v57 = vld [vmem:[#allocation8 + $0xe0] sm:$0xff]  ;;  %v1632_v3 = vld [vmem:[#allocation8 + $0x170] sm:$0xff] }
 0x49a   : > { %1937 = vmatpush.msrb.mxu0 %v1778_v56  ;;  %v1828_v56 = vld [vmem:[#allocation10 + $0x390] sm:$0xff] }
 0x49b   : > { %1953 = vmatpush.msrb.mxu1 %v1798_v51  ;;  %1985 = vmatpush.msrb.mxu3 %v1838_v33  ;;  %v1613_v51 = vld [vmem:[#allocation8 + $0xd8] sm:$0xff]  ;;  %v1631_v33 = vld [vmem:[#allocation8 + $0x168] sm:$0xff] }
 0x49d   : > { %1954 = vmatpush.msrb.mxu1 %v1797_v42  ;;  %1986 = vmatpush.msrb.mxu3 %v1837_v4  ;;  %v1592_v42 = vld [vmem:[#allocation8 + $0x30] sm:$0xff] }
 0x49e   : > { %v1612_v4 = vld [vmem:[#allocation8 + $0xd0] sm:$0xff] }
 0x49f   : > { %1955 = vmatpush.msrb.mxu1 %v1796_v32  ;;  %1987 = vmatpush.msrb.mxu3 %v1836_v43  ;;  %v1826_v32 = vld [vmem:[#allocation10 + $0x380] sm:$0xff]  ;;  %v1591_v43 = vld [vmem:[#allocation8 + $0x28] sm:$0xff] }
 0x4a1   : > { %1988 = vmatpush.msrb.mxu3 %v1835_v54  ;;  %v1628_v54 = vld [vmem:[#allocation8 + $0x150] sm:$0xff] }
 0x4a2   : > { %v1000_v35 = vpop.permute.xlu2 %999 }
 0x4a3   : > { %v3450_v61 = vsel %vm3298_vm11, %v1000_v35, %v996_v62  ;;  %vm757_vm11 = vcmp.lt.s32.totalorder %v3021_v10, %v3292_v59  ;;  %v1795_v59 = vld [vmem:[#allocation10 + $0x288] sm:$0xff]  ;;  %v1833_v62 = vld [vmem:[#allocation10 + $0x3b8] sm:$0xff]  ;;  %v1812_v35 = vld [vmem:[#allocation10 + $0x310] sm:$0xff]  ;;  %1989 = vmatpush.msrb.mxu3 %v1834_v27 }
 0x4a4   : > { %1898 = vmatmul.f32.vlgmr.msra.gmra.mxu2 %v3450_v61  ;;  %vm758_vm6 = vmand %vm752_vm5, %vm757_vm11  ;;  %1956 = vmatpush.msrb.mxu1 %v1795_v59  ;;  %v1610_v59 = vld [vmem:[#allocation8 + $0xc0] sm:$0xff]  ;;  %v1588_v27 = vld [vmem:[#allocation8 + $0x10] sm:$0xff] }
 0x4a5   : > { %1990 = vmatpush.msrb.mxu3 %v1833_v62  ;;  %1975 = vmatpush.msrb.mxu2 %v1812_v35  ;;  %v1587_v62 = vld [vmem:[#allocation8 + $0x8] sm:$0xff] }
 0x4a6   : > { %1957 = vmatpush.msrb.mxu1 %v1794_v20  ;;  %v1627_v20 = vld [vmem:[#allocation8 + $0x148] sm:$0xff] }
 0x4a7   : > { %1991 = vmatpush.msrb.mxu3 %v1832_v46  ;;  %1976 = vmatpush.msrb.mxu2 %v1811_v38  ;;  %v1607_v35 = vld [vmem:[#allocation8 + $0xa8] sm:$0xff]  ;;  %v1586_v46 = vld [vmem:[#allocation8] sm:$0xff] }
 0x4a8   : > { %v1623_v38 = vld [vmem:[#allocation8 + $0x128] sm:$0xff] }
 0x4a9   : > { %1992 = vmatpush.msrb.mxu3 %v1831_v48  ;;  %1977 = vmatpush.msrb.mxu2 %v1810_v40  ;;  %v1603_v48 = vld [vmem:[#allocation8 + $0x88] sm:$0xff]  ;;  %v1621_v40 = vld [vmem:[#allocation8 + $0x118] sm:$0xff] }
 0x4ab   : > { %1993 = vmatpush.msrb.mxu3 %v1830_v2  ;;  %2042 = vmatpush.msra.mxu2 %v1633_v18  ;;  %v1602_v2 = vld [vmem:[#allocation8 + $0x80] sm:$0xff]  ;;  %v1649_v18 = vld [vmem:[#allocation8 + $0x1f8] sm:$0xff] }
 0x4ad   : > { %1994 = vmatpush.msrb.mxu3 %v1829_v53  ;;  %2043 = vmatpush.msra.mxu2 %v1632_v3  ;;  %v1620_v53 = vld [vmem:[#allocation8 + $0x110] sm:$0xff]  ;;  %v1619_v3 = vld [vmem:[#allocation8 + $0x108] sm:$0xff] }
 0x4af   : > { %1995 = vmatpush.msrb.mxu3 %v1828_v56  ;;  %2044 = vmatpush.msra.mxu2 %v1631_v33  ;;  %v1647_v56 = vld [vmem:[#allocation8 + $0x1e8] sm:$0xff]  ;;  %v1328_v33 = vpop.permute.xlu2 %1327 }
 0x4b0   : > { %vm1329_vm8 = vcmp.ge.s32.totalorder %v3021_v10, %v1328_v33 }
 0x4b1   : > { %1996 = vmatpush.msrb.mxu3 %v1827_v28  ;;  %2045 = vmatpush.msra.mxu2 %v1630_v36  ;;  %v1643_v28 = vld [vmem:[#allocation8 + $0x1c8] sm:$0xff]  ;;  %vm1335_vm12 = vmand %vm1329_vm8, %vm1334_vm10 }
 0x4b2   : > { %v770_v44 = vpop.permute.xlu0 %769 }
 0x4b3   : > { %v3462_v41 = vsel %vm758_vm6, %v770_v44, %v766_v60  ;;  %v3473_v60 = vpop.permute.xlu1 %1212  ;;  %v1629_v44 = vld [vmem:[#allocation8 + $0x158] sm:$0xff]  ;;  %1997 = vmatpush.msrb.mxu3 %v1826_v32 }
 0x4b4   : > { %1858 = vmatmul.f32.vlgmr.msra.gmra.mxu0 %v3462_v41  ;;  %2046 = vmatpush.msra.mxu2 %v1629_v44  ;;  %v1640_v44 = vld [vmem:[#allocation8 + $0x1b0] sm:$0xff] }
 0x4b5   : > { %2002 = vmatpush.msra.mxu0 %v1601_v9  ;;  %v1590_v9 = vld [vmem:[#allocation8 + $0x20] sm:$0xff] }
 0x4b6   : > { %2047 = vmatpush.msra.mxu2 %v1628_v54  ;;  %v1638_v54 = vld [vmem:[#allocation8 + $0x1a0] sm:$0xff] }
 0x4b7   : > { %2003 = vmatpush.msra.mxu0 %v1600_v30  ;;  %v1609_v30 = vld [vmem:[#allocation8 + $0xb8] sm:$0xff] }
 0x4b8   : > { %2048 = vmatpush.msra.mxu2 %v1627_v20 }
 0x4b9   : > { %2004 = vmatpush.msra.mxu0 %v1599_v52  ;;  %v1626_v52 = vld [vmem:[#allocation8 + $0x140] sm:$0xff] }
 0x4ba   : > { %v885_v29 = vpop.permute.xlu0 %884  ;;  %2049 = vmatpush.msra.mxu2 %v1626_v52  ;;  %v1661_v52 = vld [vmem:[#allocation8 + $0x258] sm:$0xff] }
 0x4bb   : > { %v3470_v47 = vsel %vm3324_vm9, %v885_v29, %v881_v22  ;;  %2005 = vmatpush.msra.mxu0 %v1598_v7  ;;  %v1625_v7 = vld [vmem:[#allocation8 + $0x138] sm:$0xff]  ;;  %v1606_v22 = vld [vmem:[#allocation8 + $0xa0] sm:$0xff]  ;;  %v1224_v29 = vpop.permute.xlu1 %1223  ;;  %vm1219_vm9 = vcmp.lt.s32.totalorder %v3021_v10, %v3416_v14  ;;  %v1339_v14 = vpop.permute.xlu2 %1338 }
 0x4bc   : > { %1878 = vmatmul.f32.vlgmr.msra.gmra.mxu1 %v3470_v47  ;;  %2050 = vmatpush.msra.mxu2 %v1625_v7  ;;  %v1226_v36 = vsel %vm3441_vm4, %v1224_v29, 0.0  ;;  %v1660_v7 = vld [vmem:[#allocation8 + $0x250] sm:$0xff]  ;;  %v641_v29 = vmax.f32 %v2911_v8, 0.0  ;;  %v1697_v8 = vld [vmem:[#allocation8 + $0x378] sm:$0xff] }
 0x4bd   : > { %2006 = vmatpush.msra.mxu0 %v1597_v5  ;;  %2022 = vmatpush.msra.mxu1 %v1617_v0  ;;  %v1624_v5 = vld [vmem:[#allocation8 + $0x130] sm:$0xff]  ;;  %v1605_v0 = vld [vmem:[#allocation8 + $0x98] sm:$0xff] }
 0x4be   : > { %2051 = vmatpush.msra.mxu2 %v1624_v5  ;;  %v1658_v5 = vld [vmem:[#allocation8 + $0x240] sm:$0xff] }
 0x4bf   : > { %2007 = vmatpush.msra.mxu0 %v1596_v45  ;;  %2023 = vmatpush.msra.mxu1 %v1616_v21  ;;  %v1604_v45 = vld [vmem:[#allocation8 + $0x90] sm:$0xff]  ;;  %v1622_v21 = vld [vmem:[#allocation8 + $0x120] sm:$0xff] }
 0x4c0   : > { %2052 = vmatpush.msra.mxu2 %v1623_v38  ;;  %v1456_v38 = vsel %vm3441_vm4, %v3435_v31, 0.0  ;;  %v1696_v31 = vld [vmem:[#allocation8 + $0x370] sm:$0xff] }
 0x4c1   : > { %2008 = vmatpush.msra.mxu0 %v1595_v11  ;;  %2024 = vmatpush.msra.mxu1 %v1615_v34  ;;  %v1111_v11 = vsel %vm3441_vm4, %v3408_v24, 0.0  ;;  %v1646_v24 = vld [vmem:[#allocation8 + $0x1e0] sm:$0xff] }
 0x4c2   : > { %2053 = vmatpush.msra.mxu2 %v1622_v21 }
 0x4c3   : > { %2009 = vmatpush.msra.mxu0 %v1594_v12  ;;  %2025 = vmatpush.msra.mxu1 %v1614_v57  ;;  %v1648_v57 = vld [vmem:[#allocation8 + $0x1f0] sm:$0xff] }
 0x4c4   : > { %2054 = vmatpush.msra.mxu2 %v1621_v40  ;;  %v1677_v40 = vld [vmem:[#allocation8 + $0x2d8] sm:$0xff] }
 0x4c5   : > { %2010 = vmatpush.msra.mxu0 %v1593_v26  ;;  %2026 = vmatpush.msra.mxu1 %v1613_v51  ;;  %v1618_v26 = vld [vmem:[#allocation8 + $0x100] sm:$0xff]  ;;  %v1645_v51 = vld [vmem:[#allocation8 + $0x1d8] sm:$0xff] }
 0x4c6   : > { %2055 = vmatpush.msra.mxu2 %v1620_v53  ;;  %v1675_v53 = vld [vmem:[#allocation8 + $0x2c8] sm:$0xff] }
 0x4c7   : > { %2011 = vmatpush.msra.mxu0 %v1592_v42  ;;  %2027 = vmatpush.msra.mxu1 %v1612_v4  ;;  %v1642_v42 = vld [vmem:[#allocation8 + $0x1c0] sm:$0xff]  ;;  %v1641_v4 = vld [vmem:[#allocation8 + $0x1b8] sm:$0xff] }
 0x4c8   : > { %2056 = vmatpush.msra.mxu2 %v1619_v3  ;;  %v1674_v3 = vld [vmem:[#allocation8 + $0x2c0] sm:$0xff] }
 0x4c9   : > { %2012 = vmatpush.msra.mxu0 %v1591_v43  ;;  %2028 = vmatpush.msra.mxu1 %v1611_v37  ;;  %v1665_v43 = vld [vmem:[#allocation8 + $0x278] sm:$0xff] }
 0x4ca   : > { %2057 = vmatpush.msra.mxu2 %v1618_v26  ;;  %v1694_v26 = vld [vmem:[#allocation8 + $0x360] sm:$0xff] }
 0x4cb   : > { %2013 = vmatpush.msra.mxu0 %v1590_v9  ;;  %2029 = vmatpush.msra.mxu1 %v1610_v59  ;;  %v1664_v9 = vld [vmem:[#allocation8 + $0x270] sm:$0xff]  ;;  %v1663_v59 = vld [vmem:[#allocation8 + $0x268] sm:$0xff] }
 0x4cd   : > { %2014 = vmatpush.msra.mxu0 %v1589_v15  ;;  %2030 = vmatpush.msra.mxu1 %v1609_v30  ;;  %v640_v15 = vmax.f32 %v2909_v6, 0.0  ;;  %v1662_v30 = vld [vmem:[#allocation8 + $0x260] sm:$0xff]  ;;  %v1637_v6 = vld [vmem:[#allocation8 + $0x198] sm:$0xff] }
 0x4cf   : > { %2015 = vmatpush.msra.mxu0 %v1588_v27  ;;  %2031 = vmatpush.msra.mxu1 %v1608_v49  ;;  %v1578_v20 = vmul.f32 %v3462_v41, %v640_v15  ;;  %v1341_v27 = vsel %vm3441_vm4, %v1339_v14, 0.0  ;;  %v1659_v41 = vld [vmem:[#allocation8 + $0x248] sm:$0xff]  ;;  %v1690_v14 = vld [vmem:[#allocation8 + $0x340] sm:$0xff] }
 0x4d0   : > { %v1710_v15 = vld [vmem:[#allocation8 + $0x3e0] sm:$0xff] }
 0x4d1   : > { %2016 = vmatpush.msra.mxu0 %v1587_v62  ;;  %2032 = vmatpush.msra.mxu1 %v1607_v35  ;;  %v1681_v62 = vld [vmem:[#allocation8 + $0x2f8] sm:$0xff] }
 0x4d3   : > { %2017 = vmatpush.msra.mxu0 %v1586_v46  ;;  %2033 = vmatpush.msra.mxu1 %v1606_v22  ;;  %v1679_v46 = vld [vmem:[#allocation8 + $0x2e8] sm:$0xff] }
 0x4d4   : > { %v1635_v22 = vld [vmem:[#allocation8 + $0x188] sm:$0xff] }
 0x4d5   : > { %2034 = vmatpush.msra.mxu1 %v1605_v0  ;;  %v1678_v0 = vld [vmem:[#allocation8 + $0x2e0] sm:$0xff] }
 0x4d7   : > { %2035 = vmatpush.msra.mxu1 %v1604_v45  ;;  %v1579_v45 = vmul.f32 %v3470_v47, %v641_v29  ;;  %v1655_v47 = vld [vmem:[#allocation8 + $0x228] sm:$0xff]  ;;  %v1705_v29 = vld [vmem:[#allocation8 + $0x3b8] sm:$0xff] }
 0x4d9   : > { %v1115_v34 = vpop.permute.xlu1 %1114  ;;  %2036 = vmatpush.msra.mxu1 %v1603_v48  ;;  %v1657_v48 = vld [vmem:[#allocation8 + $0x238] sm:$0xff] }
 0x4da   : > { %v3480_v12 = vsel %vm3312_vm1, %v1115_v34, %v1111_v11  ;;  %vm1214_vm1 = vcmp.ge.s32.totalorder %v3021_v10, %v3473_v60  ;;  %v1639_v60 = vld [vmem:[#allocation8 + $0x1a8] sm:$0xff]  ;;  %v1680_v10 = vld [vmem:[#allocation8 + $0x2f0] sm:$0xff]  ;;  %v1634_v11 = vld [vmem:[#allocation8 + $0x180] sm:$0xff] }
 0x4db   : > { %1918 = vmatmul.f32.vlgmr.msra.gmra.mxu3 %v3480_v12  ;;  %2037 = vmatpush.msra.mxu1 %v1602_v2  ;;  %vm1220_vm7 = vmand %vm1214_vm1, %vm1219_vm9  ;;  %v1656_v34 = vld [vmem:[#allocation8 + $0x230] sm:$0xff] }
 0x4dc   : > { %2062 = vmatpush.msra.mxu3 %v1649_v18  ;;  %v1676_v18 = vld [vmem:[#allocation8 + $0x2d0] sm:$0xff] }
 0x4de   : > { %2063 = vmatpush.msra.mxu3 %v1648_v57  ;;  %v1654_v57 = vld [vmem:[#allocation8 + $0x220] sm:$0xff] }
 0x4e0   : > { %2064 = vmatpush.msra.mxu3 %v1647_v56  ;;  %v642_v56 = vmax.f32 %v2921_v13, 0.0  ;;  %v1693_v13 = vld [vmem:[#allocation8 + $0x358] sm:$0xff] }
 0x4e2   : > { %2065 = vmatpush.msra.mxu3 %v1646_v24  ;;  %v1571_v24 = vsel %vm3441_vm4, %v3431_v1, 0.0  ;;  %v1580_v33 = vmul.f32 %v3450_v61, %v642_v56  ;;  %v1672_v1 = vld [vmem:[#allocation8 + $0x2b0] sm:$0xff] }
 0x4e3   : > { %v1712_v61 = vld [vmem:[#allocation8 + $0x3f0] sm:$0xff] }
 0x4e4   : > { %2066 = vmatpush.msra.mxu3 %v1645_v51 }
 0x4e6   : > { %2067 = vmatpush.msra.mxu3 %v1644_v50  ;;  %v1653_v50 = vld [vmem:[#allocation8 + $0x218] sm:$0xff] }
 0x4e8   : > { %2068 = vmatpush.msra.mxu3 %v1643_v28 }
 0x4ea   : > { %v1230_v32 = vpop.permute.xlu1 %1229  ;;  %2069 = vmatpush.msra.mxu3 %v1642_v42  ;;  %v1673_v42 = vld [vmem:[#allocation8 + $0x2b8] sm:$0xff] }
 0x4eb   : > { %v3489_v37 = vsel %vm1220_vm7, %v1230_v32, %v1226_v36  ;;  %v1652_v36 = vld [vmem:[#allocation8 + $0x210] sm:$0xff]  ;;  %v1651_v32 = vld [vmem:[#allocation8 + $0x208] sm:$0xff] }
 0x4ec   : > { %1938 = vmatmul.f32.vlgmr.msrb.gmra.mxu0 %v3489_v37  ;;  %2070 = vmatpush.msra.mxu3 %v1641_v4  ;;  %v1713_v4 = vld [vmem:[#allocation8 + $0x3f8] sm:$0xff] }
 0x4ed   : > { %2082 = vmatpush.msrb.mxu0 %v1665_v43  ;;  %v1691_v43 = vld [vmem:[#allocation8 + $0x348] sm:$0xff] }
 0x4ee   : > { %2071 = vmatpush.msra.mxu3 %v1640_v44  ;;  %v1711_v44 = vld [vmem:[#allocation8 + $0x3e8] sm:$0xff] }
 0x4ef   : > { %2083 = vmatpush.msrb.mxu0 %v1664_v9  ;;  %v1650_v9 = vld [vmem:[#allocation8 + $0x200] sm:$0xff] }
 0x4f0   : > { %2072 = vmatpush.msra.mxu3 %v1639_v60  ;;  %v644_v60 = vmax.f32 %v2925_v17, 0.0  ;;  %v1709_v17 = vld [vmem:[#allocation8 + $0x3d8] sm:$0xff] }
 0x4f1   : > { %2084 = vmatpush.msrb.mxu0 %v1663_v59  ;;  %v1670_v59 = vld [vmem:[#allocation8 + $0x2a0] sm:$0xff] }
 0x4f2   : > { %v1345_v49 = vpop.permute.xlu0 %1344  ;;  %2073 = vmatpush.msra.mxu3 %v1638_v54  ;;  %v643_v54 = vmax.f32 %v2917_v63, 0.0  ;;  %v1688_v63 = vld [vmem:[#allocation8 + $0x330] sm:$0xff] }
 0x4f3   : > { %2085 = vmatpush.msrb.mxu0 %v1662_v30  ;;  %v3499_v35 = vsel %vm1335_vm12, %v1345_v49, %v1341_v27  ;;  %v1582_v30 = vmul.f32 %v3489_v37, %v644_v60  ;;  %v1689_v49 = vld [vmem:[#allocation8 + $0x338] sm:$0xff]  ;;  %v1687_v37 = vld [vmem:[#allocation8 + $0x328] sm:$0xff] }
 0x4f4   : > { %1958 = vmatmul.f32.vlgmr.msrb.gmra.mxu1 %v3499_v35  ;;  %2018 = vmatmul.f32.vlgmr.msra.gmra.mxu0 %v1578_v20  ;;  %v1669_v20 = vld [vmem:[#allocation8 + $0x298] sm:$0xff]  ;;  %v1581_v27 = vmul.f32 %v3480_v12, %v643_v54  ;;  %v1666_v12 = vld [vmem:[#allocation8 + $0x280] sm:$0xff] }
 0x4f5   : > { %2086 = vmatpush.msrb.mxu0 %v1661_v52  ;;  %2102 = vmatpush.msrb.mxu1 %v1681_v62  ;;  %v1668_v52 = vld [vmem:[#allocation8 + $0x290] sm:$0xff] }
 0x4f6   : > { %2074 = vmatpush.msra.mxu3 %v1637_v6  ;;  %v1708_v62 = vld [vmem:[#allocation8 + $0x3d0] sm:$0xff]  ;;  %v1667_v6 = vld [vmem:[#allocation8 + $0x288] sm:$0xff] }
 0x4f7   : > { %2087 = vmatpush.msrb.mxu0 %v1660_v7  ;;  %2103 = vmatpush.msrb.mxu1 %v1680_v10  ;;  %v1707_v7 = vld [vmem:[#allocation8 + $0x3c8] sm:$0xff]  ;;  %v645_v10 = vmax.f32 %v2927_v19, 0.0  ;;  %v646_v19 = vmax.f32 %v2935_v25, 0.0 }
 0x4f8   : > { %2075 = vmatpush.msra.mxu3 %v1636_v16  ;;  %v1686_v16 = vld [vmem:[#allocation8 + $0x320] sm:$0xff] }
 0x4f9   : > { %2088 = vmatpush.msrb.mxu0 %v1659_v41  ;;  %2104 = vmatpush.msrb.mxu1 %v1679_v46  ;;  %v1706_v41 = vld [vmem:[#allocation8 + $0x3c0] sm:$0xff]  ;;  %v1583_v46 = vmul.f32 %v3499_v35, %v645_v10 }
 0x4fa   : > { %v1460_v21 = vpop.permute.xlu1 %1459  ;;  %2076 = vmatpush.msra.mxu3 %v1635_v22  ;;  %v1685_v22 = vld [vmem:[#allocation8 + $0x318] sm:$0xff] }
 0x4fb   : > { %v3509_v2 = vsel %vm3334_vm0, %v1460_v21, %v1456_v38  ;;  %2089 = vmatpush.msrb.mxu0 %v1658_v5  ;;  %2105 = vmatpush.msrb.mxu1 %v1678_v0  ;;  %v1684_v5 = vld [vmem:[#allocation8 + $0x310] sm:$0xff]  ;;  %v1683_v38 = vld [vmem:[#allocation8 + $0x308] sm:$0xff]  ;;  %v1682_v21 = vld [vmem:[#allocation8 + $0x300] sm:$0xff] }
 0x4fc   : > { %1978 = vmatmul.f32.vlgmr.msrb.gmra.mxu2 %v3509_v2  ;;  %2038 = vmatmul.f32.vlgmr.msra.gmra.mxu1 %v1579_v45  ;;  %v1704_v0 = vld [vmem:[#allocation8 + $0x3b0] sm:$0xff]  ;;  %v1703_v45 = vld [vmem:[#allocation8 + $0x3a8] sm:$0xff]  ;;  %v1584_v35 = vmul.f32 %v3509_v2, %v646_v19 }
 0x4fd   : > { %2090 = vmatpush.msrb.mxu0 %v1657_v48  ;;  %2106 = vmatpush.msrb.mxu1 %v1677_v40  ;;  %v1702_v48 = vld [vmem:[#allocation8 + $0x3a0] sm:$0xff]  ;;  %v1701_v40 = vld [vmem:[#allocation8 + $0x398] sm:$0xff] }
 0x4fe   : > { %2122 = vmatpush.msrb.mxu2 %v1697_v8  ;;  %2077 = vmatpush.msra.mxu3 %v1634_v11  ;;  %v1700_v8 = vld [vmem:[#allocation8 + $0x390] sm:$0xff]  ;;  %v1699_v11 = vld [vmem:[#allocation8 + $0x388] sm:$0xff] }
 0x4ff   : > { %2091 = vmatpush.msrb.mxu0 %v1656_v34  ;;  %2107 = vmatpush.msrb.mxu1 %v1676_v18  ;;  %v647_v34 = vmax.f32 %v2933_v23, 0.0  ;;  %v1698_v18 = vld [vmem:[#allocation8 + $0x380] sm:$0xff] }
 0x500   : > { %2123 = vmatpush.msrb.mxu2 %v1696_v31 }
 0x501   : > { %2092 = vmatpush.msrb.mxu0 %v1655_v47  ;;  %2108 = vmatpush.msrb.mxu1 %v1675_v53 }
 0x502   : > { %2124 = vmatpush.msrb.mxu2 %v1695_v55  ;;  %v1575_v51 = vpop.permute.xlu1 %1574 }
 0x503   : > { %v3519_v28 = vsel %vm3424_vm15, %v1575_v51, %v1571_v24  ;;  %2093 = vmatpush.msrb.mxu0 %v1654_v57  ;;  %2109 = vmatpush.msrb.mxu1 %v1674_v3 }
 0x504   : > { %2125 = vmatpush.msrb.mxu2 %v1694_v26  ;;  %1998 = vmatmul.f32.vlgmr.msrb.gmra.mxu3 %v3519_v28  ;;  %v1585_v25 = vmul.f32 %v3519_v28, %v647_v34 }
 0x505   : > { %2058 = vmatmul.f32.vlgmr.msra.gmra.mxu2 %v1580_v33  ;;  %2094 = vmatpush.msrb.mxu0 %v1653_v50 }
 0x506   : > { %2110 = vmatpush.msrb.mxu1 %v1673_v42  ;;  %2126 = vmatpush.msrb.mxu2 %v1693_v13 }
 0x507   : > { %2142 = vmatpush.msrb.mxu3 %v1713_v4  ;;  %2095 = vmatpush.msrb.mxu0 %v1652_v36 }
 0x508   : > { %2111 = vmatpush.msrb.mxu1 %v1672_v1  ;;  %2127 = vmatpush.msrb.mxu2 %v1692_v39 }
 0x509   : > { %2143 = vmatpush.msrb.mxu3 %v1712_v61  ;;  %2096 = vmatpush.msrb.mxu0 %v1651_v32 }
 0x50a   : > { %2112 = vmatpush.msrb.mxu1 %v1671_v58  ;;  %2128 = vmatpush.msrb.mxu2 %v1691_v43 }
 0x50b   : > { %2144 = vmatpush.msrb.mxu3 %v1711_v44  ;;  %2097 = vmatpush.msrb.mxu0 %v1650_v9 }
 0x50c   : > { %2113 = vmatpush.msrb.mxu1 %v1670_v59  ;;  %2129 = vmatpush.msrb.mxu2 %v1690_v14  ;;  %v2432_v14 = vld [vmem:[%s3575_s5] ss:$0 sm:$0xff] }
 0x50d   : > { %2145 = vmatpush.msrb.mxu3 %v1710_v15  ;;  %2098 = vmatmul.f32.vlgmr.msrb.gmra.mxu0 %v1582_v30 }
 0x50e   : > { %2078 = vmatmul.f32.vlgmr.msra.gmra.mxu3 %v1581_v27  ;;  %2114 = vmatpush.msrb.mxu1 %v1669_v20 }
 0x50f   : > { %2130 = vmatpush.msrb.mxu2 %v1689_v49  ;;  %2146 = vmatpush.msrb.mxu3 %v1709_v17 }
 0x510   : > { %2115 = vmatpush.msrb.mxu1 %v1668_v52 }
 0x511   : > { %2131 = vmatpush.msrb.mxu2 %v1688_v63  ;;  %2147 = vmatpush.msrb.mxu3 %v1708_v62 }
 0x512   : > { %2116 = vmatpush.msrb.mxu1 %v1667_v6 }
 0x513   : > { %2132 = vmatpush.msrb.mxu2 %v1687_v37  ;;  %2148 = vmatpush.msrb.mxu3 %v1707_v7 }
 0x514   : > { %2117 = vmatpush.msrb.mxu1 %v1666_v12 }
 0x515   : > { %2133 = vmatpush.msrb.mxu2 %v1686_v16  ;;  %2149 = vmatpush.msrb.mxu3 %v1706_v41 }
 0x516   : > { %2118 = vmatmul.f32.vlgmr.msrb.gmra.mxu1 %v1583_v46 }
 0x517   : > { %2134 = vmatpush.msrb.mxu2 %v1685_v22  ;;  %2150 = vmatpush.msrb.mxu3 %v1705_v29 }
 0x519   : > { %2135 = vmatpush.msrb.mxu2 %v1684_v5  ;;  %2151 = vmatpush.msrb.mxu3 %v1704_v0 }
 0x51b   : > { %2136 = vmatpush.msrb.mxu2 %v1683_v38  ;;  %2152 = vmatpush.msrb.mxu3 %v1703_v45 }
 0x51d   : > { %2137 = vmatpush.msrb.mxu2 %v1682_v21  ;;  %2153 = vmatpush.msrb.mxu3 %v1702_v48 }
 0x51e   : > { %2138 = vmatmul.f32.vlgmr.msrb.gmra.mxu2 %v1584_v35 }
 0x51f   : > { %2154 = vmatpush.msrb.mxu3 %v1701_v40 }
 0x521   : > { %2155 = vmatpush.msrb.mxu3 %v1700_v8 }
 0x523   : > { %2156 = vmatpush.msrb.mxu3 %v1699_v11 }
 0x525   : > { %2157 = vmatpush.msrb.mxu3 %v1698_v18 }
 0x526   : > { %2158 = vmatmul.f32.vlgmr.msrb.gmra.mxu3 %v1585_v25 }
 0x527   : > { %v1899_v2 = vpop.f32.mrf.mxu2 }
 0x531   : > { %v1859_v31 = vpop.f32.mrf.mxu0 }
 0x539   : > { %v1879_v47 = vpop.f32.mrf.mxu1 }
 0x53a   : > { %v1880_v53 = vadd.f32 %v1879_v47, %v1859_v31 }
 0x53c   : > { %v1900_v57 = vadd.f32 %v1899_v2, %v1880_v53 }
 0x55e   : > { %v1919_v55 = vpop.f32.mrf.mxu3 }
 0x55f   : > { %v1920_v56 = vadd.f32 %v1919_v55, %v1900_v57 }
 0x569   : > { %v1939_v3 = vpop.f32.mrf.mxu0 }
 0x56a   : > { %v1940_v24 = vadd.f32 %v1939_v3, %v1920_v56 }
 0x571   : > { %v1959_v26 = vpop.f32.mrf.mxu1  ;;  %v2019_v13 = vpop.f32.mrf.mxu0 }
 0x572   : > { %v1960_v50 = vadd.f32 %v1959_v26, %v1940_v24 }
 0x579   : > { %v2039_v4 = vpop.f32.mrf.mxu1 }
 0x57f   : > { %v1979_v51 = vpop.f32.mrf.mxu2 }
 0x580   : > { %v1980_v33 = vadd.f32 %v1979_v51, %v1960_v50 }
 0x587   : > { %v1999_v23 = vpop.f32.mrf.mxu3 }
 0x588   : > { %v2000_v42 = vadd.f32 %v1999_v23, %v1980_v33  ;;  %v2059_v1 = vpop.f32.mrf.mxu2 }
 0x58a   : > { %v2020_v28 = vadd.f32 %v2019_v13, %v2000_v42  ;;  %v2099_v58 = vpop.f32.mrf.mxu0 }
 0x58c   : > { %v2040_v36 = vadd.f32 %v2039_v4, %v2020_v28 }
 0x58e   : > { %v2060_v39 = vadd.f32 %v2059_v1, %v2040_v36 }
 0x591   : > { %v2079_v61 = vpop.f32.mrf.mxu3 }
 0x592   : > { %v2080_v32 = vadd.f32 %v2079_v61, %v2060_v39 }
 0x593   : > { %v2119_v44 = vpop.f32.mrf.mxu1 }
 0x594   : > { %v2100_v43 = vadd.f32 %v2099_v58, %v2080_v32 }
 0x596   : > { %v2120_v60 = vadd.f32 %v2119_v44, %v2100_v43 }
 0x5a1   : > { %v2139_v9 = vpop.f32.mrf.mxu2 }
 0x5a2   : > { %v2140_v59 = vadd.f32 %v2139_v9, %v2120_v60 }
 0x5a9   : > { %v2159_v54 = vpop.f32.mrf.mxu3 }
 0x5aa   : > { %v2160_v15 = vadd.f32 %v2159_v54, %v2140_v59 }
 0x5ac   : > { %v2166_v30 = vadd.f32 %v2432_v14, %v2160_v15 }
 0x5ae   : > { %2167 = vst [vmem:[%s332_s7] sm:$0xff] %v2166_v30 }
 0x5af   : > { %2658 = shalt.err (!%p2655_p9)
}
 0x5b0   : > { %2330 = dma.vmem_to_hbm [thread:$0]  (%p2847_p4), %s2182_s1, 128, %s2184_s29, %s2169_s28  }
 0x5b1 PF: > { %s2195_s16 = sand.u32 1, %s2693_s21   ;;  %p3600_p10 = scmp.ge.s32.totalorder %s2705_s24, 2 }
 0x5b2   : > { %s2196_s20 = scalar_lea.sflag [#allocation4], %s2195_s16 }
 0x5b3   : > { %p2350_p13 = pnand %p3600_p10, %p2851_p6 }
 0x5b5   : > { %p2351_p11 = pneg %p2350_p13 }
 0x5b7   : > { %2688 = dma.done.wait (%p2351_p11), %s2196_s20, 128  }
 0x5b8   : > { %2690 = vsyncadd (%p2351_p11), %s2196_s20, 4294967168  ;;  %p21_p0 = scmp.ge.s32.totalorder %s2821_s12, 4   ;;  %s3601_s21 = smov %s2697_s22 }
 0x5b9   : > { %s3602_s22 = smov %s2701_s23  ;;  %s3603_s23 = smov %s2832_s15 }
 0x5ba   : > { %s3604_s24 = smov %s2821_s12  ;;  %23 = sbr.rel (!%p21_p0) target bundleno = 9 (0x9), region = 105 }
 0x5bf   :  { %2202 = vsyncpa [#allocation3], 1 }
 0x5c0   :  { %2204 = vsyncpa [#allocation3 + $0x1], 1 }
 0x5c1   :  { %2205 = vsyncpa [#allocation6], 1 }
 0x5c2   :  { %2206 = vsyncpa [#allocation9], 1 }
 0x5c3   :  { %2207 = vsyncpa [#allocation4], 1 }
 0x5c4   :  { %2209 = vsyncpa [#allocation4 + $0x1], 1 }

</bundles_post_ra>
